<compile_context>
chip_gen: v6e
topology: v6e:2x2x1
jax: 0.10.0
libtpu: 0.0.40
codegen_flags: <defaults>
</compile_context>

<pallas_src>
import math

import jax
import jax.numpy as jnp
from jax.experimental import pallas as pl
from jax.experimental.pallas import tpu as pltpu

# ---------------- config (small synthetic DPR/BERT encoder) ----------------
VOCAB = 128
D_MODEL = 32
N_HEADS = 4
D_HEAD = 8
INNER = N_HEADS * D_HEAD          # 32
QKV = 3 * INNER                   # 96
D_FF = 64
N_LAYERS = 2
MAX_POS = 32
LN_EPS = 1e-12
NEG_INF = float(jnp.finfo(jnp.float32).min)


def _layernorm(x, w, b):
    """LayerNorm with one-pass stats (E[x^2] - mean^2), BERT eps=1e-12."""
    mu = jnp.mean(x, axis=-1, keepdims=True)
    var = jnp.mean(x * x, axis=-1, keepdims=True) - mu * mu
    return (x - mu) * jax.lax.rsqrt(var + LN_EPS) * w + b


def _erf(z):
    """Abramowitz & Stegun 7.1.26 erf (|abs err| <= 1.5e-7): matches exact-GELU numerics
    in fp32 while using only ops guaranteed to lower in Mosaic (abs/exp/where)."""
    a1, a2, a3, a4, a5 = (0.254829592, -0.284496736, 1.421413741,
                          -1.453152027, 1.061405429)
    az = jnp.abs(z)
    t = 1.0 / (1.0 + 0.3275911 * az)
    poly = ((((a5 * t + a4) * t + a3) * t + a2) * t + a1) * t
    e = 1.0 - poly * jnp.exp(-az * az)
    return jnp.where(z >= 0.0, e, -e)


def _gelu_exact(x):
    """Exact (erf-based) GELU, as used by HF BERT/DPR."""
    return 0.5 * x * (1.0 + _erf(x * (1.0 / math.sqrt(2.0))))


# ---------------- fused dual-encoder Pallas kernel (one grid step per encoder) ----------------
def _make_combined_kernel(B, S):
    BS = B * S
    scale = 1.0 / math.sqrt(D_HEAD)

    def kernel(ids_ref, mask_ref, wemb_ref, postok_ref, vecs_ref, b96_ref,
               wqkv_ref, wo_ref, wi_ref, wo2_ref, out_ref):
        # ---- embeddings: in-VMEM token gather via one-hot matmul ----
        ids = ids_ref[...]                                              # (BS, 1) int32
        onehot = (jax.lax.broadcasted_iota(jnp.int32, (BS, VOCAB), 1) == ids
                  ).astype(jnp.float32)                                 # (BS, VOCAB)
        x = jnp.dot(onehot, wemb_ref[...], preferred_element_type=jnp.float32)
        # + position + token-type(0) embeddings, broadcast over batch in-kernel
        x = (x.reshape(B, S, D_MODEL) + postok_ref[0:S, :][None, :, :]
             ).reshape(BS, D_MODEL)
        x = _layernorm(x, vecs_ref[0:1, :], vecs_ref[1:2, :])

        # additive attention mask (hoisted): (B, 1, S); 0 attend / finfo.min masked
        mask3 = ((1.0 - mask_ref[...]) * NEG_INF)[:, None, :]

        for l in range(N_LAYERS):
            r = 2 + 6 * l
            bo_l = vecs_ref[r + 0:r + 1, :]
            ln1w = vecs_ref[r + 1:r + 2, :]
            ln1b = vecs_ref[r + 2:r + 3, :]
            bo2_l = vecs_ref[r + 3:r + 4, :]
            ln2w = vecs_ref[r + 4:r + 5, :]
            ln2b = vecs_ref[r + 5:r + 6, :]
            b96 = b96_ref[l]                                            # (2, 96)
            bqkv_l = b96[0:1, :]                                        # (1, 96)
            bi_l = b96[1:2, 0:D_FF]                                     # (1, 64)

            # --- self-attention: fused QKV projection, all B*S rows per matmul ---
            qkv = jnp.dot(x, wqkv_ref[l], preferred_element_type=jnp.float32) + bqkv_l
            qkv3 = qkv.reshape(B, S, QKV)           # free reshape (splits sublane dim)
            wo_l = wo_ref[l]                        # (INNER, D)

            acc = None
            for h in range(N_HEADS):                # heads only; batch is a dot batch dim
                qh = qkv3[:, :, h * D_HEAD:(h + 1) * D_HEAD]
                kh = qkv3[:, :, INNER + h * D_HEAD:INNER + (h + 1) * D_HEAD]
                vh = qkv3[:, :, 2 * INNER + h * D_HEAD:2 * INNER + (h + 1) * D_HEAD]
                # q @ k^T for all batches at once (no materialized transpose)
                s = jax.lax.dot_general(qh, kh, (((2,), (2,)), ((0,), (0,))),
                                        preferred_element_type=jnp.float32)   # (B,S,S)
                s = s * scale + mask3
                m = jnp.max(s, axis=-1, keepdims=True)
                p = jnp.exp(s - m)
                attn = p / jnp.sum(p, axis=-1, keepdims=True)                 # exact softmax
                ctx = jax.lax.dot_general(attn, vh, (((2,), (1,)), ((0,), (0,))),
                                          preferred_element_type=jnp.float32)  # (B,S,Dh)
                # fold the output projection per head (merges heads for free)
                contrib = jnp.dot(ctx.reshape(BS, D_HEAD),
                                  wo_l[h * D_HEAD:(h + 1) * D_HEAD, :],
                                  preferred_element_type=jnp.float32)          # (BS, D)
                acc = contrib if acc is None else acc + contrib
            x = _layernorm(x + acc + bo_l, ln1w, ln1b)

            # --- feed-forward: wi -> exact GELU -> wo (all fused, no HBM round-trips) ---
            h_mid = jnp.dot(x, wi_ref[l], preferred_element_type=jnp.float32) + bi_l
            h_mid = _gelu_exact(h_mid)
            ffn = jnp.dot(h_mid, wo2_ref[l], preferred_element_type=jnp.float32) + bo2_l
            x = _layernorm(x + ffn, ln2w, ln2b)

        # ---- DPR pooling: CLS row of each sequence (direct row copies, no matmul) ----
        for b in range(B):
            out_ref[b:b + 1, :] = x[b * S:b * S + 1, :]

    return kernel


def _enc_block_spec(shape):
    """Per-encoder whole-array block: leading encoder dim squeezed, trailing dims full."""
    n = len(shape) - 1
    return pl.BlockSpec((None,) + tuple(int(d) for d in shape[1:]),
                        lambda e, _n=n: (e,) + (0,) * _n)


def dpr_combined_forward(packed, question_input_ids, question_attention_mask,
                         context_input_ids, context_attention_mask):
    """DPRCombinedModel.forward -> (question pooled, context pooled) in ONE pallas_call."""
    B, SQ = question_input_ids.shape
    Bc, SC = context_input_ids.shape
    assert B == Bc
    S = max(SQ, SC)

    def pad_to(t, s):
        return jnp.pad(t, ((0, 0), (0, S - s)))

    ids = jnp.stack([pad_to(question_input_ids.astype(jnp.int32), SQ),
                     pad_to(context_input_ids.astype(jnp.int32), SC)]
                    ).reshape(2, B * S, 1)                              # (2, BS, 1)
    mask = jnp.stack([pad_to(question_attention_mask.astype(jnp.float32), SQ),
                      pad_to(context_attention_mask.astype(jnp.float32), SC)])  # (2, B, S)

    operands = (ids, mask, packed["word_emb"], packed["postok"], packed["vecs32"],
                packed["bias96"], packed["wqkv"], packed["wo"], packed["wi"],
                packed["wo2"])
    out = pl.pallas_call(
        _make_combined_kernel(B, S),
        grid=(2,),                                   # encoder axis: question / context
        out_shape=jax.ShapeDtypeStruct((2, B, D_MODEL), jnp.float32),
        in_specs=[_enc_block_spec(op.shape) for op in operands],
        out_specs=_enc_block_spec((2, B, D_MODEL)),
        compiler_params=pltpu.CompilerParams(dimension_semantics=("parallel",)),
    )(*operands)
    return out[0], out[1]


# ---------------- parameters (deterministic synthetic init, layer-stacked) ----------------
def init_encoder_params(key):
    keys = iter(jax.random.split(key, 20))

    def nrm(shape, scl=0.05):
        return (scl * jax.random.normal(next(keys), shape)).astype(jnp.float32)

    L = N_LAYERS
    return {
        "word_emb": nrm((VOCAB, D_MODEL), 1.0),
        "pos_emb": nrm((MAX_POS, D_MODEL), 0.1),
        "tok_emb": nrm((2, D_MODEL), 0.1),
        "emb_ln_w": 1.0 + nrm((1, D_MODEL), 0.1),
        "emb_ln_b": nrm((1, D_MODEL), 0.05),
        "wqkv": nrm((L, D_MODEL, QKV)),
        "bqkv": nrm((L, 1, QKV), 0.02),
        "wo": nrm((L, INNER, D_MODEL)),
        "bo": nrm((L, 1, D_MODEL), 0.02),
        "ln1_w": 1.0 + nrm((L, 1, D_MODEL), 0.1),
        "ln1_b": nrm((L, 1, D_MODEL), 0.05),
        "wi": nrm((L, D_MODEL, D_FF)),
        "bi": nrm((L, 1, D_FF), 0.02),
        "wo2": nrm((L, D_FF, D_MODEL)),
        "bo2": nrm((L, 1, D_MODEL), 0.02),
        "ln2_w": 1.0 + nrm((L, 1, D_MODEL), 0.1),
        "ln2_b": nrm((L, 1, D_MODEL), 0.05),
    }


def _pack_encoder(p):
    """Pack small per-layer vectors into two operands (fewer DMA descriptors)."""
    rows = [p["emb_ln_w"], p["emb_ln_b"]]
    for l in range(N_LAYERS):
        rows += [p["bo"][l], p["ln1_w"][l], p["ln1_b"][l],
                 p["bo2"][l], p["ln2_w"][l], p["ln2_b"][l]]
    vecs32 = jnp.concatenate(rows, axis=0)                                # (2+6L, D)
    bi_pad = jnp.pad(p["bi"], ((0, 0), (0, 0), (0, QKV - D_FF)))          # (L, 1, 96)
    bias96 = jnp.concatenate([p["bqkv"], bi_pad], axis=1)                 # (L, 2, 96)
    postok = p["pos_emb"] + p["tok_emb"][0:1]                             # (MAX_POS, D)
    return {"word_emb": p["word_emb"], "postok": postok, "vecs32": vecs32,
            "bias96": bias96, "wqkv": p["wqkv"], "wo": p["wo"],
            "wi": p["wi"], "wo2": p["wo2"]}


def pack_dpr_params(params):
    """Stack question/context encoder params along a leading encoder axis (done once)."""
    q = _pack_encoder(params["question_encoder"])
    c = _pack_encoder(params["context_encoder"])
    return {k: jnp.stack([q[k], c[k]], axis=0) for k in q}


# ---------------- pure-JAX reference (sanity check of the fused kernel) ----------------
def _encoder_reference(p, input_ids, attention_mask):
    B, S = input_ids.shape
    x = p["word_emb"][input_ids] + p["pos_emb"][:S][None, :, :] + p["tok_emb"][0][None, None, :]
    x = _layernorm(x, p["emb_ln_w"], p["emb_ln_b"])
    mask_add = (1.0 - attention_mask.astype(jnp.float32))[:, None, None, :] * NEG_INF
    for l in range(N_LAYERS):
        qkv = x @ p["wqkv"][l] + p["bqkv"][l]
        q, k, v = jnp.split(qkv, 3, axis=-1)

        def split_heads(t):
            return t.reshape(B, S, N_HEADS, D_HEAD).transpose(0, 2, 1, 3)

        q, k, v = split_heads(q), split_heads(k), split_heads(v)
        s = jnp.einsum("bhqd,bhkd->bhqk", q, k) / math.sqrt(D_HEAD) + mask_add
        a = jax.nn.softmax(s, axis=-1)
        ctx = jnp.einsum("bhqk,bhkd->bhqd", a, v).transpose(0, 2, 1, 3).reshape(B, S, INNER)
        x = _layernorm(x + ctx @ p["wo"][l] + p["bo"][l], p["ln1_w"][l], p["ln1_b"][l])
        h = jax.nn.gelu(x @ p["wi"][l] + p["bi"][l], approximate=False)   # exact erf GELU
        x = _layernorm(x + h @ p["wo2"][l] + p["bo2"][l], p["ln2_w"][l], p["ln2_b"][l])
    return x[:, 0, :]


if __name__ == "__main__":
    key = jax.random.PRNGKey(0)
    kq, kc, kiq, kic = jax.random.split(key, 4)
    params = {"question_encoder": init_encoder_params(kq),
              "context_encoder": init_encoder_params(kc)}
    packed = pack_dpr_params(params)          # parameter packing done once, outside jit

    B, SQ, SC = 2, 8, 16
    question_input_ids = jax.random.randint(kiq, (B, SQ), 0, VOCAB, dtype=jnp.int32)
    context_input_ids = jax.random.randint(kic, (B, SC), 0, VOCAB, dtype=jnp.int32)
    question_attention_mask = jnp.array([[1] * SQ, [1] * (SQ - 2) + [0] * 2], dtype=jnp.int32)
    context_attention_mask = jnp.array([[1] * SC, [1] * (SC - 4) + [0] * 4], dtype=jnp.int32)

    fwd = jax.jit(dpr_combined_forward)
    q_pooled, c_pooled = fwd(packed, question_input_ids, question_attention_mask,
                             context_input_ids, context_attention_mask)
    jax.block_until_ready((q_pooled, c_pooled))

    assert q_pooled.shape == (B, D_MODEL) and c_pooled.shape == (B, D_MODEL)
    assert q_pooled.dtype == jnp.float32 and c_pooled.dtype == jnp.float32

    # sanity check vs pure-JAX reference (exact GELU / exact softmax -> tight tolerance;
    # remaining slack covers fp32 accumulation-order differences between MXU and XLA)
    with jax.default_matmul_precision("highest"):
        q_ref = _encoder_reference(params["question_encoder"],
                                   question_input_ids, question_attention_mask)
        c_ref = _encoder_reference(params["context_encoder"],
                                   context_input_ids, context_attention_mask)
    assert jnp.allclose(q_pooled, q_ref, rtol=2e-3, atol=2e-4), "question encoder mismatch"
    assert jnp.allclose(c_pooled, c_ref, rtol=2e-3, atol=2e-4), "context encoder mismatch"

    print("KERNEL_OK")
</pallas_src>

<mosaic_0001>
module attributes {stable_mosaic.version = 11 : i64} {
  func.func @kernel(%arg0: i32, %arg1: memref<1x32x1xi32, #tpu.memory_space<vmem>>, %arg2: memref<1x2x16xf32, #tpu.memory_space<vmem>>, %arg3: memref<1x128x32xf32, #tpu.memory_space<vmem>>, %arg4: memref<1x32x32xf32, #tpu.memory_space<vmem>>, %arg5: memref<1x14x32xf32, #tpu.memory_space<vmem>>, %arg6: memref<1x2x2x96xf32, #tpu.memory_space<vmem>>, %arg7: memref<1x2x32x96xf32, #tpu.memory_space<vmem>>, %arg8: memref<1x2x32x32xf32, #tpu.memory_space<vmem>>, %arg9: memref<1x2x32x64xf32, #tpu.memory_space<vmem>>, %arg10: memref<1x2x64x32xf32, #tpu.memory_space<vmem>>, %arg11: memref<1x2x32xf32, #tpu.memory_space<vmem>>) attributes {dimension_semantics = [#tpu.dimension_semantics<parallel>], iteration_bounds = array<i64: 2>, scalar_prefetch = 0 : i64, scratch_operands = 0 : i64, tpu.core_type = #tpu.core_type<tc>, window_params = [{transform_indices = @transform_0, window_bounds = array<i64: 1, 32, 1>}, {transform_indices = @transform_1, window_bounds = array<i64: 1, 2, 16>}, {transform_indices = @transform_2, window_bounds = array<i64: 1, 128, 32>}, {transform_indices = @transform_3, window_bounds = array<i64: 1, 32, 32>}, {transform_indices = @transform_4, window_bounds = array<i64: 1, 14, 32>}, {transform_indices = @transform_5, window_bounds = array<i64: 1, 2, 2, 96>}, {transform_indices = @transform_6, window_bounds = array<i64: 1, 2, 32, 96>}, {transform_indices = @transform_7, window_bounds = array<i64: 1, 2, 32, 32>}, {transform_indices = @transform_8, window_bounds = array<i64: 1, 2, 32, 64>}, {transform_indices = @transform_9, window_bounds = array<i64: 1, 2, 64, 32>}, {transform_indices = @transform_10, window_bounds = array<i64: 1, 2, 32>}]} {
    %c0 = arith.constant 0 : index
    %c0_0 = arith.constant 0 : index
    %c0_1 = arith.constant 0 : index
    %0 = vector.load %arg1[%c0, %c0_0, %c0_1] : memref<1x32x1xi32, #tpu.memory_space<vmem>>, vector<1x32x1xi32>
    %1 = vector.shape_cast %0 : vector<1x32x1xi32> to vector<32x1xi32>
    %2 = tpu.iota {dimensions = array<i32: 1>} : vector<32x128xi32>
    %3 = vector.broadcast %1 : vector<32x1xi32> to vector<32x128xi32>
    %4 = arith.cmpi eq, %2, %3 : vector<32x128xi32>
    %5 = arith.extui %4 : vector<32x128xi1> to vector<32x128xi32>
    %6 = arith.sitofp %5 : vector<32x128xi32> to vector<32x128xf32>
    %c0_2 = arith.constant 0 : index
    %c0_3 = arith.constant 0 : index
    %c0_4 = arith.constant 0 : index
    %7 = vector.load %arg3[%c0_2, %c0_3, %c0_4] : memref<1x128x32xf32, #tpu.memory_space<vmem>>, vector<1x128x32xf32>
    %8 = vector.shape_cast %7 : vector<1x128x32xf32> to vector<128x32xf32>
    %cst = arith.constant dense<0.000000e+00> : vector<32x32xf32>
    %9 = tpu.matmul %6, %8, %cst {dimension_numbers = #tpu.dot_dimension_numbers<[1], [0], [0], [1], [0, 0, 1, 1], [], []>} : vector<32x128xf32>, vector<128x32xf32>, vector<32x32xf32> -> vector<32x32xf32>
    %10 = vector.shape_cast %9 : vector<32x32xf32> to vector<2x16x32xf32>
    %c0_5 = arith.constant 0 : index
    %c0_6 = arith.constant 0 : index
    %c0_7 = arith.constant 0 : index
    %11 = vector.load %arg4[%c0_5, %c0_6, %c0_7] : memref<1x32x32xf32, #tpu.memory_space<vmem>>, vector<1x16x32xf32>
    %12 = vector.shape_cast %11 : vector<1x16x32xf32> to vector<16x32xf32>
    %13 = vector.shape_cast %12 : vector<16x32xf32> to vector<1x16x32xf32>
    %14 = vector.broadcast %13 : vector<1x16x32xf32> to vector<2x16x32xf32>
    %15 = arith.addf %10, %14 : vector<2x16x32xf32>
    %16 = vector.shape_cast %15 : vector<2x16x32xf32> to vector<32x32xf32>
    %c0_8 = arith.constant 0 : index
    %c0_9 = arith.constant 0 : index
    %c0_10 = arith.constant 0 : index
    %17 = vector.load %arg5[%c0_8, %c0_9, %c0_10] : memref<1x14x32xf32, #tpu.memory_space<vmem>>, vector<1x1x32xf32>
    %18 = vector.shape_cast %17 : vector<1x1x32xf32> to vector<1x32xf32>
    %c0_11 = arith.constant 0 : index
    %c1 = arith.constant 1 : index
    %c0_12 = arith.constant 0 : index
    %19 = vector.load %arg5[%c0_11, %c1, %c0_12] : memref<1x14x32xf32, #tpu.memory_space<vmem>>, vector<1x1x32xf32>
    %20 = vector.shape_cast %19 : vector<1x1x32xf32> to vector<1x32xf32>
    %cst_13 = arith.constant dense<0.000000e+00> : vector<32xf32>
    %21 = vector.multi_reduction <add>, %16, %cst_13 [1] : vector<32x32xf32> to vector<32xf32>
    %22 = vector.shape_cast %21 : vector<32xf32> to vector<32x1xf32>
    %cst_14 = arith.constant 3.200000e+01 : f32
    %23 = vector.broadcast %cst_14 : f32 to vector<32x1xf32>
    %24 = arith.divf %22, %23 : vector<32x1xf32>
    %25 = arith.mulf %16, %16 : vector<32x32xf32>
    %cst_15 = arith.constant dense<0.000000e+00> : vector<32xf32>
    %26 = vector.multi_reduction <add>, %25, %cst_15 [1] : vector<32x32xf32> to vector<32xf32>
    %27 = vector.shape_cast %26 : vector<32xf32> to vector<32x1xf32>
    %cst_16 = arith.constant 3.200000e+01 : f32
    %28 = vector.broadcast %cst_16 : f32 to vector<32x1xf32>
    %29 = arith.divf %27, %28 : vector<32x1xf32>
    %30 = arith.mulf %24, %24 : vector<32x1xf32>
    %31 = arith.subf %29, %30 : vector<32x1xf32>
    %32 = vector.broadcast %24 : vector<32x1xf32> to vector<32x32xf32>
    %33 = arith.subf %16, %32 : vector<32x32xf32>
    %cst_17 = arith.constant 9.99999996E-13 : f32
    %34 = vector.broadcast %cst_17 : f32 to vector<32x1xf32>
    %35 = arith.addf %31, %34 : vector<32x1xf32>
    %36 = math.rsqrt %35 : vector<32x1xf32>
    %37 = vector.broadcast %36 : vector<32x1xf32> to vector<32x32xf32>
    %38 = arith.mulf %33, %37 : vector<32x32xf32>
    %39 = vector.broadcast %18 : vector<1x32xf32> to vector<32x32xf32>
    %40 = arith.mulf %38, %39 : vector<32x32xf32>
    %41 = vector.broadcast %20 : vector<1x32xf32> to vector<32x32xf32>
    %42 = arith.addf %40, %41 : vector<32x32xf32>
    %c0_18 = arith.constant 0 : index
    %c0_19 = arith.constant 0 : index
    %c0_20 = arith.constant 0 : index
    %43 = vector.load %arg2[%c0_18, %c0_19, %c0_20] : memref<1x2x16xf32, #tpu.memory_space<vmem>>, vector<1x2x16xf32>
    %44 = vector.shape_cast %43 : vector<1x2x16xf32> to vector<2x16xf32>
    %cst_21 = arith.constant 1.000000e+00 : f32
    %45 = vector.broadcast %cst_21 : f32 to vector<2x16xf32>
    %46 = arith.subf %45, %44 : vector<2x16xf32>
    %cst_22 = arith.constant -3.40282347E+38 : f32
    %47 = vector.broadcast %cst_22 : f32 to vector<2x16xf32>
    %48 = arith.mulf %46, %47 : vector<2x16xf32>
    %49 = vector.shape_cast %48 : vector<2x16xf32> to vector<2x1x16xf32>
    %c0_23 = arith.constant 0 : index
    %c2 = arith.constant 2 : index
    %c0_24 = arith.constant 0 : index
    %50 = vector.load %arg5[%c0_23, %c2, %c0_24] : memref<1x14x32xf32, #tpu.memory_space<vmem>>, vector<1x1x32xf32>
    %51 = vector.shape_cast %50 : vector<1x1x32xf32> to vector<1x32xf32>
    %c0_25 = arith.constant 0 : index
    %c3 = arith.constant 3 : index
    %c0_26 = arith.constant 0 : index
    %52 = vector.load %arg5[%c0_25, %c3, %c0_26] : memref<1x14x32xf32, #tpu.memory_space<vmem>>, vector<1x1x32xf32>
    %53 = vector.shape_cast %52 : vector<1x1x32xf32> to vector<1x32xf32>
    %c0_27 = arith.constant 0 : index
    %c4 = arith.constant 4 : index
    %c0_28 = arith.constant 0 : index
    %54 = vector.load %arg5[%c0_27, %c4, %c0_28] : memref<1x14x32xf32, #tpu.memory_space<vmem>>, vector<1x1x32xf32>
    %55 = vector.shape_cast %54 : vector<1x1x32xf32> to vector<1x32xf32>
    %c0_29 = arith.constant 0 : index
    %c5 = arith.constant 5 : index
    %c0_30 = arith.constant 0 : index
    %56 = vector.load %arg5[%c0_29, %c5, %c0_30] : memref<1x14x32xf32, #tpu.memory_space<vmem>>, vector<1x1x32xf32>
    %57 = vector.shape_cast %56 : vector<1x1x32xf32> to vector<1x32xf32>
    %c0_31 = arith.constant 0 : index
    %c6 = arith.constant 6 : index
    %c0_32 = arith.constant 0 : index
    %58 = vector.load %arg5[%c0_31, %c6, %c0_32] : memref<1x14x32xf32, #tpu.memory_space<vmem>>, vector<1x1x32xf32>
    %59 = vector.shape_cast %58 : vector<1x1x32xf32> to vector<1x32xf32>
    %c0_33 = arith.constant 0 : index
    %c7 = arith.constant 7 : index
    %c0_34 = arith.constant 0 : index
    %60 = vector.load %arg5[%c0_33, %c7, %c0_34] : memref<1x14x32xf32, #tpu.memory_space<vmem>>, vector<1x1x32xf32>
    %61 = vector.shape_cast %60 : vector<1x1x32xf32> to vector<1x32xf32>
    %c0_35 = arith.constant 0 : index
    %c0_36 = arith.constant 0 : index
    %c0_37 = arith.constant 0 : index
    %c0_38 = arith.constant 0 : index
    %62 = vector.load %arg6[%c0_35, %c0_36, %c0_37, %c0_38] : memref<1x2x2x96xf32, #tpu.memory_space<vmem>>, vector<1x1x2x96xf32>
    %63 = vector.shape_cast %62 : vector<1x1x2x96xf32> to vector<2x96xf32>
    %64 = vector.extract_strided_slice %63 {offsets = [0, 0], sizes = [1, 96], strides = [1, 1]} : vector<2x96xf32> to vector<1x96xf32>
    %65 = vector.extract_strided_slice %63 {offsets = [1, 0], sizes = [1, 64], strides = [1, 1]} : vector<2x96xf32> to vector<1x64xf32>
    %c0_39 = arith.constant 0 : index
    %c0_40 = arith.constant 0 : index
    %c0_41 = arith.constant 0 : index
    %c0_42 = arith.constant 0 : index
    %66 = vector.load %arg7[%c0_39, %c0_40, %c0_41, %c0_42] : memref<1x2x32x96xf32, #tpu.memory_space<vmem>>, vector<1x1x32x96xf32>
    %67 = vector.shape_cast %66 : vector<1x1x32x96xf32> to vector<32x96xf32>
    %cst_43 = arith.constant dense<0.000000e+00> : vector<32x96xf32>
    %68 = tpu.matmul %42, %67, %cst_43 {dimension_numbers = #tpu.dot_dimension_numbers<[1], [0], [0], [1], [0, 0, 1, 1], [], []>} : vector<32x32xf32>, vector<32x96xf32>, vector<32x96xf32> -> vector<32x96xf32>
    %69 = vector.broadcast %64 : vector<1x96xf32> to vector<32x96xf32>
    %70 = arith.addf %68, %69 : vector<32x96xf32>
    %71 = vector.shape_cast %70 : vector<32x96xf32> to vector<2x16x96xf32>
    %c0_44 = arith.constant 0 : index
    %c0_45 = arith.constant 0 : index
    %c0_46 = arith.constant 0 : index
    %c0_47 = arith.constant 0 : index
    %72 = vector.load %arg8[%c0_44, %c0_45, %c0_46, %c0_47] : memref<1x2x32x32xf32, #tpu.memory_space<vmem>>, vector<1x1x32x32xf32>
    %73 = vector.shape_cast %72 : vector<1x1x32x32xf32> to vector<32x32xf32>
    %74 = vector.extract_strided_slice %71 {offsets = [0, 0, 0], sizes = [2, 16, 8], strides = [1, 1, 1]} : vector<2x16x96xf32> to vector<2x16x8xf32>
    %75 = vector.extract_strided_slice %71 {offsets = [0, 0, 32], sizes = [2, 16, 8], strides = [1, 1, 1]} : vector<2x16x96xf32> to vector<2x16x8xf32>
    %76 = vector.extract_strided_slice %71 {offsets = [0, 0, 64], sizes = [2, 16, 8], strides = [1, 1, 1]} : vector<2x16x96xf32> to vector<2x16x8xf32>
    %cst_48 = arith.constant dense<0.000000e+00> : vector<2x16x16xf32>
    %77 = tpu.matmul %74, %75, %cst_48 {dimension_numbers = #tpu.dot_dimension_numbers<[2], [2], [1], [1], [0, 0, 0, 1, 1, 1], [0], [0]>} : vector<2x16x8xf32>, vector<2x16x8xf32>, vector<2x16x16xf32> -> vector<2x16x16xf32>
    %cst_49 = arith.constant 0.353553385 : f32
    %78 = vector.broadcast %cst_49 : f32 to vector<2x16x16xf32>
    %79 = arith.mulf %77, %78 : vector<2x16x16xf32>
    %80 = vector.broadcast %49 : vector<2x1x16xf32> to vector<2x16x16xf32>
    %81 = arith.addf %79, %80 : vector<2x16x16xf32>
    %cst_50 = arith.constant dense<0xFF800000> : vector<2x16xf32>
    %82 = vector.multi_reduction <maximumf>, %81, %cst_50 [2] : vector<2x16x16xf32> to vector<2x16xf32>
    %83 = vector.shape_cast %82 : vector<2x16xf32> to vector<2x16x1xf32>
    %84 = vector.broadcast %83 : vector<2x16x1xf32> to vector<2x16x16xf32>
    %85 = arith.subf %81, %84 : vector<2x16x16xf32>
    %86 = math.exp %85 : vector<2x16x16xf32>
    %cst_51 = arith.constant dense<0.000000e+00> : vector<2x16xf32>
    %87 = vector.multi_reduction <add>, %86, %cst_51 [2] : vector<2x16x16xf32> to vector<2x16xf32>
    %88 = vector.shape_cast %87 : vector<2x16xf32> to vector<2x16x1xf32>
    %89 = vector.broadcast %88 : vector<2x16x1xf32> to vector<2x16x16xf32>
    %90 = arith.divf %86, %89 : vector<2x16x16xf32>
    %cst_52 = arith.constant dense<0.000000e+00> : vector<2x16x8xf32>
    %91 = tpu.matmul %90, %76, %cst_52 {dimension_numbers = #tpu.dot_dimension_numbers<[2], [1], [1], [2], [0, 0, 0, 1, 1, 2], [0], [0]>} : vector<2x16x16xf32>, vector<2x16x8xf32>, vector<2x16x8xf32> -> vector<2x16x8xf32>
    %92 = vector.shape_cast %91 : vector<2x16x8xf32> to vector<32x8xf32>
    %93 = vector.extract_strided_slice %73 {offsets = [0, 0], sizes = [8, 32], strides = [1, 1]} : vector<32x32xf32> to vector<8x32xf32>
    %cst_53 = arith.constant dense<0.000000e+00> : vector<32x32xf32>
    %94 = tpu.matmul %92, %93, %cst_53 {dimension_numbers = #tpu.dot_dimension_numbers<[1], [0], [0], [1], [0, 0, 1, 1], [], []>} : vector<32x8xf32>, vector<8x32xf32>, vector<32x32xf32> -> vector<32x32xf32>
    %95 = vector.extract_strided_slice %71 {offsets = [0, 0, 8], sizes = [2, 16, 8], strides = [1, 1, 1]} : vector<2x16x96xf32> to vector<2x16x8xf32>
    %96 = vector.extract_strided_slice %71 {offsets = [0, 0, 40], sizes = [2, 16, 8], strides = [1, 1, 1]} : vector<2x16x96xf32> to vector<2x16x8xf32>
    %97 = vector.extract_strided_slice %71 {offsets = [0, 0, 72], sizes = [2, 16, 8], strides = [1, 1, 1]} : vector<2x16x96xf32> to vector<2x16x8xf32>
    %cst_54 = arith.constant dense<0.000000e+00> : vector<2x16x16xf32>
    %98 = tpu.matmul %95, %96, %cst_54 {dimension_numbers = #tpu.dot_dimension_numbers<[2], [2], [1], [1], [0, 0, 0, 1, 1, 1], [0], [0]>} : vector<2x16x8xf32>, vector<2x16x8xf32>, vector<2x16x16xf32> -> vector<2x16x16xf32>
    %cst_55 = arith.constant 0.353553385 : f32
    %99 = vector.broadcast %cst_55 : f32 to vector<2x16x16xf32>
    %100 = arith.mulf %98, %99 : vector<2x16x16xf32>
    %101 = vector.broadcast %49 : vector<2x1x16xf32> to vector<2x16x16xf32>
    %102 = arith.addf %100, %101 : vector<2x16x16xf32>
    %cst_56 = arith.constant dense<0xFF800000> : vector<2x16xf32>
    %103 = vector.multi_reduction <maximumf>, %102, %cst_56 [2] : vector<2x16x16xf32> to vector<2x16xf32>
    %104 = vector.shape_cast %103 : vector<2x16xf32> to vector<2x16x1xf32>
    %105 = vector.broadcast %104 : vector<2x16x1xf32> to vector<2x16x16xf32>
    %106 = arith.subf %102, %105 : vector<2x16x16xf32>
    %107 = math.exp %106 : vector<2x16x16xf32>
    %cst_57 = arith.constant dense<0.000000e+00> : vector<2x16xf32>
    %108 = vector.multi_reduction <add>, %107, %cst_57 [2] : vector<2x16x16xf32> to vector<2x16xf32>
    %109 = vector.shape_cast %108 : vector<2x16xf32> to vector<2x16x1xf32>
    %110 = vector.broadcast %109 : vector<2x16x1xf32> to vector<2x16x16xf32>
    %111 = arith.divf %107, %110 : vector<2x16x16xf32>
    %cst_58 = arith.constant dense<0.000000e+00> : vector<2x16x8xf32>
    %112 = tpu.matmul %111, %97, %cst_58 {dimension_numbers = #tpu.dot_dimension_numbers<[2], [1], [1], [2], [0, 0, 0, 1, 1, 2], [0], [0]>} : vector<2x16x16xf32>, vector<2x16x8xf32>, vector<2x16x8xf32> -> vector<2x16x8xf32>
    %113 = vector.shape_cast %112 : vector<2x16x8xf32> to vector<32x8xf32>
    %114 = vector.extract_strided_slice %73 {offsets = [8, 0], sizes = [8, 32], strides = [1, 1]} : vector<32x32xf32> to vector<8x32xf32>
    %cst_59 = arith.constant dense<0.000000e+00> : vector<32x32xf32>
    %115 = tpu.matmul %113, %114, %cst_59 {dimension_numbers = #tpu.dot_dimension_numbers<[1], [0], [0], [1], [0, 0, 1, 1], [], []>} : vector<32x8xf32>, vector<8x32xf32>, vector<32x32xf32> -> vector<32x32xf32>
    %116 = arith.addf %94, %115 : vector<32x32xf32>
    %117 = vector.extract_strided_slice %71 {offsets = [0, 0, 16], sizes = [2, 16, 8], strides = [1, 1, 1]} : vector<2x16x96xf32> to vector<2x16x8xf32>
    %118 = vector.extract_strided_slice %71 {offsets = [0, 0, 48], sizes = [2, 16, 8], strides = [1, 1, 1]} : vector<2x16x96xf32> to vector<2x16x8xf32>
    %119 = vector.extract_strided_slice %71 {offsets = [0, 0, 80], sizes = [2, 16, 8], strides = [1, 1, 1]} : vector<2x16x96xf32> to vector<2x16x8xf32>
    %cst_60 = arith.constant dense<0.000000e+00> : vector<2x16x16xf32>
    %120 = tpu.matmul %117, %118, %cst_60 {dimension_numbers = #tpu.dot_dimension_numbers<[2], [2], [1], [1], [0, 0, 0, 1, 1, 1], [0], [0]>} : vector<2x16x8xf32>, vector<2x16x8xf32>, vector<2x16x16xf32> -> vector<2x16x16xf32>
    %cst_61 = arith.constant 0.353553385 : f32
    %121 = vector.broadcast %cst_61 : f32 to vector<2x16x16xf32>
    %122 = arith.mulf %120, %121 : vector<2x16x16xf32>
    %123 = vector.broadcast %49 : vector<2x1x16xf32> to vector<2x16x16xf32>
    %124 = arith.addf %122, %123 : vector<2x16x16xf32>
    %cst_62 = arith.constant dense<0xFF800000> : vector<2x16xf32>
    %125 = vector.multi_reduction <maximumf>, %124, %cst_62 [2] : vector<2x16x16xf32> to vector<2x16xf32>
    %126 = vector.shape_cast %125 : vector<2x16xf32> to vector<2x16x1xf32>
    %127 = vector.broadcast %126 : vector<2x16x1xf32> to vector<2x16x16xf32>
    %128 = arith.subf %124, %127 : vector<2x16x16xf32>
    %129 = math.exp %128 : vector<2x16x16xf32>
    %cst_63 = arith.constant dense<0.000000e+00> : vector<2x16xf32>
    %130 = vector.multi_reduction <add>, %129, %cst_63 [2] : vector<2x16x16xf32> to vector<2x16xf32>
    %131 = vector.shape_cast %130 : vector<2x16xf32> to vector<2x16x1xf32>
    %132 = vector.broadcast %131 : vector<2x16x1xf32> to vector<2x16x16xf32>
    %133 = arith.divf %129, %132 : vector<2x16x16xf32>
    %cst_64 = arith.constant dense<0.000000e+00> : vector<2x16x8xf32>
    %134 = tpu.matmul %133, %119, %cst_64 {dimension_numbers = #tpu.dot_dimension_numbers<[2], [1], [1], [2], [0, 0, 0, 1, 1, 2], [0], [0]>} : vector<2x16x16xf32>, vector<2x16x8xf32>, vector<2x16x8xf32> -> vector<2x16x8xf32>
    %135 = vector.shape_cast %134 : vector<2x16x8xf32> to vector<32x8xf32>
    %136 = vector.extract_strided_slice %73 {offsets = [16, 0], sizes = [8, 32], strides = [1, 1]} : vector<32x32xf32> to vector<8x32xf32>
    %cst_65 = arith.constant dense<0.000000e+00> : vector<32x32xf32>
    %137 = tpu.matmul %135, %136, %cst_65 {dimension_numbers = #tpu.dot_dimension_numbers<[1], [0], [0], [1], [0, 0, 1, 1], [], []>} : vector<32x8xf32>, vector<8x32xf32>, vector<32x32xf32> -> vector<32x32xf32>
    %138 = arith.addf %116, %137 : vector<32x32xf32>
    %139 = vector.extract_strided_slice %71 {offsets = [0, 0, 24], sizes = [2, 16, 8], strides = [1, 1, 1]} : vector<2x16x96xf32> to vector<2x16x8xf32>
    %140 = vector.extract_strided_slice %71 {offsets = [0, 0, 56], sizes = [2, 16, 8], strides = [1, 1, 1]} : vector<2x16x96xf32> to vector<2x16x8xf32>
    %141 = vector.extract_strided_slice %71 {offsets = [0, 0, 88], sizes = [2, 16, 8], strides = [1, 1, 1]} : vector<2x16x96xf32> to vector<2x16x8xf32>
    %cst_66 = arith.constant dense<0.000000e+00> : vector<2x16x16xf32>
    %142 = tpu.matmul %139, %140, %cst_66 {dimension_numbers = #tpu.dot_dimension_numbers<[2], [2], [1], [1], [0, 0, 0, 1, 1, 1], [0], [0]>} : vector<2x16x8xf32>, vector<2x16x8xf32>, vector<2x16x16xf32> -> vector<2x16x16xf32>
    %cst_67 = arith.constant 0.353553385 : f32
    %143 = vector.broadcast %cst_67 : f32 to vector<2x16x16xf32>
    %144 = arith.mulf %142, %143 : vector<2x16x16xf32>
    %145 = vector.broadcast %49 : vector<2x1x16xf32> to vector<2x16x16xf32>
    %146 = arith.addf %144, %145 : vector<2x16x16xf32>
    %cst_68 = arith.constant dense<0xFF800000> : vector<2x16xf32>
    %147 = vector.multi_reduction <maximumf>, %146, %cst_68 [2] : vector<2x16x16xf32> to vector<2x16xf32>
    %148 = vector.shape_cast %147 : vector<2x16xf32> to vector<2x16x1xf32>
    %149 = vector.broadcast %148 : vector<2x16x1xf32> to vector<2x16x16xf32>
    %150 = arith.subf %146, %149 : vector<2x16x16xf32>
    %151 = math.exp %150 : vector<2x16x16xf32>
    %cst_69 = arith.constant dense<0.000000e+00> : vector<2x16xf32>
    %152 = vector.multi_reduction <add>, %151, %cst_69 [2] : vector<2x16x16xf32> to vector<2x16xf32>
    %153 = vector.shape_cast %152 : vector<2x16xf32> to vector<2x16x1xf32>
    %154 = vector.broadcast %153 : vector<2x16x1xf32> to vector<2x16x16xf32>
    %155 = arith.divf %151, %154 : vector<2x16x16xf32>
    %cst_70 = arith.constant dense<0.000000e+00> : vector<2x16x8xf32>
    %156 = tpu.matmul %155, %141, %cst_70 {dimension_numbers = #tpu.dot_dimension_numbers<[2], [1], [1], [2], [0, 0, 0, 1, 1, 2], [0], [0]>} : vector<2x16x16xf32>, vector<2x16x8xf32>, vector<2x16x8xf32> -> vector<2x16x8xf32>
    %157 = vector.shape_cast %156 : vector<2x16x8xf32> to vector<32x8xf32>
    %158 = vector.extract_strided_slice %73 {offsets = [24, 0], sizes = [8, 32], strides = [1, 1]} : vector<32x32xf32> to vector<8x32xf32>
    %cst_71 = arith.constant dense<0.000000e+00> : vector<32x32xf32>
    %159 = tpu.matmul %157, %158, %cst_71 {dimension_numbers = #tpu.dot_dimension_numbers<[1], [0], [0], [1], [0, 0, 1, 1], [], []>} : vector<32x8xf32>, vector<8x32xf32>, vector<32x32xf32> -> vector<32x32xf32>
    %160 = arith.addf %138, %159 : vector<32x32xf32>
    %161 = arith.addf %42, %160 : vector<32x32xf32>
    %162 = vector.broadcast %51 : vector<1x32xf32> to vector<32x32xf32>
    %163 = arith.addf %161, %162 : vector<32x32xf32>
    %cst_72 = arith.constant dense<0.000000e+00> : vector<32xf32>
    %164 = vector.multi_reduction <add>, %163, %cst_72 [1] : vector<32x32xf32> to vector<32xf32>
    %165 = vector.shape_cast %164 : vector<32xf32> to vector<32x1xf32>
    %cst_73 = arith.constant 3.200000e+01 : f32
    %166 = vector.broadcast %cst_73 : f32 to vector<32x1xf32>
    %167 = arith.divf %165, %166 : vector<32x1xf32>
    %168 = arith.mulf %163, %163 : vector<32x32xf32>
    %cst_74 = arith.constant dense<0.000000e+00> : vector<32xf32>
    %169 = vector.multi_reduction <add>, %168, %cst_74 [1] : vector<32x32xf32> to vector<32xf32>
    %170 = vector.shape_cast %169 : vector<32xf32> to vector<32x1xf32>
    %cst_75 = arith.constant 3.200000e+01 : f32
    %171 = vector.broadcast %cst_75 : f32 to vector<32x1xf32>
    %172 = arith.divf %170, %171 : vector<32x1xf32>
    %173 = arith.mulf %167, %167 : vector<32x1xf32>
    %174 = arith.subf %172, %173 : vector<32x1xf32>
    %175 = vector.broadcast %167 : vector<32x1xf32> to vector<32x32xf32>
    %176 = arith.subf %163, %175 : vector<32x32xf32>
    %cst_76 = arith.constant 9.99999996E-13 : f32
    %177 = vector.broadcast %cst_76 : f32 to vector<32x1xf32>
    %178 = arith.addf %174, %177 : vector<32x1xf32>
    %179 = math.rsqrt %178 : vector<32x1xf32>
    %180 = vector.broadcast %179 : vector<32x1xf32> to vector<32x32xf32>
    %181 = arith.mulf %176, %180 : vector<32x32xf32>
    %182 = vector.broadcast %53 : vector<1x32xf32> to vector<32x32xf32>
    %183 = arith.mulf %181, %182 : vector<32x32xf32>
    %184 = vector.broadcast %55 : vector<1x32xf32> to vector<32x32xf32>
    %185 = arith.addf %183, %184 : vector<32x32xf32>
    %c0_77 = arith.constant 0 : index
    %c0_78 = arith.constant 0 : index
    %c0_79 = arith.constant 0 : index
    %c0_80 = arith.constant 0 : index
    %186 = vector.load %arg9[%c0_77, %c0_78, %c0_79, %c0_80] : memref<1x2x32x64xf32, #tpu.memory_space<vmem>>, vector<1x1x32x64xf32>
    %187 = vector.shape_cast %186 : vector<1x1x32x64xf32> to vector<32x64xf32>
    %cst_81 = arith.constant dense<0.000000e+00> : vector<32x64xf32>
    %188 = tpu.matmul %185, %187, %cst_81 {dimension_numbers = #tpu.dot_dimension_numbers<[1], [0], [0], [1], [0, 0, 1, 1], [], []>} : vector<32x32xf32>, vector<32x64xf32>, vector<32x64xf32> -> vector<32x64xf32>
    %189 = vector.broadcast %65 : vector<1x64xf32> to vector<32x64xf32>
    %190 = arith.addf %188, %189 : vector<32x64xf32>
    %cst_82 = arith.constant 5.000000e-01 : f32
    %191 = vector.broadcast %cst_82 : f32 to vector<32x64xf32>
    %192 = arith.mulf %191, %190 : vector<32x64xf32>
    %cst_83 = arith.constant 0.707106769 : f32
    %193 = vector.broadcast %cst_83 : f32 to vector<32x64xf32>
    %194 = arith.mulf %190, %193 : vector<32x64xf32>
    %195 = math.absf %194 : vector<32x64xf32>
    %cst_84 = arith.constant 0.327591091 : f32
    %196 = vector.broadcast %cst_84 : f32 to vector<32x64xf32>
    %197 = arith.mulf %196, %195 : vector<32x64xf32>
    %cst_85 = arith.constant 1.000000e+00 : f32
    %198 = vector.broadcast %cst_85 : f32 to vector<32x64xf32>
    %199 = arith.addf %198, %197 : vector<32x64xf32>
    %cst_86 = arith.constant 1.000000e+00 : f32
    %200 = vector.broadcast %cst_86 : f32 to vector<32x64xf32>
    %201 = arith.divf %200, %199 : vector<32x64xf32>
    %cst_87 = arith.constant 1.06140542 : f32
    %202 = vector.broadcast %cst_87 : f32 to vector<32x64xf32>
    %203 = arith.mulf %202, %201 : vector<32x64xf32>
    %cst_88 = arith.constant -1.45315206 : f32
    %204 = vector.broadcast %cst_88 : f32 to vector<32x64xf32>
    %205 = arith.addf %203, %204 : vector<32x64xf32>
    %206 = arith.mulf %205, %201 : vector<32x64xf32>
    %cst_89 = arith.constant 1.42141378 : f32
    %207 = vector.broadcast %cst_89 : f32 to vector<32x64xf32>
    %208 = arith.addf %206, %207 : vector<32x64xf32>
    %209 = arith.mulf %208, %201 : vector<32x64xf32>
    %cst_90 = arith.constant -0.284496725 : f32
    %210 = vector.broadcast %cst_90 : f32 to vector<32x64xf32>
    %211 = arith.addf %209, %210 : vector<32x64xf32>
    %212 = arith.mulf %211, %201 : vector<32x64xf32>
    %cst_91 = arith.constant 0.254829586 : f32
    %213 = vector.broadcast %cst_91 : f32 to vector<32x64xf32>
    %214 = arith.addf %212, %213 : vector<32x64xf32>
    %215 = arith.mulf %214, %201 : vector<32x64xf32>
    %cst_92 = arith.constant 0.000000e+00 : f32
    %216 = vector.broadcast %cst_92 : f32 to vector<32x64xf32>
    %217 = arith.subf %216, %195 : vector<32x64xf32>
    %218 = arith.mulf %217, %195 : vector<32x64xf32>
    %219 = math.exp %218 : vector<32x64xf32>
    %220 = arith.mulf %215, %219 : vector<32x64xf32>
    %cst_93 = arith.constant 1.000000e+00 : f32
    %221 = vector.broadcast %cst_93 : f32 to vector<32x64xf32>
    %222 = arith.subf %221, %220 : vector<32x64xf32>
    %cst_94 = arith.constant 0.000000e+00 : f32
    %223 = vector.broadcast %cst_94 : f32 to vector<32x64xf32>
    %224 = arith.cmpf oge, %194, %223 : vector<32x64xf32>
    %cst_95 = arith.constant 0.000000e+00 : f32
    %225 = vector.broadcast %cst_95 : f32 to vector<32x64xf32>
    %226 = arith.subf %225, %222 : vector<32x64xf32>
    %227 = arith.select %224, %222, %226 : vector<32x64xi1>, vector<32x64xf32>
    %cst_96 = arith.constant 1.000000e+00 : f32
    %228 = vector.broadcast %cst_96 : f32 to vector<32x64xf32>
    %229 = arith.addf %228, %227 : vector<32x64xf32>
    %230 = arith.mulf %192, %229 : vector<32x64xf32>
    %c0_97 = arith.constant 0 : index
    %c0_98 = arith.constant 0 : index
    %c0_99 = arith.constant 0 : index
    %c0_100 = arith.constant 0 : index
    %231 = vector.load %arg10[%c0_97, %c0_98, %c0_99, %c0_100] : memref<1x2x64x32xf32, #tpu.memory_space<vmem>>, vector<1x1x64x32xf32>
    %232 = vector.shape_cast %231 : vector<1x1x64x32xf32> to vector<64x32xf32>
    %cst_101 = arith.constant dense<0.000000e+00> : vector<32x32xf32>
    %233 = tpu.matmul %230, %232, %cst_101 {dimension_numbers = #tpu.dot_dimension_numbers<[1], [0], [0], [1], [0, 0, 1, 1], [], []>} : vector<32x64xf32>, vector<64x32xf32>, vector<32x32xf32> -> vector<32x32xf32>
    %234 = vector.broadcast %57 : vector<1x32xf32> to vector<32x32xf32>
    %235 = arith.addf %233, %234 : vector<32x32xf32>
    %236 = arith.addf %185, %235 : vector<32x32xf32>
    %cst_102 = arith.constant dense<0.000000e+00> : vector<32xf32>
    %237 = vector.multi_reduction <add>, %236, %cst_102 [1] : vector<32x32xf32> to vector<32xf32>
    %238 = vector.shape_cast %237 : vector<32xf32> to vector<32x1xf32>
    %cst_103 = arith.constant 3.200000e+01 : f32
    %239 = vector.broadcast %cst_103 : f32 to vector<32x1xf32>
    %240 = arith.divf %238, %239 : vector<32x1xf32>
    %241 = arith.mulf %236, %236 : vector<32x32xf32>
    %cst_104 = arith.constant dense<0.000000e+00> : vector<32xf32>
    %242 = vector.multi_reduction <add>, %241, %cst_104 [1] : vector<32x32xf32> to vector<32xf32>
    %243 = vector.shape_cast %242 : vector<32xf32> to vector<32x1xf32>
    %cst_105 = arith.constant 3.200000e+01 : f32
    %244 = vector.broadcast %cst_105 : f32 to vector<32x1xf32>
    %245 = arith.divf %243, %244 : vector<32x1xf32>
    %246 = arith.mulf %240, %240 : vector<32x1xf32>
    %247 = arith.subf %245, %246 : vector<32x1xf32>
    %248 = vector.broadcast %240 : vector<32x1xf32> to vector<32x32xf32>
    %249 = arith.subf %236, %248 : vector<32x32xf32>
    %cst_106 = arith.constant 9.99999996E-13 : f32
    %250 = vector.broadcast %cst_106 : f32 to vector<32x1xf32>
    %251 = arith.addf %247, %250 : vector<32x1xf32>
    %252 = math.rsqrt %251 : vector<32x1xf32>
    %253 = vector.broadcast %252 : vector<32x1xf32> to vector<32x32xf32>
    %254 = arith.mulf %249, %253 : vector<32x32xf32>
    %255 = vector.broadcast %59 : vector<1x32xf32> to vector<32x32xf32>
    %256 = arith.mulf %254, %255 : vector<32x32xf32>
    %257 = vector.broadcast %61 : vector<1x32xf32> to vector<32x32xf32>
    %258 = arith.addf %256, %257 : vector<32x32xf32>
    %c0_107 = arith.constant 0 : index
    %c8 = arith.constant 8 : index
    %c0_108 = arith.constant 0 : index
    %259 = vector.load %arg5[%c0_107, %c8, %c0_108] : memref<1x14x32xf32, #tpu.memory_space<vmem>>, vector<1x1x32xf32>
    %260 = vector.shape_cast %259 : vector<1x1x32xf32> to vector<1x32xf32>
    %c0_109 = arith.constant 0 : index
    %c9 = arith.constant 9 : index
    %c0_110 = arith.constant 0 : index
    %261 = vector.load %arg5[%c0_109, %c9, %c0_110] : memref<1x14x32xf32, #tpu.memory_space<vmem>>, vector<1x1x32xf32>
    %262 = vector.shape_cast %261 : vector<1x1x32xf32> to vector<1x32xf32>
    %c0_111 = arith.constant 0 : index
    %c10 = arith.constant 10 : index
    %c0_112 = arith.constant 0 : index
    %263 = vector.load %arg5[%c0_111, %c10, %c0_112] : memref<1x14x32xf32, #tpu.memory_space<vmem>>, vector<1x1x32xf32>
    %264 = vector.shape_cast %263 : vector<1x1x32xf32> to vector<1x32xf32>
    %c0_113 = arith.constant 0 : index
    %c11 = arith.constant 11 : index
    %c0_114 = arith.constant 0 : index
    %265 = vector.load %arg5[%c0_113, %c11, %c0_114] : memref<1x14x32xf32, #tpu.memory_space<vmem>>, vector<1x1x32xf32>
    %266 = vector.shape_cast %265 : vector<1x1x32xf32> to vector<1x32xf32>
    %c0_115 = arith.constant 0 : index
    %c12 = arith.constant 12 : index
    %c0_116 = arith.constant 0 : index
    %267 = vector.load %arg5[%c0_115, %c12, %c0_116] : memref<1x14x32xf32, #tpu.memory_space<vmem>>, vector<1x1x32xf32>
    %268 = vector.shape_cast %267 : vector<1x1x32xf32> to vector<1x32xf32>
    %c0_117 = arith.constant 0 : index
    %c13 = arith.constant 13 : index
    %c0_118 = arith.constant 0 : index
    %269 = vector.load %arg5[%c0_117, %c13, %c0_118] : memref<1x14x32xf32, #tpu.memory_space<vmem>>, vector<1x1x32xf32>
    %270 = vector.shape_cast %269 : vector<1x1x32xf32> to vector<1x32xf32>
    %c0_119 = arith.constant 0 : index
    %c1_120 = arith.constant 1 : index
    %c0_121 = arith.constant 0 : index
    %c0_122 = arith.constant 0 : index
    %271 = vector.load %arg6[%c0_119, %c1_120, %c0_121, %c0_122] : memref<1x2x2x96xf32, #tpu.memory_space<vmem>>, vector<1x1x2x96xf32>
    %272 = vector.shape_cast %271 : vector<1x1x2x96xf32> to vector<2x96xf32>
    %273 = vector.extract_strided_slice %272 {offsets = [0, 0], sizes = [1, 96], strides = [1, 1]} : vector<2x96xf32> to vector<1x96xf32>
    %274 = vector.extract_strided_slice %272 {offsets = [1, 0], sizes = [1, 64], strides = [1, 1]} : vector<2x96xf32> to vector<1x64xf32>
    %c0_123 = arith.constant 0 : index
    %c1_124 = arith.constant 1 : index
    %c0_125 = arith.constant 0 : index
    %c0_126 = arith.constant 0 : index
    %275 = vector.load %arg7[%c0_123, %c1_124, %c0_125, %c0_126] : memref<1x2x32x96xf32, #tpu.memory_space<vmem>>, vector<1x1x32x96xf32>
    %276 = vector.shape_cast %275 : vector<1x1x32x96xf32> to vector<32x96xf32>
    %cst_127 = arith.constant dense<0.000000e+00> : vector<32x96xf32>
    %277 = tpu.matmul %258, %276, %cst_127 {dimension_numbers = #tpu.dot_dimension_numbers<[1], [0], [0], [1], [0, 0, 1, 1], [], []>} : vector<32x32xf32>, vector<32x96xf32>, vector<32x96xf32> -> vector<32x96xf32>
    %278 = vector.broadcast %273 : vector<1x96xf32> to vector<32x96xf32>
    %279 = arith.addf %277, %278 : vector<32x96xf32>
    %280 = vector.shape_cast %279 : vector<32x96xf32> to vector<2x16x96xf32>
    %c0_128 = arith.constant 0 : index
    %c1_129 = arith.constant 1 : index
    %c0_130 = arith.constant 0 : index
    %c0_131 = arith.constant 0 : index
    %281 = vector.load %arg8[%c0_128, %c1_129, %c0_130, %c0_131] : memref<1x2x32x32xf32, #tpu.memory_space<vmem>>, vector<1x1x32x32xf32>
    %282 = vector.shape_cast %281 : vector<1x1x32x32xf32> to vector<32x32xf32>
    %283 = vector.extract_strided_slice %280 {offsets = [0, 0, 0], sizes = [2, 16, 8], strides = [1, 1, 1]} : vector<2x16x96xf32> to vector<2x16x8xf32>
    %284 = vector.extract_strided_slice %280 {offsets = [0, 0, 32], sizes = [2, 16, 8], strides = [1, 1, 1]} : vector<2x16x96xf32> to vector<2x16x8xf32>
    %285 = vector.extract_strided_slice %280 {offsets = [0, 0, 64], sizes = [2, 16, 8], strides = [1, 1, 1]} : vector<2x16x96xf32> to vector<2x16x8xf32>
    %cst_132 = arith.constant dense<0.000000e+00> : vector<2x16x16xf32>
    %286 = tpu.matmul %283, %284, %cst_132 {dimension_numbers = #tpu.dot_dimension_numbers<[2], [2], [1], [1], [0, 0, 0, 1, 1, 1], [0], [0]>} : vector<2x16x8xf32>, vector<2x16x8xf32>, vector<2x16x16xf32> -> vector<2x16x16xf32>
    %cst_133 = arith.constant 0.353553385 : f32
    %287 = vector.broadcast %cst_133 : f32 to vector<2x16x16xf32>
    %288 = arith.mulf %286, %287 : vector<2x16x16xf32>
    %289 = vector.broadcast %49 : vector<2x1x16xf32> to vector<2x16x16xf32>
    %290 = arith.addf %288, %289 : vector<2x16x16xf32>
    %cst_134 = arith.constant dense<0xFF800000> : vector<2x16xf32>
    %291 = vector.multi_reduction <maximumf>, %290, %cst_134 [2] : vector<2x16x16xf32> to vector<2x16xf32>
    %292 = vector.shape_cast %291 : vector<2x16xf32> to vector<2x16x1xf32>
    %293 = vector.broadcast %292 : vector<2x16x1xf32> to vector<2x16x16xf32>
    %294 = arith.subf %290, %293 : vector<2x16x16xf32>
    %295 = math.exp %294 : vector<2x16x16xf32>
    %cst_135 = arith.constant dense<0.000000e+00> : vector<2x16xf32>
    %296 = vector.multi_reduction <add>, %295, %cst_135 [2] : vector<2x16x16xf32> to vector<2x16xf32>
    %297 = vector.shape_cast %296 : vector<2x16xf32> to vector<2x16x1xf32>
    %298 = vector.broadcast %297 : vector<2x16x1xf32> to vector<2x16x16xf32>
    %299 = arith.divf %295, %298 : vector<2x16x16xf32>
    %cst_136 = arith.constant dense<0.000000e+00> : vector<2x16x8xf32>
    %300 = tpu.matmul %299, %285, %cst_136 {dimension_numbers = #tpu.dot_dimension_numbers<[2], [1], [1], [2], [0, 0, 0, 1, 1, 2], [0], [0]>} : vector<2x16x16xf32>, vector<2x16x8xf32>, vector<2x16x8xf32> -> vector<2x16x8xf32>
    %301 = vector.shape_cast %300 : vector<2x16x8xf32> to vector<32x8xf32>
    %302 = vector.extract_strided_slice %282 {offsets = [0, 0], sizes = [8, 32], strides = [1, 1]} : vector<32x32xf32> to vector<8x32xf32>
    %cst_137 = arith.constant dense<0.000000e+00> : vector<32x32xf32>
    %303 = tpu.matmul %301, %302, %cst_137 {dimension_numbers = #tpu.dot_dimension_numbers<[1], [0], [0], [1], [0, 0, 1, 1], [], []>} : vector<32x8xf32>, vector<8x32xf32>, vector<32x32xf32> -> vector<32x32xf32>
    %304 = vector.extract_strided_slice %280 {offsets = [0, 0, 8], sizes = [2, 16, 8], strides = [1, 1, 1]} : vector<2x16x96xf32> to vector<2x16x8xf32>
    %305 = vector.extract_strided_slice %280 {offsets = [0, 0, 40], sizes = [2, 16, 8], strides = [1, 1, 1]} : vector<2x16x96xf32> to vector<2x16x8xf32>
    %306 = vector.extract_strided_slice %280 {offsets = [0, 0, 72], sizes = [2, 16, 8], strides = [1, 1, 1]} : vector<2x16x96xf32> to vector<2x16x8xf32>
    %cst_138 = arith.constant dense<0.000000e+00> : vector<2x16x16xf32>
    %307 = tpu.matmul %304, %305, %cst_138 {dimension_numbers = #tpu.dot_dimension_numbers<[2], [2], [1], [1], [0, 0, 0, 1, 1, 1], [0], [0]>} : vector<2x16x8xf32>, vector<2x16x8xf32>, vector<2x16x16xf32> -> vector<2x16x16xf32>
    %cst_139 = arith.constant 0.353553385 : f32
    %308 = vector.broadcast %cst_139 : f32 to vector<2x16x16xf32>
    %309 = arith.mulf %307, %308 : vector<2x16x16xf32>
    %310 = vector.broadcast %49 : vector<2x1x16xf32> to vector<2x16x16xf32>
    %311 = arith.addf %309, %310 : vector<2x16x16xf32>
    %cst_140 = arith.constant dense<0xFF800000> : vector<2x16xf32>
    %312 = vector.multi_reduction <maximumf>, %311, %cst_140 [2] : vector<2x16x16xf32> to vector<2x16xf32>
    %313 = vector.shape_cast %312 : vector<2x16xf32> to vector<2x16x1xf32>
    %314 = vector.broadcast %313 : vector<2x16x1xf32> to vector<2x16x16xf32>
    %315 = arith.subf %311, %314 : vector<2x16x16xf32>
    %316 = math.exp %315 : vector<2x16x16xf32>
    %cst_141 = arith.constant dense<0.000000e+00> : vector<2x16xf32>
    %317 = vector.multi_reduction <add>, %316, %cst_141 [2] : vector<2x16x16xf32> to vector<2x16xf32>
    %318 = vector.shape_cast %317 : vector<2x16xf32> to vector<2x16x1xf32>
    %319 = vector.broadcast %318 : vector<2x16x1xf32> to vector<2x16x16xf32>
    %320 = arith.divf %316, %319 : vector<2x16x16xf32>
    %cst_142 = arith.constant dense<0.000000e+00> : vector<2x16x8xf32>
    %321 = tpu.matmul %320, %306, %cst_142 {dimension_numbers = #tpu.dot_dimension_numbers<[2], [1], [1], [2], [0, 0, 0, 1, 1, 2], [0], [0]>} : vector<2x16x16xf32>, vector<2x16x8xf32>, vector<2x16x8xf32> -> vector<2x16x8xf32>
    %322 = vector.shape_cast %321 : vector<2x16x8xf32> to vector<32x8xf32>
    %323 = vector.extract_strided_slice %282 {offsets = [8, 0], sizes = [8, 32], strides = [1, 1]} : vector<32x32xf32> to vector<8x32xf32>
    %cst_143 = arith.constant dense<0.000000e+00> : vector<32x32xf32>
    %324 = tpu.matmul %322, %323, %cst_143 {dimension_numbers = #tpu.dot_dimension_numbers<[1], [0], [0], [1], [0, 0, 1, 1], [], []>} : vector<32x8xf32>, vector<8x32xf32>, vector<32x32xf32> -> vector<32x32xf32>
    %325 = arith.addf %303, %324 : vector<32x32xf32>
    %326 = vector.extract_strided_slice %280 {offsets = [0, 0, 16], sizes = [2, 16, 8], strides = [1, 1, 1]} : vector<2x16x96xf32> to vector<2x16x8xf32>
    %327 = vector.extract_strided_slice %280 {offsets = [0, 0, 48], sizes = [2, 16, 8], strides = [1, 1, 1]} : vector<2x16x96xf32> to vector<2x16x8xf32>
    %328 = vector.extract_strided_slice %280 {offsets = [0, 0, 80], sizes = [2, 16, 8], strides = [1, 1, 1]} : vector<2x16x96xf32> to vector<2x16x8xf32>
    %cst_144 = arith.constant dense<0.000000e+00> : vector<2x16x16xf32>
    %329 = tpu.matmul %326, %327, %cst_144 {dimension_numbers = #tpu.dot_dimension_numbers<[2], [2], [1], [1], [0, 0, 0, 1, 1, 1], [0], [0]>} : vector<2x16x8xf32>, vector<2x16x8xf32>, vector<2x16x16xf32> -> vector<2x16x16xf32>
    %cst_145 = arith.constant 0.353553385 : f32
    %330 = vector.broadcast %cst_145 : f32 to vector<2x16x16xf32>
    %331 = arith.mulf %329, %330 : vector<2x16x16xf32>
    %332 = vector.broadcast %49 : vector<2x1x16xf32> to vector<2x16x16xf32>
    %333 = arith.addf %331, %332 : vector<2x16x16xf32>
    %cst_146 = arith.constant dense<0xFF800000> : vector<2x16xf32>
    %334 = vector.multi_reduction <maximumf>, %333, %cst_146 [2] : vector<2x16x16xf32> to vector<2x16xf32>
    %335 = vector.shape_cast %334 : vector<2x16xf32> to vector<2x16x1xf32>
    %336 = vector.broadcast %335 : vector<2x16x1xf32> to vector<2x16x16xf32>
    %337 = arith.subf %333, %336 : vector<2x16x16xf32>
    %338 = math.exp %337 : vector<2x16x16xf32>
    %cst_147 = arith.constant dense<0.000000e+00> : vector<2x16xf32>
    %339 = vector.multi_reduction <add>, %338, %cst_147 [2] : vector<2x16x16xf32> to vector<2x16xf32>
    %340 = vector.shape_cast %339 : vector<2x16xf32> to vector<2x16x1xf32>
    %341 = vector.broadcast %340 : vector<2x16x1xf32> to vector<2x16x16xf32>
    %342 = arith.divf %338, %341 : vector<2x16x16xf32>
    %cst_148 = arith.constant dense<0.000000e+00> : vector<2x16x8xf32>
    %343 = tpu.matmul %342, %328, %cst_148 {dimension_numbers = #tpu.dot_dimension_numbers<[2], [1], [1], [2], [0, 0, 0, 1, 1, 2], [0], [0]>} : vector<2x16x16xf32>, vector<2x16x8xf32>, vector<2x16x8xf32> -> vector<2x16x8xf32>
    %344 = vector.shape_cast %343 : vector<2x16x8xf32> to vector<32x8xf32>
    %345 = vector.extract_strided_slice %282 {offsets = [16, 0], sizes = [8, 32], strides = [1, 1]} : vector<32x32xf32> to vector<8x32xf32>
    %cst_149 = arith.constant dense<0.000000e+00> : vector<32x32xf32>
    %346 = tpu.matmul %344, %345, %cst_149 {dimension_numbers = #tpu.dot_dimension_numbers<[1], [0], [0], [1], [0, 0, 1, 1], [], []>} : vector<32x8xf32>, vector<8x32xf32>, vector<32x32xf32> -> vector<32x32xf32>
    %347 = arith.addf %325, %346 : vector<32x32xf32>
    %348 = vector.extract_strided_slice %280 {offsets = [0, 0, 24], sizes = [2, 16, 8], strides = [1, 1, 1]} : vector<2x16x96xf32> to vector<2x16x8xf32>
    %349 = vector.extract_strided_slice %280 {offsets = [0, 0, 56], sizes = [2, 16, 8], strides = [1, 1, 1]} : vector<2x16x96xf32> to vector<2x16x8xf32>
    %350 = vector.extract_strided_slice %280 {offsets = [0, 0, 88], sizes = [2, 16, 8], strides = [1, 1, 1]} : vector<2x16x96xf32> to vector<2x16x8xf32>
    %cst_150 = arith.constant dense<0.000000e+00> : vector<2x16x16xf32>
    %351 = tpu.matmul %348, %349, %cst_150 {dimension_numbers = #tpu.dot_dimension_numbers<[2], [2], [1], [1], [0, 0, 0, 1, 1, 1], [0], [0]>} : vector<2x16x8xf32>, vector<2x16x8xf32>, vector<2x16x16xf32> -> vector<2x16x16xf32>
    %cst_151 = arith.constant 0.353553385 : f32
    %352 = vector.broadcast %cst_151 : f32 to vector<2x16x16xf32>
    %353 = arith.mulf %351, %352 : vector<2x16x16xf32>
    %354 = vector.broadcast %49 : vector<2x1x16xf32> to vector<2x16x16xf32>
    %355 = arith.addf %353, %354 : vector<2x16x16xf32>
    %cst_152 = arith.constant dense<0xFF800000> : vector<2x16xf32>
    %356 = vector.multi_reduction <maximumf>, %355, %cst_152 [2] : vector<2x16x16xf32> to vector<2x16xf32>
    %357 = vector.shape_cast %356 : vector<2x16xf32> to vector<2x16x1xf32>
    %358 = vector.broadcast %357 : vector<2x16x1xf32> to vector<2x16x16xf32>
    %359 = arith.subf %355, %358 : vector<2x16x16xf32>
    %360 = math.exp %359 : vector<2x16x16xf32>
    %cst_153 = arith.constant dense<0.000000e+00> : vector<2x16xf32>
    %361 = vector.multi_reduction <add>, %360, %cst_153 [2] : vector<2x16x16xf32> to vector<2x16xf32>
    %362 = vector.shape_cast %361 : vector<2x16xf32> to vector<2x16x1xf32>
    %363 = vector.broadcast %362 : vector<2x16x1xf32> to vector<2x16x16xf32>
    %364 = arith.divf %360, %363 : vector<2x16x16xf32>
    %cst_154 = arith.constant dense<0.000000e+00> : vector<2x16x8xf32>
    %365 = tpu.matmul %364, %350, %cst_154 {dimension_numbers = #tpu.dot_dimension_numbers<[2], [1], [1], [2], [0, 0, 0, 1, 1, 2], [0], [0]>} : vector<2x16x16xf32>, vector<2x16x8xf32>, vector<2x16x8xf32> -> vector<2x16x8xf32>
    %366 = vector.shape_cast %365 : vector<2x16x8xf32> to vector<32x8xf32>
    %367 = vector.extract_strided_slice %282 {offsets = [24, 0], sizes = [8, 32], strides = [1, 1]} : vector<32x32xf32> to vector<8x32xf32>
    %cst_155 = arith.constant dense<0.000000e+00> : vector<32x32xf32>
    %368 = tpu.matmul %366, %367, %cst_155 {dimension_numbers = #tpu.dot_dimension_numbers<[1], [0], [0], [1], [0, 0, 1, 1], [], []>} : vector<32x8xf32>, vector<8x32xf32>, vector<32x32xf32> -> vector<32x32xf32>
    %369 = arith.addf %347, %368 : vector<32x32xf32>
    %370 = arith.addf %258, %369 : vector<32x32xf32>
    %371 = vector.broadcast %260 : vector<1x32xf32> to vector<32x32xf32>
    %372 = arith.addf %370, %371 : vector<32x32xf32>
    %cst_156 = arith.constant dense<0.000000e+00> : vector<32xf32>
    %373 = vector.multi_reduction <add>, %372, %cst_156 [1] : vector<32x32xf32> to vector<32xf32>
    %374 = vector.shape_cast %373 : vector<32xf32> to vector<32x1xf32>
    %cst_157 = arith.constant 3.200000e+01 : f32
    %375 = vector.broadcast %cst_157 : f32 to vector<32x1xf32>
    %376 = arith.divf %374, %375 : vector<32x1xf32>
    %377 = arith.mulf %372, %372 : vector<32x32xf32>
    %cst_158 = arith.constant dense<0.000000e+00> : vector<32xf32>
    %378 = vector.multi_reduction <add>, %377, %cst_158 [1] : vector<32x32xf32> to vector<32xf32>
    %379 = vector.shape_cast %378 : vector<32xf32> to vector<32x1xf32>
    %cst_159 = arith.constant 3.200000e+01 : f32
    %380 = vector.broadcast %cst_159 : f32 to vector<32x1xf32>
    %381 = arith.divf %379, %380 : vector<32x1xf32>
    %382 = arith.mulf %376, %376 : vector<32x1xf32>
    %383 = arith.subf %381, %382 : vector<32x1xf32>
    %384 = vector.broadcast %376 : vector<32x1xf32> to vector<32x32xf32>
    %385 = arith.subf %372, %384 : vector<32x32xf32>
    %cst_160 = arith.constant 9.99999996E-13 : f32
    %386 = vector.broadcast %cst_160 : f32 to vector<32x1xf32>
    %387 = arith.addf %383, %386 : vector<32x1xf32>
    %388 = math.rsqrt %387 : vector<32x1xf32>
    %389 = vector.broadcast %388 : vector<32x1xf32> to vector<32x32xf32>
    %390 = arith.mulf %385, %389 : vector<32x32xf32>
    %391 = vector.broadcast %262 : vector<1x32xf32> to vector<32x32xf32>
    %392 = arith.mulf %390, %391 : vector<32x32xf32>
    %393 = vector.broadcast %264 : vector<1x32xf32> to vector<32x32xf32>
    %394 = arith.addf %392, %393 : vector<32x32xf32>
    %c0_161 = arith.constant 0 : index
    %c1_162 = arith.constant 1 : index
    %c0_163 = arith.constant 0 : index
    %c0_164 = arith.constant 0 : index
    %395 = vector.load %arg9[%c0_161, %c1_162, %c0_163, %c0_164] : memref<1x2x32x64xf32, #tpu.memory_space<vmem>>, vector<1x1x32x64xf32>
    %396 = vector.shape_cast %395 : vector<1x1x32x64xf32> to vector<32x64xf32>
    %cst_165 = arith.constant dense<0.000000e+00> : vector<32x64xf32>
    %397 = tpu.matmul %394, %396, %cst_165 {dimension_numbers = #tpu.dot_dimension_numbers<[1], [0], [0], [1], [0, 0, 1, 1], [], []>} : vector<32x32xf32>, vector<32x64xf32>, vector<32x64xf32> -> vector<32x64xf32>
    %398 = vector.broadcast %274 : vector<1x64xf32> to vector<32x64xf32>
    %399 = arith.addf %397, %398 : vector<32x64xf32>
    %cst_166 = arith.constant 5.000000e-01 : f32
    %400 = vector.broadcast %cst_166 : f32 to vector<32x64xf32>
    %401 = arith.mulf %400, %399 : vector<32x64xf32>
    %cst_167 = arith.constant 0.707106769 : f32
    %402 = vector.broadcast %cst_167 : f32 to vector<32x64xf32>
    %403 = arith.mulf %399, %402 : vector<32x64xf32>
    %404 = math.absf %403 : vector<32x64xf32>
    %cst_168 = arith.constant 0.327591091 : f32
    %405 = vector.broadcast %cst_168 : f32 to vector<32x64xf32>
    %406 = arith.mulf %405, %404 : vector<32x64xf32>
    %cst_169 = arith.constant 1.000000e+00 : f32
    %407 = vector.broadcast %cst_169 : f32 to vector<32x64xf32>
    %408 = arith.addf %407, %406 : vector<32x64xf32>
    %cst_170 = arith.constant 1.000000e+00 : f32
    %409 = vector.broadcast %cst_170 : f32 to vector<32x64xf32>
    %410 = arith.divf %409, %408 : vector<32x64xf32>
    %cst_171 = arith.constant 1.06140542 : f32
    %411 = vector.broadcast %cst_171 : f32 to vector<32x64xf32>
    %412 = arith.mulf %411, %410 : vector<32x64xf32>
    %cst_172 = arith.constant -1.45315206 : f32
    %413 = vector.broadcast %cst_172 : f32 to vector<32x64xf32>
    %414 = arith.addf %412, %413 : vector<32x64xf32>
    %415 = arith.mulf %414, %410 : vector<32x64xf32>
    %cst_173 = arith.constant 1.42141378 : f32
    %416 = vector.broadcast %cst_173 : f32 to vector<32x64xf32>
    %417 = arith.addf %415, %416 : vector<32x64xf32>
    %418 = arith.mulf %417, %410 : vector<32x64xf32>
    %cst_174 = arith.constant -0.284496725 : f32
    %419 = vector.broadcast %cst_174 : f32 to vector<32x64xf32>
    %420 = arith.addf %418, %419 : vector<32x64xf32>
    %421 = arith.mulf %420, %410 : vector<32x64xf32>
    %cst_175 = arith.constant 0.254829586 : f32
    %422 = vector.broadcast %cst_175 : f32 to vector<32x64xf32>
    %423 = arith.addf %421, %422 : vector<32x64xf32>
    %424 = arith.mulf %423, %410 : vector<32x64xf32>
    %cst_176 = arith.constant 0.000000e+00 : f32
    %425 = vector.broadcast %cst_176 : f32 to vector<32x64xf32>
    %426 = arith.subf %425, %404 : vector<32x64xf32>
    %427 = arith.mulf %426, %404 : vector<32x64xf32>
    %428 = math.exp %427 : vector<32x64xf32>
    %429 = arith.mulf %424, %428 : vector<32x64xf32>
    %cst_177 = arith.constant 1.000000e+00 : f32
    %430 = vector.broadcast %cst_177 : f32 to vector<32x64xf32>
    %431 = arith.subf %430, %429 : vector<32x64xf32>
    %cst_178 = arith.constant 0.000000e+00 : f32
    %432 = vector.broadcast %cst_178 : f32 to vector<32x64xf32>
    %433 = arith.cmpf oge, %403, %432 : vector<32x64xf32>
    %cst_179 = arith.constant 0.000000e+00 : f32
    %434 = vector.broadcast %cst_179 : f32 to vector<32x64xf32>
    %435 = arith.subf %434, %431 : vector<32x64xf32>
    %436 = arith.select %433, %431, %435 : vector<32x64xi1>, vector<32x64xf32>
    %cst_180 = arith.constant 1.000000e+00 : f32
    %437 = vector.broadcast %cst_180 : f32 to vector<32x64xf32>
    %438 = arith.addf %437, %436 : vector<32x64xf32>
    %439 = arith.mulf %401, %438 : vector<32x64xf32>
    %c0_181 = arith.constant 0 : index
    %c1_182 = arith.constant 1 : index
    %c0_183 = arith.constant 0 : index
    %c0_184 = arith.constant 0 : index
    %440 = vector.load %arg10[%c0_181, %c1_182, %c0_183, %c0_184] : memref<1x2x64x32xf32, #tpu.memory_space<vmem>>, vector<1x1x64x32xf32>
    %441 = vector.shape_cast %440 : vector<1x1x64x32xf32> to vector<64x32xf32>
    %cst_185 = arith.constant dense<0.000000e+00> : vector<32x32xf32>
    %442 = tpu.matmul %439, %441, %cst_185 {dimension_numbers = #tpu.dot_dimension_numbers<[1], [0], [0], [1], [0, 0, 1, 1], [], []>} : vector<32x64xf32>, vector<64x32xf32>, vector<32x32xf32> -> vector<32x32xf32>
    %443 = vector.broadcast %266 : vector<1x32xf32> to vector<32x32xf32>
    %444 = arith.addf %442, %443 : vector<32x32xf32>
    %445 = arith.addf %394, %444 : vector<32x32xf32>
    %cst_186 = arith.constant dense<0.000000e+00> : vector<32xf32>
    %446 = vector.multi_reduction <add>, %445, %cst_186 [1] : vector<32x32xf32> to vector<32xf32>
    %447 = vector.shape_cast %446 : vector<32xf32> to vector<32x1xf32>
    %cst_187 = arith.constant 3.200000e+01 : f32
    %448 = vector.broadcast %cst_187 : f32 to vector<32x1xf32>
    %449 = arith.divf %447, %448 : vector<32x1xf32>
    %450 = arith.mulf %445, %445 : vector<32x32xf32>
    %cst_188 = arith.constant dense<0.000000e+00> : vector<32xf32>
    %451 = vector.multi_reduction <add>, %450, %cst_188 [1] : vector<32x32xf32> to vector<32xf32>
    %452 = vector.shape_cast %451 : vector<32xf32> to vector<32x1xf32>
    %cst_189 = arith.constant 3.200000e+01 : f32
    %453 = vector.broadcast %cst_189 : f32 to vector<32x1xf32>
    %454 = arith.divf %452, %453 : vector<32x1xf32>
    %455 = arith.mulf %449, %449 : vector<32x1xf32>
    %456 = arith.subf %454, %455 : vector<32x1xf32>
    %457 = vector.broadcast %449 : vector<32x1xf32> to vector<32x32xf32>
    %458 = arith.subf %445, %457 : vector<32x32xf32>
    %cst_190 = arith.constant 9.99999996E-13 : f32
    %459 = vector.broadcast %cst_190 : f32 to vector<32x1xf32>
    %460 = arith.addf %456, %459 : vector<32x1xf32>
    %461 = math.rsqrt %460 : vector<32x1xf32>
    %462 = vector.broadcast %461 : vector<32x1xf32> to vector<32x32xf32>
    %463 = arith.mulf %458, %462 : vector<32x32xf32>
    %464 = vector.broadcast %268 : vector<1x32xf32> to vector<32x32xf32>
    %465 = arith.mulf %463, %464 : vector<32x32xf32>
    %466 = vector.broadcast %270 : vector<1x32xf32> to vector<32x32xf32>
    %467 = arith.addf %465, %466 : vector<32x32xf32>
    %468 = vector.extract_strided_slice %467 {offsets = [0, 0], sizes = [1, 32], strides = [1, 1]} : vector<32x32xf32> to vector<1x32xf32>
    %c0_191 = arith.constant 0 : index
    %c0_192 = arith.constant 0 : index
    %c0_193 = arith.constant 0 : index
    %469 = vector.load %arg11[%c0_191, %c0_192, %c0_193] : memref<1x2x32xf32, #tpu.memory_space<vmem>>, vector<1x1x32xf32>
    %470 = vector.shape_cast %469 : vector<1x1x32xf32> to vector<1x32xf32>
    %471 = vector.shape_cast %468 : vector<1x32xf32> to vector<1x1x32xf32>
    tpu.vector_store %arg11[%c0_191, %c0_192, %c0_193], %471 {strides = array<i32>} : memref<1x2x32xf32, #tpu.memory_space<vmem>>, vector<1x1x32xf32>,
    %472 = vector.extract_strided_slice %467 {offsets = [16, 0], sizes = [1, 32], strides = [1, 1]} : vector<32x32xf32> to vector<1x32xf32>
    %c0_194 = arith.constant 0 : index
    %c1_195 = arith.constant 1 : index
    %c0_196 = arith.constant 0 : index
    %473 = vector.load %arg11[%c0_194, %c1_195, %c0_196] : memref<1x2x32xf32, #tpu.memory_space<vmem>>, vector<1x1x32xf32>
    %474 = vector.shape_cast %473 : vector<1x1x32xf32> to vector<1x32xf32>
    %475 = vector.shape_cast %472 : vector<1x32xf32> to vector<1x1x32xf32>
    tpu.vector_store %arg11[%c0_194, %c1_195, %c0_196], %475 {strides = array<i32>} : memref<1x2x32xf32, #tpu.memory_space<vmem>>, vector<1x1x32xf32>,
    return
  }
  func.func @transform_0(%arg0: i32) -> (i32, i32, i32) {
    %c0_i32 = arith.constant 0 : i32
    %c0_i32_0 = arith.constant 0 : i32
    %c0_i32_1 = arith.constant 0 : i32
    return %arg0, %c0_i32, %c0_i32_0 : i32, i32, i32
  }
  func.func @transform_1(%arg0: i32) -> (i32, i32, i32) {
    %c0_i32 = arith.constant 0 : i32
    %c0_i32_0 = arith.constant 0 : i32
    %c0_i32_1 = arith.constant 0 : i32
    return %arg0, %c0_i32, %c0_i32_0 : i32, i32, i32
  }
  func.func @transform_2(%arg0: i32) -> (i32, i32, i32) {
    %c0_i32 = arith.constant 0 : i32
    %c0_i32_0 = arith.constant 0 : i32
    %c0_i32_1 = arith.constant 0 : i32
    return %arg0, %c0_i32, %c0_i32_0 : i32, i32, i32
  }
  func.func @transform_3(%arg0: i32) -> (i32, i32, i32) {
    %c0_i32 = arith.constant 0 : i32
    %c0_i32_0 = arith.constant 0 : i32
    %c0_i32_1 = arith.constant 0 : i32
    return %arg0, %c0_i32, %c0_i32_0 : i32, i32, i32
  }
  func.func @transform_4(%arg0: i32) -> (i32, i32, i32) {
    %c0_i32 = arith.constant 0 : i32
    %c0_i32_0 = arith.constant 0 : i32
    %c0_i32_1 = arith.constant 0 : i32
    return %arg0, %c0_i32, %c0_i32_0 : i32, i32, i32
  }
  func.func @transform_5(%arg0: i32) -> (i32, i32, i32, i32) {
    %c0_i32 = arith.constant 0 : i32
    %c0_i32_0 = arith.constant 0 : i32
    %c0_i32_1 = arith.constant 0 : i32
    %c0_i32_2 = arith.constant 0 : i32
    return %arg0, %c0_i32, %c0_i32_0, %c0_i32_1 : i32, i32, i32, i32
  }
  func.func @transform_6(%arg0: i32) -> (i32, i32, i32, i32) {
    %c0_i32 = arith.constant 0 : i32
    %c0_i32_0 = arith.constant 0 : i32
    %c0_i32_1 = arith.constant 0 : i32
    %c0_i32_2 = arith.constant 0 : i32
    return %arg0, %c0_i32, %c0_i32_0, %c0_i32_1 : i32, i32, i32, i32
  }
  func.func @transform_7(%arg0: i32) -> (i32, i32, i32, i32) {
    %c0_i32 = arith.constant 0 : i32
    %c0_i32_0 = arith.constant 0 : i32
    %c0_i32_1 = arith.constant 0 : i32
    %c0_i32_2 = arith.constant 0 : i32
    return %arg0, %c0_i32, %c0_i32_0, %c0_i32_1 : i32, i32, i32, i32
  }
  func.func @transform_8(%arg0: i32) -> (i32, i32, i32, i32) {
    %c0_i32 = arith.constant 0 : i32
    %c0_i32_0 = arith.constant 0 : i32
    %c0_i32_1 = arith.constant 0 : i32
    %c0_i32_2 = arith.constant 0 : i32
    return %arg0, %c0_i32, %c0_i32_0, %c0_i32_1 : i32, i32, i32, i32
  }
  func.func @transform_9(%arg0: i32) -> (i32, i32, i32, i32) {
    %c0_i32 = arith.constant 0 : i32
    %c0_i32_0 = arith.constant 0 : i32
    %c0_i32_1 = arith.constant 0 : i32
    %c0_i32_2 = arith.constant 0 : i32
    return %arg0, %c0_i32, %c0_i32_0, %c0_i32_1 : i32, i32, i32, i32
  }
  func.func @transform_10(%arg0: i32) -> (i32, i32, i32) {
    %c0_i32 = arith.constant 0 : i32
    %c0_i32_0 = arith.constant 0 : i32
    %c0_i32_1 = arith.constant 0 : i32
    return %arg0, %c0_i32, %c0_i32_0 : i32, i32, i32
  }
}

</mosaic_0001>

<bundles_post_ra>
// kernel: dpr_combined_forward.1
= control target key start
LH: loop header
LB: loop body
LE: loop exit
PB: predicated region body
PF: predicated region fallthrough
CT: control target
= control target key end

     0   :  { %s7382_s13 = smov 0   ;;  %s8384_s0 = inlined_call_operand.vmem [shape: s32[2,32,1], index: 0, kind: input, shape index: {}]   ;;  %s8385_s1 = inlined_call_operand.vmem [shape: f32[2,2,16], index: 1, kind: input, shape index: {}]   ;;  %s8386_s2 = inlined_call_operand.vmem [shape: f32[2,128,32], index: 2, kind: input, shape index: {}]   ;;  %s8387_s3 = inlined_call_operand.vmem [shape: f32[2,32,32], index: 3, kind: input, shape index: {}]   ;;  %s8388_s4 = inlined_call_operand.vmem [shape: f32[2,14,32], index: 4, kind: input, shape index: {}]   ;;  %s8389_s5 = inlined_call_operand.vmem [shape: f32[2,2,2,96], index: 5, kind: input, shape index: {}]   ;;  %s8390_s6 = inlined_call_operand.vmem [shape: f32[2,2,32,96], index: 6, kind: input, shape index: {}]   ;;  %s8391_s7 = inlined_call_operand.vmem [shape: f32[2,2,32,32], index: 7, kind: input, shape index: {}]   ;;  %s8392_s8 = inlined_call_operand.vmem [shape: f32[2,2,32,64], index: 8, kind: input, shape index: {}]   ;;  %s8393_s9 = inlined_call_operand.vmem [shape: f32[2,2,64,32], index: 9, kind: input, shape index: {}]   ;;  %s8394_s10 = inlined_call_operand.vmem [shape: f32[2,2,32], index: 10, kind: output, shape index: {}]  }
   0x1 LB: > { %s6182_s14 = sadd.s32 4294967295, %s7311_s13   ;;  %p6186_p0 = scmp.ge.s32.totalorder %s7311_s13, 1  ;;  %s7311_s13 = sphi %s7382_s13, %s20_s13  }
   0x2   : > { %p401_p1 = scmp.lt.s32.totalorder %s7311_s13, 3 }
   0x4   : > { %p402_p2 = pnand %p6186_p0, %p401_p1 }
   0x5   : > { %p482_p3 = scmp.lt.s32.totalorder (!%p402_p2), %s6182_s14, 1  ;;  %s7315_s21 = smov (!%p402_p2), 96  }
   0x6   : > { %405 = sbr.rel (%p402_p2) target bundleno = 8713 (0x2209), region = 60  ;;  %s7317_s27 = smov (!%p402_p2), 64  }
   0x7   : > { %s7318_s28 = smov (!%p402_p2), 88   ;;  %s7320_s18 = smov (!%p402_p2), 56  }
   0x8   : > { %s7322_s23 = smov (!%p402_p2), 112   ;;  %s7323_s24 = smov (!%p402_p2), 48  }
   0x9   : > { %s8398_s11 = smov (!%p402_p2), 104   ;;  %s8396_s12 = smov (!%p402_p2), 40  }
   0xb   : > { %v7313_v0 = vmov 0   ;;  %s8404_s14 = smov (!%p482_p3, %s6182_s14), 1  ;;  %v539_v21 = vlaneseq  ;;  %v7314_v25 = vmov 1.0   ;;  %vm674_vm4 = vcmask 261120  }
   0xc   : > { %7105 = vset.pattern.permute.xlu0 %v7313_v0  ;;  %7106 = vset.pattern.permute.xlu1 %v7313_v0  ;;  %s6404_s15 = sshll.u32 %s8404_s14, 5  ;;  %s6405_s16 = sshll.u32 %s8404_s14, 7  ;;  %vm900_vm5 = vcmask 64512   ;;  %vm1091_vm6 = vcmask 130048   ;;  %vm3243_vm9 = vcmask 523264  }
   0xd   : > { %s486_s19 = scalar_lea.vmem %s8384_s0, %s6404_s15  ;;  %s7404_s22 = scalar_lea.vmem %s8386_s2, %s6405_s16  ;;  %v540_v22 = vand.u32 127, %v539_v21 }
   0xe   : > { %v535_v1 = vld [vmem:[%s486_s19] sm:$0xff]  ;;  %v537_v2 = vld [vmem:[%s486_s19 + $0x10] sm:$0xff]  ;;  %v580_v3 = vld [vmem:[%s7404_s22 + $0x78] sm:$0xff]  ;;  %s500_s25 = scalar_lea.vmem %s8387_s3, %s6404_s15  ;;  %s7457_s26 = sshll.u32 %s8404_s14, 6 }
   0xf   : > { %542 = vperm.xlu0 %7105, %v535_v1   ;;  %548 = vperm.xlu1 %7106, %v537_v2   ;;  %v579_v4 = vld [vmem:[%s7404_s22 + $0x70] sm:$0xff]  ;;  %v536_v5 = vld [vmem:[%s486_s19 + $0x8] sm:$0xff]  ;;  %v538_v6 = vld [vmem:[%s486_s19 + $0x18] sm:$0xff]  ;;  %s7463_s29 = scalar_lea.vmem %s8390_s6, %s7457_s26  ;;  %s6407_s30 = sshll.u32 %s8404_s14, 4 }
  0x10   : > { %6657 = vmatprep.subr.mxu0 %v580_v3  ;;  %v578_v7 = vld [vmem:[%s7404_s22 + $0x68] sm:$0xff]  ;;  %v577_v8 = vld [vmem:[%s7404_s22 + $0x60] sm:$0xff]  ;;  %v576_v9 = vld [vmem:[%s7404_s22 + $0x58] sm:$0xff]  ;;  %s7473_s15 = scalar_lea.vmem %s8388_s4, %s6407_s30  ;;  %s6408_s17 = sshll.u32 %s8404_s14, 2 }
  0x11   : > { %6658 = vmatpush3.msra.mxu0 %v580_v3  ;;  %v575_v10 = vld [vmem:[%s7404_s22 + $0x50] sm:$0xff]  ;;  %v574_v11 = vld [vmem:[%s7404_s22 + $0x48] sm:$0xff]  ;;  %v573_v12 = vld [vmem:[%s7404_s22 + $0x40] sm:$0xff]  ;;  %s7504_s20 = scalar_lea.vmem %s8389_s5, %s6408_s17  ;;  %s7319_s30 = smov 120  }
  0x12   : > { %6659 = vmatprep.subr.mxu0 %v579_v4  ;;  %v572_v13 = vld [vmem:[%s7404_s22 + $0x38] sm:$0xff]  ;;  %v571_v14 = vld [vmem:[%s7404_s22 + $0x30] sm:$0xff]  ;;  %v570_v15 = vld [vmem:[%s7404_s22 + $0x28] sm:$0xff]  ;;  %s7612_s17 = scalar_lea.vmem %s8391_s7, %s7457_s26  ;;  %s7321_s19 = smov 80  }
  0x13   : > { %545 = vperm.xlu0 %7105, %v536_v5   ;;  %551 = vperm.xlu1 %7106, %v538_v6   ;;  %v569_v16 = vld [vmem:[%s7404_s22 + $0x20] sm:$0xff]  ;;  %v568_v17 = vld [vmem:[%s7404_s22 + $0x18] sm:$0xff]  ;;  %v567_v18 = vld [vmem:[%s7404_s22 + $0x10] sm:$0xff] }
  0x14   : > { %6660 = vmatpush3.msra.mxu0 %v579_v4  ;;  %v566_v19 = vld [vmem:[%s7404_s22 + $0x8] sm:$0xff]  ;;  %v565_v20 = vld [vmem:[%s7404_s22] sm:$0xff]  ;;  %v788_v50 = vld [vmem:[%s7463_s29 + $0x18] sm:$0xff]  ;;  %s8395_s22 = sshll.u32 %s8404_s14, 1 }
  0x15   : > { %6661 = vmatprep.subr.mxu0 %v578_v7  ;;  %v667_v28 = vld [vmem:[%s500_s25 + $0x8] sm:$0xff]  ;;  %v666_v30 = vld [vmem:[%s500_s25] sm:$0xff]  ;;  %v787_v51 = vld [vmem:[%s7463_s29 + $0x10] sm:$0xff]  ;;  %6695 = vmatprep.subr.mxu1 %v788_v50  ;;  %s490_s25 = scalar_lea.vmem %s8385_s1, %s8395_s22 }
  0x16   : > { %6662 = vmatpush3.msra.mxu0 %v578_v7  ;;  %6696 = vmatpush3.msra.mxu1 %v788_v50  ;;  %v786_v52 = vld [vmem:[%s7463_s29 + $0x8] sm:$0xff]  ;;  %v785_v53 = vld [vmem:[%s7463_s29] sm:$0xff] }
  0x17   : > { %6663 = vmatprep.subr.mxu0 %v577_v8  ;;  %6697 = vmatprep.subr.mxu1 %v787_v51 }
  0x18   : > { %6664 = vmatpush3.msra.mxu0 %v577_v8  ;;  %6698 = vmatpush3.msra.mxu1 %v787_v51 }
  0x19   : > { %6665 = vmatprep.subr.mxu0 %v576_v9  ;;  %6699 = vmatprep.subr.mxu1 %v786_v52 }
  0x1a   : > { %6666 = vmatpush3.msra.mxu0 %v576_v9  ;;  %6700 = vmatpush3.msra.mxu1 %v786_v52 }
  0x1b   : > { %6667 = vmatprep.subr.mxu0 %v575_v10  ;;  %6701 = vmatprep.subr.mxu1 %v785_v53 }
  0x1c   : > { %6668 = vmatpush3.msra.mxu0 %v575_v10  ;;  %6702 = vmatpush3.msra.mxu1 %v785_v53 }
  0x1d   : > { %6669 = vmatprep.subr.mxu0 %v574_v11 }
  0x1e   : > { %6670 = vmatpush3.msra.mxu0 %v574_v11 }
  0x1f   : > { %6671 = vmatprep.subr.mxu0 %v573_v12 }
  0x20   : > { %6672 = vmatpush3.msra.mxu0 %v573_v12 }
  0x21   : > { %6673 = vmatprep.subr.mxu0 %v572_v13 }
  0x22   : > { %6674 = vmatpush3.msra.mxu0 %v572_v13 }
  0x23   : > { %6675 = vmatprep.subr.mxu0 %v571_v14 }
  0x24   : > { %6676 = vmatpush3.msra.mxu0 %v571_v14 }
  0x25   : > { %6677 = vmatprep.subr.mxu0 %v570_v15 }
  0x26   : > { %6678 = vmatpush3.msra.mxu0 %v570_v15 }
  0x27   : > { %6679 = vmatprep.subr.mxu0 %v569_v16 }
  0x28   : > { %6680 = vmatpush3.msra.mxu0 %v569_v16 }
  0x29   : > { %6681 = vmatprep.subr.mxu0 %v568_v17 }
  0x2a   : > { %6682 = vmatpush3.msra.mxu0 %v568_v17 }
  0x2b   : > { %6683 = vmatprep.subr.mxu0 %v567_v18 }
  0x2c   : > { %6684 = vmatpush3.msra.mxu0 %v567_v18 }
  0x2d   : > { %6685 = vmatprep.subr.mxu0 %v566_v19 }
  0x2e   : > { %6686 = vmatpush3.msra.mxu0 %v566_v19 }
  0x2f   : > { %6687 = vmatprep.subr.mxu0 %v565_v20 }
  0x30   : > { %6688 = vmatpush3.msra.mxu0 %v565_v20  ;;  %v6215_v20 = vld [vmem:[%s7473_s15] ss:$0 sm:$0xff] }
  0x8a   : > { %v543_v23 = vpop.permute.xlu0 %542  ;;  %v549_v24 = vpop.permute.xlu1 %548 }
  0x8b   : > { %vm553_vm0 = vcmp.eq.s32.totalorder %v540_v22, %v543_v23  ;;  %vm555_vm1 = vcmp.eq.s32.totalorder %v540_v22, %v549_v24  ;;  %v6216_v23 = vld [vmem:[%s7473_s15 + $0x1] ss:$0 sm:$0xff] }
  0x8c   : > { %6689 = vmatprep.mubr.msk.f32.mxu0 %vm553_vm0, %v7314_v25  ;;  %vm6018_vm0 = vcmask 253952  }
  0x8e   : > { %v546_v26 = vpop.permute.xlu0 %545  ;;  %v552_v27 = vpop.permute.xlu1 %551 }
  0x8f   : > { %vm554_vm2 = vcmp.eq.s32.totalorder %v540_v22, %v546_v26  ;;  %vm556_vm3 = vcmp.eq.s32.totalorder %v540_v22, %v552_v27 }
  0x90   : > { %6690 = vmatmul.mubr.msk.f32.vlgmr.msra.gmra.mxu0 %vm554_vm2, %v7314_v25 }
  0x91   : > { %6692 = vmatprep.mubr.msk.f32.mxu0 %vm555_vm1, %v7314_v25 }
  0x94   : > { %6693 = vmatmul.mubr.msk.f32.gmra.mxu0 %vm556_vm3, %v7314_v25 }
 0x150   : > { %v6691_v29 = vpop.f32.mrf.mxu0 }
 0x151   : > { %v7428_v31 = vadd.f32 %v6691_v29, %v667_v28 }
 0x152   : > { %v647_v32 = vpop.f32.mrf.mxu0 }
 0x153   : > { %v7430_v33 = vadd.f32 %v666_v30, %v647_v32  ;;  %v678_v34 = vsel %vm674_vm4, %v7428_v31, 0.0  ;;  %v693_v42 = vmul.f32 %v7428_v31, %v7428_v31 }
 0x154   : > { %679 = vadd.xlane.f32.xlu1 %v678_v34  ;;  %v6694_v35 = vpop.f32.mrf.mxu0 }
 0x155   : > { %v675_v36 = vsel %vm674_vm4, %v7430_v33, 0.0  ;;  %v692_v37 = vmul.f32 %v7430_v33, %v7430_v33  ;;  %v7447_v44 = vadd.f32 %v6694_v35, %v667_v28  ;;  %v699_v46 = vsel %vm674_vm4, %v693_v42, 0.0 }
 0x156   : > { %676 = vadd.xlane.f32.xlu0 %v675_v36  ;;  %v657_v38 = vpop.f32.mrf.mxu0 }
 0x157   : > { %v7438_v39 = vadd.f32 %v666_v30, %v657_v38  ;;  %v696_v40 = vsel %vm674_vm4, %v692_v37, 0.0  ;;  %v684_v47 = vsel %vm674_vm4, %v7447_v44, 0.0  ;;  %v695_v48 = vmul.f32 %v7447_v44, %v7447_v44 }
 0x159   : > { %v681_v41 = vsel %vm674_vm4, %v7438_v39, 0.0  ;;  %v694_v43 = vmul.f32 %v7438_v39, %v7438_v39  ;;  %v705_v49 = vsel %vm674_vm4, %v695_v48, 0.0 }
 0x15a   : > { %697 = vadd.xlane.f32.xlu0 %v696_v40  ;;  %682 = vadd.xlane.f32.xlu1 %v681_v41  ;;  %v7499_v41 = vshrl.u32 %v539_v21, 7 }
 0x15b   : > { %v702_v45 = vsel %vm674_vm4, %v694_v43, 0.0  ;;  %v784_v43 = vld [vmem:[%s7504_s20] sm:$0x3] }
 0x15c   : > { %v7507_v42 = vsub.s32 0, %v7499_v41 }
 0x15e   : > { %700 = vadd.xlane.f32.xlu0 %v699_v46  ;;  %703 = vadd.xlane.f32.xlu1 %v702_v45 }
 0x162   : > { %685 = vadd.xlane.f32.xlu0 %v684_v47 }
 0x166   : > { %706 = vadd.xlane.f32.xlu0 %v705_v49 }
 0x1dd   : > { %v680_v54 = vpop.xlane.xlu1 %679 }
 0x1de   : > { %v689_v59 = vmul.f32 0.03125, %v680_v54 }
 0x1df   : > { %v677_v55 = vpop.xlane.xlu0 %676 }
 0x1e0   : > { %v688_v56 = vmul.f32 0.03125, %v677_v55  ;;  %v713_v3 = vmul.f32 %v689_v59, %v689_v59  ;;  %v721_v24 = vsub.f32 %v7428_v31, %v689_v59 }
 0x1e2   : > { %v712_v60 = vmul.f32 %v688_v56, %v688_v56  ;;  %v720_v18 = vsub.f32 %v7430_v33, %v688_v56  ;;  %v7316_v56 = vmov 1966171168  }
 0x1e3   : > { %v698_v57 = vpop.xlane.xlu0 %697  ;;  %v683_v58 = vpop.xlane.xlu1 %682 }
 0x1e4   : > { %v708_v61 = vmul.f32 0.03125, %v698_v57  ;;  %v690_v62 = vmul.f32 0.03125, %v683_v58  ;;  %v757_v57 = vunpack.c.l.s4 %v7316_v56  ;;  %v752_v58 = vld [vmem:[%s490_s25] sm:$0x3]  ;;  %s7324_s25 = smov 72  }
 0x1e5   : > { %v753_v59 = vsub.f32 1.0, %v752_v58 }
 0x1e6   : > { %v716_v63 = vsub.f32 %v708_v61, %v712_v60  ;;  %v714_v0 = vmul.f32 %v690_v62, %v690_v62  ;;  %v722_v27 = vsub.f32 %v7438_v39, %v690_v62  ;;  %v758_v60 = vunpack.c.0.s8 %v757_v57 }
 0x1e7   : > { %v701_v1 = vpop.xlane.xlu0 %700  ;;  %v704_v2 = vpop.xlane.xlu1 %703  ;;  %v754_v61 = vmul.f32 -3.4028235e+38, %v753_v59 }
 0x1e8   : > { %v724_v4 = vadd.f32 1e-12, %v716_v63  ;;  %v709_v5 = vmul.f32 0.03125, %v701_v1  ;;  %v710_v6 = vmul.f32 0.03125, %v704_v2  ;;  %v761_v62 = vsub.s32 %v758_v60, %v7499_v41 }
 0x1ea   : > { %7107 = vrsqrt.f32 %v724_v4  ;;  %v717_v7 = vsub.f32 %v709_v5, %v713_v3  ;;  %v718_v8 = vsub.f32 %v710_v6, %v714_v0  ;;  %v762_v63 = vrot.slane %v754_v61, %v761_v62 }
 0x1eb   : > { %v686_v9 = vpop.xlane.xlu0 %685 }
 0x1ec   : > { %v725_v10 = vadd.f32 1e-12, %v717_v7  ;;  %v726_v11 = vadd.f32 1e-12, %v718_v8  ;;  %v691_v12 = vmul.f32 0.03125, %v686_v9  ;;  %v770_v0 = vrot.slane %v762_v63, %v761_v62 }
 0x1ed   : > { %v763_v5 = vcombine.high %v762_v63, %v762_v63 }
 0x1ee   : > { %7109 = vrsqrt.f32 %v725_v10  ;;  %v715_v14 = vmul.f32 %v691_v12, %v691_v12  ;;  %v723_v31 = vsub.f32 %v7447_v44, %v691_v12  ;;  %v792_v44 = vrot.slane %v784_v43, %v7507_v42 }
 0x1ef   : > { %7111 = vrsqrt.f32 %v726_v11  ;;  %v707_v13 = vpop.xlane.xlu0 %706  ;;  %v7551_v1 = vrot.slane %v770_v0, %v7507_v42  ;;  %v777_v10 = vrot.slane %v763_v5, %v761_v62 }
 0x1f0   : > { %v711_v15 = vmul.f32 0.03125, %v707_v13 }
 0x1f2   : > { %v719_v16 = vsub.f32 %v711_v15, %v715_v14  ;;  %v7558_v14 = vrot.slane %v777_v10, %v7507_v42 }
 0x1f4   : > { %v727_v17 = vadd.f32 1e-12, %v719_v16 }
 0x1f6   : > { %7113 = vrsqrt.f32 %v727_v17 }
 0x1f7   : > { %v7108_v19 = vpop.eup %7107 }
 0x1f8   : > { %v732_v22 = vmul.f32 %v7108_v19, %v720_v18 }
 0x1fa   : > { %v740_v25 = vmul.f32 %v6215_v20, %v732_v22 }
 0x1fb   : > { %v7110_v26 = vpop.eup %7109 }
 0x1fc   : > { %v7112_v28 = vpop.eup %7111  ;;  %v7480_v29 = vadd.f32 %v6216_v23, %v740_v25  ;;  %v733_v30 = vmul.f32 %v7110_v26, %v721_v24 }
 0x1fd   : > { %v734_v32 = vmul.f32 %v7112_v28, %v722_v27 }
 0x1fe   : > { %6703 = vmatprep.mubr.msk.f32.mxu1 %vm674_vm4, %v7480_v29  ;;  %v741_v33 = vmul.f32 %v6215_v20, %v733_v30 }
 0x1ff   : > { %v742_v34 = vmul.f32 %v6215_v20, %v734_v32 }
 0x200   : > { %v7484_v35 = vadd.f32 %v6216_v23, %v741_v33 }
 0x201   : > { %v7486_v36 = vadd.f32 %v6216_v23, %v742_v34 }
 0x202   : > { %6704 = vmatmul.mubr.msk.f32.vlgmr.msra.gmra.mxu1 %vm674_vm4, %v7484_v35 }
 0x203   : > { %v7114_v37 = vpop.eup %7113  ;;  %6706 = vmatprep.mubr.msk.f32.mxu1 %vm674_vm4, %v7486_v36 }
 0x204   : > { %v735_v38 = vmul.f32 %v7114_v37, %v723_v31 }
 0x206   : > { %v743_v39 = vmul.f32 %v6215_v20, %v735_v38 }
 0x208   : > { %v7493_v40 = vadd.f32 %v6216_v23, %v743_v39 }
 0x20a   : > { %6707 = vmatmul.mubr.msk.f32.gmra.mxu1 %vm674_vm4, %v7493_v40 }
 0x2c2   : > { %v6705_v45 = vpop.f32.mrf.mxu1 }
 0x2c3   : > { %v7511_v46 = vadd.f32 %v6705_v45, %v792_v44 }
 0x2c4   : > { %v871_v47 = vpop.f32.mrf.mxu1 }
 0x2c5   : > { %v7513_v48 = vadd.f32 %v871_v47, %v792_v44  ;;  %898 = vrot.lane.b32.xlu1 %v7511_v46, %s7315_s21 }
 0x2c7   : > { %896 = vrot.lane.b32.xlu0 %v7513_v48, %s7315_s21  ;;  %6713 = vmatprep.mubr.msk.f32.mxu1 %vm900_vm5, %v7513_v48 }
 0x2ca   : > { %v6708_v21 = vpop.f32.mrf.mxu1 }
 0x2cb   : > { %v7521_v49 = vadd.f32 %v6708_v21, %v792_v44 }
 0x2cc   : > { %v881_v50 = vpop.f32.mrf.mxu1 }
 0x2cd   : > { %988 = vrot.lane.b32.xlu1 %v7521_v49, %s7315_s21  ;;  %v7525_v51 = vadd.f32 %v881_v50, %v792_v44 }
 0x2d1   : > { %986 = vrot.lane.b32.xlu1 %v7525_v51, %s7315_s21 }
 0x337   : > { %v899_v52 = vpop.permute.xlu1 %898 }
 0x338   : > { %6709 = vmatprep.subr.msk.mxu1 %vm900_vm5, %v899_v52 }
 0x339   : > { %v897_v53 = vpop.permute.xlu0 %896  ;;  %6710 = vmatpush3.xpose.msk.msra.mxu1 %vm900_vm5, %v899_v52 }
 0x33a   : > { %6711 = vmatprep.subr.msk.mxu1 %vm900_vm5, %v897_v53 }
 0x33d   : > { %6712 = vmatpush3.xpose.msk.msra.mxu1 %vm900_vm5, %v897_v53 }
 0x33f   : > { %v989_v54 = vpop.permute.xlu1 %988 }
 0x340   : > { %6714 = vmatmul.mubr.msk.f32.vlgmr.msra.gmra.mxu1 %vm900_vm5, %v7511_v46  ;;  %6716 = vmatprep.subr.msk.mxu1 %vm900_vm5, %v989_v54 }
 0x341   : > { %6717 = vmatpush3.xpose.msk.msra.mxu1 %vm900_vm5, %v989_v54  ;;  %6720 = vmatprep.mubr.msk.f32.mxu1 %vm900_vm5, %v7525_v51 }
 0x343   : > { %v987_v55 = vpop.permute.xlu1 %986 }
 0x344   : > { %6718 = vmatprep.subr.msk.mxu1 %vm900_vm5, %v987_v55 }
 0x345   : > { %6719 = vmatpush3.xpose.msk.msra.mxu1 %vm900_vm5, %v987_v55 }
 0x348   : > { %6721 = vmatmul.mubr.msk.f32.vlgmr.msra.gmra.mxu1 %vm900_vm5, %v7521_v49 }
 0x400   : > { %v6715_v2 = vpop.f32.mrf.mxu1 }
 0x401   : > { %v1074_v3 = vmul.f32 0.35355338, %v6715_v2 }
 0x402   : > { %v975_v4 = vpop.f32.mrf.mxu1 }
 0x403   : > { %v1073_v6 = vmul.f32 0.35355338, %v975_v4  ;;  %v1088_v7 = vadd.f32 %v7551_v1, %v1074_v3 }
 0x405   : > { %v1095_v8 = vsel %vm1091_vm6, %v1088_v7, -inf  ;;  %v1087_v9 = vadd.f32 %v7551_v1, %v1073_v6 }
 0x406   : > { %1096 = vmax.xlane.f32.xlu1 %v1095_v8 }
 0x407   : > { %v1092_v11 = vsel %vm1091_vm6, %v1087_v9, -inf }
 0x408   : > { %1093 = vmax.xlane.f32.xlu0 %v1092_v11  ;;  %v6722_v12 = vpop.f32.mrf.mxu1 }
 0x409   : > { %v1076_v15 = vmul.f32 0.35355338, %v6722_v12  ;;  %v890_v12 = vld [vmem:[%s7612_s17] sm:$0xff] }
 0x40a   : > { %v1064_v13 = vpop.f32.mrf.mxu1 }
 0x40b   : > { %v1075_v16 = vmul.f32 0.35355338, %v1064_v13  ;;  %v1090_v19 = vadd.f32 %v7558_v14, %v1076_v15 }
 0x40d   : > { %v1089_v17 = vadd.f32 %v7558_v14, %v1075_v16  ;;  %v1101_v20 = vsel %vm1091_vm6, %v1090_v19, -inf }
 0x40f   : > { %v1098_v18 = vsel %vm1091_vm6, %v1089_v17, -inf }
 0x410   : > { %1099 = vmax.xlane.f32.xlu0 %v1098_v18 }
 0x414   : > { %1102 = vmax.xlane.f32.xlu0 %v1101_v20 }
 0x417   : > { %1138 = vrot.lane.b32.xlu1 %v7511_v46, %s7317_s27 }
 0x41b   : > { %1225 = vrot.lane.b32.xlu1 %v7521_v49, %s7317_s27 }
 0x41f   : > { %1316 = vrot.lane.b32.xlu1 %v7511_v46, %s7318_s28 }
 0x423   : > { %1314 = vrot.lane.b32.xlu1 %v7513_v48, %s7318_s28 }
 0x427   : > { %1310 = vrot.lane.b32.xlu1 %v7513_v48, %s7319_s30 }
 0x42a   : > { %1136 = vrot.lane.b32.xlu0 %v7513_v48, %s7317_s27 }
 0x42e   : > { %1223 = vrot.lane.b32.xlu0 %v7525_v51, %s7317_s27 }
 0x432   : > { %1407 = vrot.lane.b32.xlu0 %v7521_v49, %s7318_s28 }
 0x48f   : > { %v1097_v22 = vpop.xlane.xlu1 %1096 }
 0x490   : > { %v1105_v23 = vsub.f32 %v1088_v7, %v1097_v22 }
 0x491   : > { %v1094_v24 = vpop.xlane.xlu0 %1093 }
 0x492   : > { %v1110_v25 = vmul.f32 1.442695, %v1105_v23  ;;  %v1104_v26 = vsub.f32 %v1087_v9, %v1094_v24 }
 0x493   : > { %v1139_v27 = vpop.permute.xlu1 %1138 }
 0x494   : > { %7115 = vpow2.f32 %v1110_v25  ;;  %v1108_v28 = vmul.f32 1.442695, %v1104_v26  ;;  %6723 = vmatprep.subr.mxu1 %v1139_v27 }
 0x495   : > { %6724 = vmatpush3.msra.mxu1 %v1139_v27 }
 0x496   : > { %7117 = vpow2.f32 %v1108_v28 }
 0x497   : > { %v1226_v30 = vpop.permute.xlu1 %1225 }
 0x499   : > { %v1100_v32 = vpop.xlane.xlu0 %1099 }
 0x49a   : > { %v1106_v53 = vsub.f32 %v1089_v17, %v1100_v32 }
 0x49b   : > { %v1317_v33 = vpop.permute.xlu1 %1316 }
 0x49c   : > { %6737 = vmatprep.subr.msk.mxu0 %vm900_vm5, %v1317_v33  ;;  %v1112_v54 = vmul.f32 1.442695, %v1106_v53 }
 0x49d   : > { %v1103_v34 = vpop.xlane.xlu0 %1102  ;;  %6738 = vmatpush3.xpose.msk.msra.mxu0 %vm900_vm5, %v1317_v33 }
 0x49e   : > { %v1107_v31 = vsub.f32 %v1090_v19, %v1103_v34 }
 0x49f   : > { %v1315_v37 = vpop.permute.xlu1 %1314 }
 0x4a0   : > { %v1114_v38 = vmul.f32 1.442695, %v1107_v31  ;;  %6739 = vmatprep.subr.msk.mxu0 %vm900_vm5, %v1315_v37 }
 0x4a1   : > { %v7116_v39 = vpop.eup %7115  ;;  %v1137_v43 = vpop.permute.xlu0 %1136  ;;  %6740 = vmatpush3.xpose.msk.msra.mxu0 %vm900_vm5, %v1315_v37 }
 0x4a2   : > { %7119 = vpow2.f32 %v1114_v38  ;;  %6725 = vmatprep.subr.mxu1 %v1137_v43  ;;  %v1119_v44 = vsel %vm1091_vm6, %v7116_v39, 0.0 }
 0x4a3   : > { %v7118_v45 = vpop.eup %7117  ;;  %1120 = vadd.xlane.f32.xlu0 %v1119_v44  ;;  %6726 = vmatpush3.msra.mxu1 %v1137_v43  ;;  %v1311_v47 = vpop.permute.xlu1 %1310  ;;  %7121 = vpow2.f32 %v1112_v54 }
 0x4a4   : > { %6730 = vmatprep.subr.mxu1 %v1226_v30  ;;  %6741 = vmatprep.mubr.msk.f32.mxu0 %vm900_vm5, %v1311_v47  ;;  %v1116_v21 = vsel %vm1091_vm6, %v7118_v45, 0.0 }
 0x4a5   : > { %1117 = vadd.xlane.f32.xlu1 %v1116_v21  ;;  %v1224_v57 = vpop.permute.xlu0 %1223 }
 0x4a9   : > { %v1408_v58 = vpop.permute.xlu0 %1407 }
 0x4af   : > { %v7120_v50 = vpop.eup %7119 }
 0x4b0   : > { %v1125_v52 = vsel %vm1091_vm6, %v7120_v50, 0.0  ;;  %v7122_v55 = vpop.eup %7121 }
 0x4b1   : > { %1126 = vadd.xlane.f32.xlu0 %v1125_v52  ;;  %v1122_v56 = vsel %vm1091_vm6, %v7122_v55, 0.0 }
 0x4b6   : > { %1405 = vrot.lane.b32.xlu1 %v7525_v51, %s7318_s28 }
 0x4c7   : > { %1312 = vrot.lane.b32.xlu0 %v7511_v46, %s7319_s30 }
 0x4cb   : > { %1401 = vrot.lane.b32.xlu0 %v7525_v51, %s7319_s30 }
 0x4da   : > { %1123 = vadd.xlane.f32.xlu1 %v1122_v56 }
 0x4eb   : > { %1403 = vrot.lane.b32.xlu1 %v7521_v49, %s7319_s30 }
 0x52c   : > { %v1121_v59 = vpop.xlane.xlu0 %1120 }
 0x52d   : > { %7123 = vrcp.f32 %v1121_v59 }
 0x52e   : > { %v1118_v60 = vpop.xlane.xlu1 %1117 }
 0x52f   : > { %7125 = vrcp.f32 %v1118_v60 }
 0x532   : > { %v1406_v4 = vpop.permute.xlu1 %1405 }
 0x53a   : > { %v1127_v61 = vpop.xlane.xlu0 %1126  ;;  %v7124_v62 = vpop.eup %7123 }
 0x53b   : > { %v1131_v3 = vmul.f32 %v7124_v62, %v7116_v39  ;;  %7127 = vrcp.f32 %v1127_v61 }
 0x53c   : > { %v7126_v63 = vpop.eup %7125 }
 0x53d   : > { %v1129_v0 = vmul.f32 %v7126_v63, %v7118_v45 }
 0x53e   : > { %v1313_v2 = vpop.permute.xlu0 %1312 }
 0x53f   : > { %6727 = vmatprep.mubr.msk.f32.mxu1 %vm1091_vm6, %v1129_v0  ;;  %6742 = vmatmul.mubr.msk.f32.vlgmr.msra.gmra.mxu0 %vm900_vm5, %v1313_v2 }
 0x540   : > { %6728 = vmatmul.mubr.msk.f32.vlgmr.msra.gmra.mxu1 %vm1091_vm6, %v1131_v3 }
 0x541   : > { %6731 = vmatpush3.msra.mxu1 %v1226_v30 }
 0x542   : > { %6732 = vmatprep.subr.mxu1 %v1224_v57  ;;  %v1402_v10 = vpop.permute.xlu0 %1401 }
 0x543   : > { %6733 = vmatpush3.msra.mxu1 %v1224_v57 }
 0x544   : > { %6744 = vmatprep.subr.msk.mxu1 %vm900_vm5, %v1408_v58 }
 0x548   : > { %v7128_v6 = vpop.eup %7127 }
 0x549   : > { %v1135_v9 = vmul.f32 %v7128_v6, %v7120_v50 }
 0x563   : > { %v1124_v5 = vpop.xlane.xlu1 %1123 }
 0x564   : > { %7129 = vrcp.f32 %v1124_v5 }
 0x567   : > { %v1404_v11 = vpop.permute.xlu1 %1403 }
 0x571   : > { %v7130_v7 = vpop.eup %7129 }
 0x572   : > { %v1133_v8 = vmul.f32 %v7130_v7, %v7122_v55 }
 0x574   : > { %6734 = vmatprep.mubr.msk.f32.mxu1 %vm1091_vm6, %v1133_v8 }
 0x575   : > { %6735 = vmatmul.mubr.msk.f32.vlgmr.msra.gmra.mxu1 %vm1091_vm6, %v1135_v9 }
 0x576   : > { %6745 = vmatpush3.xpose.msk.msra.mxu1 %vm900_vm5, %v1408_v58  ;;  %6748 = vmatprep.mubr.msk.f32.mxu1 %vm900_vm5, %v1402_v10 }
 0x577   : > { %6746 = vmatprep.subr.msk.mxu1 %vm900_vm5, %v1406_v4 }
 0x57a   : > { %6747 = vmatpush3.xpose.msk.msra.mxu1 %vm900_vm5, %v1406_v4 }
 0x57b   : > { %6773 = vmatprep.subr.mxu1 %v890_v12 }
 0x57d   : > { %6749 = vmatmul.mubr.msk.f32.vlgmr.msra.gmra.mxu1 %vm900_vm5, %v1404_v11 }
 0x57e   : > { %6774 = vmatpush3.msra.mxu1 %v890_v12 }
 0x5ff   : > { %v6743_v13 = vpop.f32.mrf.mxu0 }
 0x600   : > { %v1493_v15 = vmul.f32 0.35355338, %v6743_v13  ;;  %v6729_v16 = vpop.f32.mrf.mxu1 }
 0x601   : > { %v1392_v17 = vpop.f32.mrf.mxu0 }
 0x602   : > { %v1492_v18 = vmul.f32 0.35355338, %v1392_v17  ;;  %v1214_v19 = vpop.f32.mrf.mxu1  ;;  %v1497_v20 = vadd.f32 %v1493_v15, %v7551_v1  ;;  %v891_v17 = vld [vmem:[%s7612_s17 + $0x8] sm:$0xff] }
 0x603   : > { %6775 = vmatprep.mubr.msk.f32.mxu1 %vm900_vm5, %v1214_v19 }
 0x604   : > { %6776 = vmatmul.mubr.msk.f32.vlgmr.msra.gmra.mxu1 %vm900_vm5, %v6729_v16  ;;  %v1503_v22 = vsel %vm1091_vm6, %v1497_v20, -inf  ;;  %v1496_v23 = vadd.f32 %v1492_v18, %v7551_v1 }
 0x605   : > { %1504 = vmax.xlane.f32.xlu1 %v1503_v22 }
 0x606   : > { %v1500_v24 = vsel %vm1091_vm6, %v1496_v23, -inf }
 0x607   : > { %1501 = vmax.xlane.f32.xlu0 %v1500_v24 }
 0x635   : > { %v6736_v25 = vpop.f32.mrf.mxu1 }
 0x637   : > { %v1301_v26 = vpop.f32.mrf.mxu1 }
 0x638   : > { %6778 = vmatprep.mubr.msk.f32.mxu1 %vm900_vm5, %v1301_v26 }
 0x639   : > { %6779 = vmatmul.mubr.msk.f32.gmra.mxu1 %vm900_vm5, %v6736_v25 }
 0x63d   : > { %v6750_v27 = vpop.f32.mrf.mxu1 }
 0x63e   : > { %v1495_v30 = vmul.f32 0.35355338, %v6750_v27 }
 0x63f   : > { %v1483_v28 = vpop.f32.mrf.mxu1 }
 0x640   : > { %v1494_v32 = vmul.f32 0.35355338, %v1483_v28  ;;  %v1499_v31 = vadd.f32 %v1495_v30, %v7558_v14 }
 0x642   : > { %v1498_v33 = vadd.f32 %v1494_v32, %v7558_v14  ;;  %v1509_v37 = vsel %vm1091_vm6, %v1499_v31, -inf }
 0x644   : > { %v1506_v34 = vsel %vm1091_vm6, %v1498_v33, -inf }
 0x645   : > { %1507 = vmax.xlane.f32.xlu0 %v1506_v34 }
 0x649   : > { %1510 = vmax.xlane.f32.xlu0 %v1509_v37 }
 0x68e   : > { %v1505_v38 = vpop.xlane.xlu1 %1504 }
 0x68f   : > { %v1513_v39 = vsub.f32 %v1497_v20, %v1505_v38 }
 0x690   : > { %v1502_v43 = vpop.xlane.xlu0 %1501 }
 0x691   : > { %v1518_v44 = vmul.f32 1.442695, %v1513_v39  ;;  %v1512_v45 = vsub.f32 %v1496_v23, %v1502_v43 }
 0x693   : > { %7131 = vpow2.f32 %v1518_v44  ;;  %v1516_v47 = vmul.f32 1.442695, %v1512_v45 }
 0x695   : > { %7133 = vpow2.f32 %v1516_v47 }
 0x6a0   : > { %v7132_v21 = vpop.eup %7131 }
 0x6a1   : > { %v1527_v50 = vsel %vm1091_vm6, %v7132_v21, 0.0 }
 0x6a2   : > { %v7134_v52 = vpop.eup %7133  ;;  %1528 = vadd.xlane.f32.xlu0 %v1527_v50 }
 0x6a3   : > { %v1524_v53 = vsel %vm1091_vm6, %v7134_v52, 0.0 }
 0x6a4   : > { %1525 = vadd.xlane.f32.xlu1 %v1524_v53 }
 0x6b5   : > { %1546 = vrot.lane.b32.xlu1 %v7511_v46, %s7320_s18 }
 0x6b9   : > { %1633 = vrot.lane.b32.xlu1 %v7521_v49, %s7320_s18 }
 0x6c4   : > { %v7676_v34 = vpop.f32.mrf.mxu1 }
 0x6ce   : > { %v1508_v54 = vpop.xlane.xlu0 %1507 }
 0x6cf   : > { %v1514_v55 = vsub.f32 %v1498_v33, %v1508_v54 }
 0x6d1   : > { %v1520_v56 = vmul.f32 1.442695, %v1514_v55 }
 0x6d2   : > { %v1511_v57 = vpop.xlane.xlu0 %1510 }
 0x6d3   : > { %7135 = vpow2.f32 %v1520_v56  ;;  %v1515_v58 = vsub.f32 %v1499_v31, %v1511_v57  ;;  %v7678_v31 = vpop.f32.mrf.mxu1 }
 0x6d5   : > { %v1522_v59 = vmul.f32 1.442695, %v1515_v58 }
 0x6d7   : > { %7137 = vpow2.f32 %v1522_v59 }
 0x6e0   : > { %v7136_v60 = vpop.eup %7135 }
 0x6e1   : > { %v1530_v61 = vsel %vm1091_vm6, %v7136_v60, 0.0 }
 0x6e2   : > { %1531 = vadd.xlane.f32.xlu1 %v1530_v61 }
 0x6e4   : > { %v7138_v62 = vpop.eup %7137 }
 0x6e5   : > { %v1533_v63 = vsel %vm1091_vm6, %v7138_v62, 0.0 }
 0x6e6   : > { %1534 = vadd.xlane.f32.xlu0 %v1533_v63 }
 0x6f3   : > { %1631 = vrot.lane.b32.xlu1 %v7525_v51, %s7320_s18 }
 0x6f7   : > { %1916 = vrot.lane.b32.xlu1 %v7513_v48, %s7321_s19 }
 0x6f9   : > { %v7680_v37 = vpop.f32.mrf.mxu1 }
 0x6fb   : > { %1912 = vrot.lane.b32.xlu1 %v7513_v48, %s7322_s23  ;;  %v7684_v39 = vpop.f32.mrf.mxu1 }
 0x6fc   : > { %1544 = vrot.lane.b32.xlu0 %v7513_v48, %s7320_s18 }
 0x6ff   : > { %2007 = vrot.lane.b32.xlu1 %v7525_v51, %s7321_s19 }
 0x700   : > { %1918 = vrot.lane.b32.xlu0 %v7511_v46, %s7321_s19 }
 0x703   : > { %2005 = vrot.lane.b32.xlu1 %v7521_v49, %s7322_s23 }
 0x704   : > { %2009 = vrot.lane.b32.xlu0 %v7521_v49, %s7321_s19 }
 0x708   : > { %1914 = vrot.lane.b32.xlu0 %v7511_v46, %s7322_s23 }
 0x70c   : > { %2003 = vrot.lane.b32.xlu0 %v7525_v51, %s7322_s23 }
 0x72b   : > { %v1529_v5 = vpop.xlane.xlu0 %1528 }
 0x72d   : > { %v1526_v0 = vpop.xlane.xlu1 %1525 }
 0x72e   : > { %7139 = vrcp.f32 %v1526_v0 }
 0x72f   : > { %7141 = vrcp.f32 %v1529_v5 }
 0x731   : > { %v1547_v2 = vpop.permute.xlu1 %1546 }
 0x732   : > { %6751 = vmatprep.subr.mxu0 %v1547_v2 }
 0x733   : > { %6752 = vmatpush3.msra.mxu0 %v1547_v2 }
 0x735   : > { %v1634_v6 = vpop.permute.xlu1 %1633 }
 0x73b   : > { %v7140_v3 = vpop.eup %7139 }
 0x73c   : > { %v1537_v4 = vmul.f32 %v7140_v3, %v7134_v52  ;;  %v7142_v10 = vpop.eup %7141 }
 0x73d   : > { %v1539_v13 = vmul.f32 %v7142_v10, %v7132_v21 }
 0x73e   : > { %6755 = vmatprep.mubr.msk.f32.mxu0 %vm1091_vm6, %v1537_v4 }
 0x76b   : > { %v1532_v7 = vpop.xlane.xlu1 %1531 }
 0x76c   : > { %7143 = vrcp.f32 %v1532_v7 }
 0x76f   : > { %v1535_v8 = vpop.xlane.xlu0 %1534  ;;  %v1632_v9 = vpop.permute.xlu1 %1631 }
 0x770   : > { %7145 = vrcp.f32 %v1535_v8 }
 0x773   : > { %v1545_v11 = vpop.permute.xlu0 %1544  ;;  %v1917_v12 = vpop.permute.xlu1 %1916 }
 0x774   : > { %6753 = vmatprep.subr.mxu0 %v1545_v11 }
 0x775   : > { %6754 = vmatpush3.msra.mxu0 %v1545_v11 }
 0x776   : > { %6756 = vmatmul.mubr.msk.f32.vlgmr.msra.gmra.mxu0 %vm1091_vm6, %v1539_v13  ;;  %6758 = vmatprep.subr.mxu0 %v1634_v6 }
 0x777   : > { %v1919_v15 = vpop.permute.xlu0 %1918  ;;  %6759 = vmatpush3.msra.mxu0 %v1634_v6  ;;  %v1913_v16 = vpop.permute.xlu1 %1912 }
 0x778   : > { %6760 = vmatprep.subr.mxu0 %v1632_v9 }
 0x779   : > { %v7144_v18 = vpop.eup %7143  ;;  %6761 = vmatpush3.msra.mxu0 %v1632_v9 }
 0x77a   : > { %v1541_v19 = vmul.f32 %v7144_v18, %v7136_v60  ;;  %6765 = vmatprep.subr.mxu0 %v891_v17 }
 0x77b   : > { %v2010_v20 = vpop.permute.xlu0 %2009  ;;  %v2008_v23 = vpop.permute.xlu1 %2007 }
 0x77c   : > { %6762 = vmatprep.mubr.msk.f32.mxu0 %vm1091_vm6, %v1541_v19  ;;  %6788 = vmatprep.subr.msk.mxu1 %vm900_vm5, %v2010_v20 }
 0x77d   : > { %v7146_v22 = vpop.eup %7145  ;;  %6789 = vmatpush3.xpose.msk.msra.mxu1 %vm900_vm5, %v2010_v20 }
 0x77e   : > { %6790 = vmatprep.subr.msk.mxu1 %vm900_vm5, %v2008_v23  ;;  %v1543_v24 = vmul.f32 %v7146_v22, %v7138_v62 }
 0x77f   : > { %v1915_v25 = vpop.permute.xlu0 %1914  ;;  %v2006_v27 = vpop.permute.xlu1 %2005 }
 0x780   : > { %6763 = vmatmul.mubr.msk.f32.vlgmr.msra.gmra.mxu0 %vm1091_vm6, %v1543_v24 }
 0x781   : > { %6766 = vmatpush3.msra.mxu0 %v891_v17  ;;  %6791 = vmatpush3.xpose.msk.msra.mxu1 %vm900_vm5, %v2008_v23 }
 0x782   : > { %6781 = vmatprep.subr.msk.mxu0 %vm900_vm5, %v1919_v15 }
 0x783   : > { %v2004_v26 = vpop.permute.xlu0 %2003 }
 0x784   : > { %6792 = vmatprep.mubr.msk.f32.mxu1 %vm900_vm5, %v2004_v26 }
 0x785   : > { %6793 = vmatmul.mubr.msk.f32.vlgmr.msra.gmra.mxu1 %vm900_vm5, %v2006_v27 }
 0x836   : > { %v6757_v28 = vpop.f32.mrf.mxu0 }
 0x838   : > { %v1622_v30 = vpop.f32.mrf.mxu0 }
 0x839   : > { %6767 = vmatprep.mubr.msk.f32.mxu0 %vm900_vm5, %v1622_v30 }
 0x83a   : > { %6768 = vmatmul.mubr.msk.f32.vlgmr.msra.gmra.mxu0 %vm900_vm5, %v6757_v28 }
 0x83b   : > { %6782 = vmatpush3.xpose.msk.msra.mxu0 %vm900_vm5, %v1919_v15 }
 0x83c   : > { %6783 = vmatprep.subr.msk.mxu0 %vm900_vm5, %v1917_v12 }
 0x83f   : > { %6784 = vmatpush3.xpose.msk.msra.mxu0 %vm900_vm5, %v1917_v12 }
 0x840   : > { %v6764_v32 = vpop.f32.mrf.mxu0 }
 0x842   : > { %v1709_v33 = vpop.f32.mrf.mxu0 }
 0x843   : > { %6770 = vmatprep.mubr.msk.f32.mxu0 %vm900_vm5, %v1709_v33 }
 0x844   : > { %6771 = vmatmul.mubr.msk.f32.gmra.mxu0 %vm900_vm5, %v6764_v32  ;;  %v892_v32 = vld [vmem:[%s7612_s17 + $0x10] sm:$0xff] }
 0x845   : > { %6785 = vmatprep.mubr.msk.f32.mxu0 %vm900_vm5, %v1913_v16  ;;  %v6794_v44 = vpop.f32.mrf.mxu1 }
 0x846   : > { %v2097_v59 = vmul.f32 0.35355338, %v6794_v44 }
 0x847   : > { %v2085_v21 = vpop.f32.mrf.mxu1 }
 0x848   : > { %6786 = vmatmul.mubr.msk.f32.vlgmr.msra.gmra.mxu0 %vm900_vm5, %v1915_v25  ;;  %v2096_v54 = vmul.f32 0.35355338, %v2085_v21  ;;  %v2101_v63 = vadd.f32 %v2097_v59, %v7558_v14 }
 0x84a   : > { %v2100_v61 = vadd.f32 %v2096_v54, %v7558_v14  ;;  %v2111_v0 = vsel %vm1091_vm6, %v2101_v63, -inf }
 0x84c   : > { %v2108_v62 = vsel %vm1091_vm6, %v2100_v61, -inf }
 0x8fa   : > { %v7682_v38 = vpop.f32.mrf.mxu0 }
 0x8fc   : > { %v7686_v43 = vpop.f32.mrf.mxu0 }
 0x904   : > { %v7688_v45 = vpop.f32.mrf.mxu0 }
 0x906   : > { %v7690_v47 = vpop.f32.mrf.mxu0 }
 0x908   : > { %v6787_v50 = vpop.f32.mrf.mxu0 }
 0x909   : > { %v2095_v52 = vmul.f32 0.35355338, %v6787_v50 }
 0x90a   : > { %v1994_v53 = vpop.f32.mrf.mxu0 }
 0x90b   : > { %v2094_v55 = vmul.f32 0.35355338, %v1994_v53  ;;  %v2099_v56 = vadd.f32 %v2095_v52, %v7551_v1 }
 0x90d   : > { %v2105_v57 = vsel %vm1091_vm6, %v2099_v56, -inf  ;;  %v2098_v58 = vadd.f32 %v2094_v55, %v7551_v1 }
 0x90e   : > { %2106 = vmax.xlane.f32.xlu1 %v2105_v57 }
 0x90f   : > { %v2102_v60 = vsel %vm1091_vm6, %v2098_v58, -inf }
 0x910   : > { %2103 = vmax.xlane.f32.xlu0 %v2102_v60 }
 0x914   : > { %2109 = vmax.xlane.f32.xlu0 %v2108_v62 }
 0x918   : > { %2112 = vmax.xlane.f32.xlu0 %v2111_v0 }
 0x997   : > { %v2107_v3 = vpop.xlane.xlu1 %2106 }
 0x998   : > { %v2115_v6 = vsub.f32 %v2099_v56, %v2107_v3 }
 0x999   : > { %v2104_v2 = vpop.xlane.xlu0 %2103 }
 0x99a   : > { %v2120_v10 = vmul.f32 1.442695, %v2115_v6  ;;  %v2114_v19 = vsub.f32 %v2098_v58, %v2104_v2 }
 0x99c   : > { %v2118_v20 = vmul.f32 1.442695, %v2114_v19 }
 0x99d   : > { %v2110_v4 = vpop.xlane.xlu0 %2109 }
 0x99e   : > { %v2116_v5 = vsub.f32 %v2100_v61, %v2110_v4 }
 0x9a0   : > { %v2122_v7 = vmul.f32 1.442695, %v2116_v5 }
 0x9a1   : > { %v2113_v8 = vpop.xlane.xlu0 %2112 }
 0x9a2   : > { %7147 = vpow2.f32 %v2122_v7  ;;  %v2117_v9 = vsub.f32 %v2101_v63, %v2113_v8 }
 0x9a4   : > { %v2124_v11 = vmul.f32 1.442695, %v2117_v9 }
 0x9a6   : > { %7149 = vpow2.f32 %v2124_v11 }
 0x9a7   : > { %7151 = vpow2.f32 %v2120_v10 }
 0x9a8   : > { %7153 = vpow2.f32 %v2118_v20 }
 0x9af   : > { %v7148_v12 = vpop.eup %7147 }
 0x9b0   : > { %v2132_v13 = vsel %vm1091_vm6, %v7148_v12, 0.0 }
 0x9b1   : > { %2133 = vadd.xlane.f32.xlu1 %v2132_v13 }
 0x9b3   : > { %v7150_v15 = vpop.eup %7149 }
 0x9b4   : > { %v2135_v16 = vsel %vm1091_vm6, %v7150_v15, 0.0  ;;  %v7702_v17 = vpop.eup %7151 }
 0x9b5   : > { %2136 = vadd.xlane.f32.xlu0 %v2135_v16  ;;  %v2129_v18 = vsel %vm1091_vm6, %v7702_v17, 0.0  ;;  %v7154_v22 = vpop.eup %7153 }
 0x9b6   : > { %v2126_v23 = vsel %vm1091_vm6, %v7154_v22, 0.0 }
 0x9b9   : > { %2130 = vadd.xlane.f32.xlu0 %v2129_v18 }
 0x9c2   : > { %2148 = vrot.lane.b32.xlu1 %v7511_v46, %s7323_s24 }
 0x9c6   : > { %2235 = vrot.lane.b32.xlu1 %v7521_v49, %s7323_s24 }
 0x9cf   : > { %2146 = vrot.lane.b32.xlu0 %v7513_v48, %s7323_s24 }
 0x9d3   : > { %2427 = vrot.lane.b32.xlu0 %v7511_v46, %s7324_s25 }
 0x9d7   : > { %2518 = vrot.lane.b32.xlu0 %v7521_v49, %s7324_s25 }
 0x9db   : > { %2423 = vrot.lane.b32.xlu0 %v7511_v46, %s8398_s11 }
 0x9df   : > { %2512 = vrot.lane.b32.xlu0 %v7525_v51, %s8398_s11 }
 0x9ea   : > { %2127 = vadd.xlane.f32.xlu1 %v2126_v23  ;;  %v1899_v23 = vadd.f32 %v7676_v34, %v7682_v38 }
 0x9fb   : > { %2233 = vrot.lane.b32.xlu1 %v7525_v51, %s7323_s24 }
 0x9ff   : > { %2425 = vrot.lane.b32.xlu1 %v7513_v48, %s7324_s25 }
 0xa03   : > { %2421 = vrot.lane.b32.xlu1 %v7513_v48, %s8398_s11 }
 0xa07   : > { %2516 = vrot.lane.b32.xlu1 %v7525_v51, %s7324_s25 }
 0xa0b   : > { %2514 = vrot.lane.b32.xlu1 %v7521_v49, %s8398_s11  ;;  %s7839_s11 = scalar_lea.vmem %s8392_s8, %s7457_s26 }
 0xa3a   : > { %v2134_v24 = vpop.xlane.xlu1 %2133 }
 0xa3b   : > { %7155 = vrcp.f32 %v2134_v24 }
 0xa3e   : > { %v2137_v25 = vpop.xlane.xlu0 %2136  ;;  %v2149_v26 = vpop.permute.xlu1 %2148 }
 0xa3f   : > { %6795 = vmatprep.subr.mxu0 %v2149_v26  ;;  %7157 = vrcp.f32 %v2137_v25 }
 0xa40   : > { %6796 = vmatpush3.msra.mxu0 %v2149_v26  ;;  %v1894_v26 = vadd.f32 %v7678_v31, %v7686_v43 }
 0xa42   : > { %v2131_v27 = vpop.xlane.xlu0 %2130  ;;  %v2236_v28 = vpop.permute.xlu1 %2235 }
 0xa43   : > { %6802 = vmatprep.subr.mxu1 %v2236_v28  ;;  %7159 = vrcp.f32 %v2131_v27 }
 0xa44   : > { %6803 = vmatpush3.msra.mxu1 %v2236_v28 }
 0xa46   : > { %v2147_v30 = vpop.permute.xlu0 %2146 }
 0xa47   : > { %6797 = vmatprep.subr.mxu0 %v2147_v30 }
 0xa48   : > { %v7156_v33 = vpop.eup %7155  ;;  %6798 = vmatpush3.msra.mxu0 %v2147_v30  ;;  %v1909_v30 = vadd.f32 %v7680_v37, %v7688_v45 }
 0xa49   : > { %v2143_v44 = vmul.f32 %v7156_v33, %v7148_v12  ;;  %6809 = vmatprep.subr.mxu0 %v892_v32 }
 0xa4a   : > { %v2428_v52 = vpop.permute.xlu0 %2427 }
 0xa4b   : > { %6806 = vmatprep.mubr.msk.f32.mxu1 %vm1091_vm6, %v2143_v44 }
 0xa4c   : > { %v7158_v50 = vpop.eup %7157 }
 0xa4d   : > { %v2145_v54 = vmul.f32 %v7158_v50, %v7150_v15 }
 0xa4e   : > { %v2519_v55 = vpop.permute.xlu0 %2518 }
 0xa50   : > { %v7160_v58 = vpop.eup %7159 }
 0xa51   : > { %v2141_v62 = vmul.f32 %v7160_v58, %v7702_v17 }
 0xa52   : > { %v2424_v60 = vpop.permute.xlu0 %2423 }
 0xa56   : > { %v2513_v13 = vpop.permute.xlu0 %2512 }
 0xa73   : > { %v2128_v21 = vpop.xlane.xlu1 %2127 }
 0xa74   : > { %7161 = vrcp.f32 %v2128_v21 }
 0xa77   : > { %v2234_v53 = vpop.permute.xlu1 %2233 }
 0xa78   : > { %6804 = vmatprep.subr.mxu1 %v2234_v53 }
 0xa79   : > { %6805 = vmatpush3.msra.mxu1 %v2234_v53 }
 0xa7a   : > { %6807 = vmatmul.mubr.msk.f32.vlgmr.msra.gmra.mxu1 %vm1091_vm6, %v2145_v54  ;;  %6817 = vmatprep.subr.msk.mxu1 %vm900_vm5, %v2428_v52 }
 0xa7b   : > { %6818 = vmatpush3.xpose.msk.msra.mxu1 %vm900_vm5, %v2428_v52  ;;  %v2426_v56 = vpop.permute.xlu1 %2425 }
 0xa7c   : > { %6819 = vmatprep.subr.msk.mxu1 %vm900_vm5, %v2426_v56 }
 0xa7f   : > { %6820 = vmatpush3.xpose.msk.msra.mxu1 %vm900_vm5, %v2426_v56  ;;  %v2422_v57 = vpop.permute.xlu1 %2421 }
 0xa80   : > { %6821 = vmatprep.mubr.msk.f32.mxu1 %vm900_vm5, %v2422_v57 }
 0xa81   : > { %v7162_v59 = vpop.eup %7161 }
 0xa82   : > { %6822 = vmatmul.mubr.msk.f32.vlgmr.msra.gmra.mxu1 %vm900_vm5, %v2424_v60  ;;  %v2139_v61 = vmul.f32 %v7162_v59, %v7154_v22 }
 0xa83   : > { %v2517_v12 = vpop.permute.xlu1 %2516 }
 0xa84   : > { %6799 = vmatprep.mubr.msk.f32.mxu0 %vm1091_vm6, %v2139_v61 }
 0xa85   : > { %6800 = vmatmul.mubr.msk.f32.vlgmr.msra.gmra.mxu0 %vm1091_vm6, %v2141_v62 }
 0xa86   : > { %6810 = vmatpush3.msra.mxu0 %v892_v32 }
 0xa87   : > { %6824 = vmatprep.subr.msk.mxu0 %vm900_vm5, %v2519_v55  ;;  %v2515_v15 = vpop.permute.xlu1 %2514 }
 0xb3a   : > { %v6808_v63 = vpop.f32.mrf.mxu1 }
 0xb3c   : > { %v2311_v0 = vpop.f32.mrf.mxu1 }
 0xb42   : > { %v6823_v2 = vpop.f32.mrf.mxu1 }
 0xb43   : > { %v2604_v3 = vmul.f32 0.35355338, %v6823_v2 }
 0xb44   : > { %v2503_v4 = vpop.f32.mrf.mxu1 }
 0xb45   : > { %v2603_v5 = vmul.f32 0.35355338, %v2503_v4  ;;  %v6801_v6 = vpop.f32.mrf.mxu0  ;;  %v2608_v7 = vadd.f32 %v2604_v3, %v7551_v1 }
 0xb47   : > { %v2224_v8 = vpop.f32.mrf.mxu0  ;;  %v2614_v9 = vsel %vm1091_vm6, %v2608_v7, -inf  ;;  %v2607_v10 = vadd.f32 %v2603_v5, %v7551_v1 }
 0xb48   : > { %6811 = vmatprep.mubr.msk.f32.mxu0 %vm900_vm5, %v2224_v8  ;;  %2615 = vmax.xlane.f32.xlu1 %v2614_v9 }
 0xb49   : > { %6812 = vmatmul.mubr.msk.f32.vlgmr.msra.gmra.mxu0 %vm900_vm5, %v6801_v6  ;;  %v2611_v11 = vsel %vm1091_vm6, %v2607_v10, -inf }
 0xb4a   : > { %6825 = vmatpush3.xpose.msk.msra.mxu0 %vm900_vm5, %v2519_v55  ;;  %6814 = vmatprep.mubr.msk.f32.mxu0 %vm900_vm5, %v2311_v0 }
 0xb4b   : > { %2612 = vmax.xlane.f32.xlu0 %v2611_v11  ;;  %6826 = vmatprep.subr.msk.mxu0 %vm900_vm5, %v2517_v12 }
 0xb4d   : > { %6815 = vmatmul.mubr.msk.f32.gmra.mxu0 %vm900_vm5, %v6808_v63 }
 0xb4e   : > { %6827 = vmatpush3.xpose.msk.msra.mxu0 %vm900_vm5, %v2517_v12  ;;  %6828 = vmatprep.mubr.msk.f32.mxu0 %vm900_vm5, %v2513_v13 }
 0xb51   : > { %6829 = vmatmul.mubr.msk.f32.vlgmr.msra.gmra.mxu0 %vm900_vm5, %v2515_v15 }
 0xbd1   : > { %v2616_v22 = vpop.xlane.xlu1 %2615 }
 0xbd2   : > { %v2624_v24 = vsub.f32 %v2608_v7, %v2616_v22 }
 0xbd4   : > { %v2613_v16 = vpop.xlane.xlu0 %2612  ;;  %v2629_v32 = vmul.f32 1.442695, %v2624_v24  ;;  %v6285_v24 = vld [vmem:[%s7473_s15 + $0x2] ss:$0 sm:$0xff] }
 0xbd5   : > { %v2623_v17 = vsub.f32 %v2607_v10, %v2613_v16  ;;  %v893_v16 = vld [vmem:[%s7612_s17 + $0x18] sm:$0xff] }
 0xbd7   : > { %v2627_v18 = vmul.f32 1.442695, %v2623_v17 }
 0xbd9   : > { %7163 = vpow2.f32 %v2627_v18 }
 0xbda   : > { %7165 = vpow2.f32 %v2629_v32 }
 0xbe6   : > { %v7164_v19 = vpop.eup %7163 }
 0xbe7   : > { %v2635_v20 = vsel %vm1091_vm6, %v7164_v19, 0.0 }
 0xbe8   : > { %2636 = vadd.xlane.f32.xlu1 %v2635_v20 }
 0xbf9   : > { %2657 = vrot.lane.b32.xlu1 %v7511_v46, %s8396_s12 }
 0xbfd   : > { %2744 = vrot.lane.b32.xlu1 %v7521_v49, %s8396_s12  ;;  %v1904_v49 = vadd.f32 %v7684_v39, %v7690_v47  ;;  %v7166_v39 = vpop.eup %7165 }
 0xbfe   : > { %v2638_v47 = vsel %vm1091_vm6, %v7166_v39, 0.0 }
 0xc09   : > { %v6813_v25 = vpop.f32.mrf.mxu0 }
 0xc0a   : > { %v7766_v27 = vadd.f32 %v6813_v25, %v1899_v23 }
 0xc0b   : > { %v2398_v28 = vpop.f32.mrf.mxu0 }
 0xc0c   : > { %v7770_v46 = vadd.f32 %v2398_v28, %v1894_v26 }
 0xc0d   : > { %v6816_v33 = vpop.f32.mrf.mxu0 }
 0xc0e   : > { %v7774_v44 = vadd.f32 %v6816_v33, %v1909_v30 }
 0xc0f   : > { %v2408_v34 = vpop.f32.mrf.mxu0 }
 0xc10   : > { %v7776_v38 = vadd.f32 %v2408_v34, %v1904_v49 }
 0xc11   : > { %v6830_v31 = vpop.f32.mrf.mxu0 }
 0xc12   : > { %v2606_v21 = vmul.f32 0.35355338, %v6830_v31 }
 0xc13   : > { %v2594_v43 = vpop.f32.mrf.mxu0 }
 0xc14   : > { %v2605_v50 = vmul.f32 0.35355338, %v2594_v43  ;;  %v2610_v45 = vadd.f32 %v2606_v21, %v7558_v14 }
 0xc16   : > { %v2609_v52 = vadd.f32 %v2605_v50, %v7558_v14  ;;  %v2620_v53 = vsel %vm1091_vm6, %v2610_v45, -inf }
 0xc18   : > { %v2617_v37 = vsel %vm1091_vm6, %v2609_v52, -inf }
 0xc19   : > { %2618 = vmax.xlane.f32.xlu0 %v2617_v37 }
 0xc1d   : > { %2621 = vmax.xlane.f32.xlu0 %v2620_v53 }
 0xc21   : > { %2639 = vadd.xlane.f32.xlu0 %v2638_v47 }
 0xc71   : > { %v2637_v54 = vpop.xlane.xlu1 %2636 }
 0xc72   : > { %7167 = vrcp.f32 %v2637_v54  ;;  %v3021_v54 = vld [vmem:[%s7839_s11 + $0x18] sm:$0xff] }
 0xc75   : > { %v2658_v55 = vpop.permute.xlu1 %2657 }
 0xc76   : > { %6831 = vmatprep.subr.mxu1 %v2658_v55 }
 0xc77   : > { %6832 = vmatpush3.msra.mxu1 %v2658_v55  ;;  %v3020_v55 = vld [vmem:[%s7839_s11 + $0x10] sm:$0xff] }
 0xc79   : > { %v2745_v56 = vpop.permute.xlu1 %2744 }
 0xc7a   : > { %6838 = vmatprep.subr.mxu0 %v2745_v56 }
 0xc7b   : > { %6839 = vmatpush3.msra.mxu0 %v2745_v56  ;;  %v3019_v56 = vld [vmem:[%s7839_s11 + $0x8] sm:$0xff] }
 0xc7f   : > { %v7168_v57 = vpop.eup %7167 }
 0xc80   : > { %v2648_v58 = vmul.f32 %v7168_v57, %v7164_v19  ;;  %v3018_v57 = vld [vmem:[%s7839_s11] sm:$0xff] }
 0xc82   : > { %6835 = vmatprep.mubr.msk.f32.mxu1 %vm1091_vm6, %v2648_v58 }
 0xca2   : > { %v2619_v59 = vpop.xlane.xlu0 %2618 }
 0xca3   : > { %v2625_v60 = vsub.f32 %v2609_v52, %v2619_v59 }
 0xca5   : > { %v2631_v61 = vmul.f32 1.442695, %v2625_v60 }
 0xca6   : > { %v2622_v62 = vpop.xlane.xlu0 %2621 }
 0xca7   : > { %7169 = vpow2.f32 %v2631_v61  ;;  %v2626_v63 = vsub.f32 %v2610_v45, %v2622_v62 }
 0xca9   : > { %v2633_v0 = vmul.f32 1.442695, %v2626_v63 }
 0xcaa   : > { %v2640_v6 = vpop.xlane.xlu0 %2639 }
 0xcab   : > { %7171 = vpow2.f32 %v2633_v0 }
 0xcac   : > { %7173 = vrcp.f32 %v2640_v6 }
 0xcb4   : > { %v7170_v2 = vpop.eup %7169 }
 0xcb5   : > { %v2641_v3 = vsel %vm1091_vm6, %v7170_v2, 0.0 }
 0xcb6   : > { %2642 = vadd.xlane.f32.xlu1 %v2641_v3 }
 0xcb8   : > { %v7172_v4 = vpop.eup %7171 }
 0xcb9   : > { %v2644_v5 = vsel %vm1091_vm6, %v7172_v4, 0.0  ;;  %v7174_v10 = vpop.eup %7173 }
 0xcba   : > { %2645 = vadd.xlane.f32.xlu0 %v2644_v5  ;;  %v2650_v12 = vmul.f32 %v7174_v10, %v7166_v39 }
 0xcc7   : > { %2742 = vrot.lane.b32.xlu1 %v7525_v51, %s8396_s12 }
 0xcd0   : > { %2655 = vrot.lane.b32.xlu0 %v7513_v48, %s8396_s12  ;;  %s7872_s12 = scalar_lea.vmem %s8393_s9, %s6405_s16  ;;  %s8400_s16 = smov 104  }
 0xd3f   : > { %v2643_v7 = vpop.xlane.xlu1 %2642 }
 0xd40   : > { %7175 = vrcp.f32 %v2643_v7 }
 0xd43   : > { %v2646_v8 = vpop.xlane.xlu0 %2645  ;;  %v2743_v9 = vpop.permute.xlu1 %2742 }
 0xd44   : > { %7177 = vrcp.f32 %v2646_v8  ;;  %6840 = vmatprep.subr.mxu0 %v2743_v9 }
 0xd45   : > { %6841 = vmatpush3.msra.mxu0 %v2743_v9 }
 0xd46   : > { %6853 = vmatprep.subr.mxu0 %v3021_v54 }
 0xd47   : > { %v2656_v11 = vpop.permute.xlu0 %2655 }
 0xd48   : > { %6833 = vmatprep.subr.mxu1 %v2656_v11 }
 0xd49   : > { %6834 = vmatpush3.msra.mxu1 %v2656_v11 }
 0xd4a   : > { %6836 = vmatmul.mubr.msk.f32.vlgmr.msra.gmra.mxu1 %vm1091_vm6, %v2650_v12  ;;  %6845 = vmatprep.subr.mxu1 %v893_v16 }
 0xd4b   : > { %6846 = vmatpush3.msra.mxu1 %v893_v16 }
 0xd4d   : > { %v7176_v51 = vpop.eup %7175 }
 0xd4e   : > { %v2652_v13 = vmul.f32 %v7176_v51, %v7170_v2 }
 0xd50   : > { %6842 = vmatprep.mubr.msk.f32.mxu0 %vm1091_vm6, %v2652_v13 }
 0xd51   : > { %v7178_v48 = vpop.eup %7177 }
 0xd52   : > { %v2654_v15 = vmul.f32 %v7178_v48, %v7172_v4 }
 0xd54   : > { %6843 = vmatmul.mubr.msk.f32.vlgmr.msra.gmra.mxu0 %vm1091_vm6, %v2654_v15 }
 0xd55   : > { %6854 = vmatpush3.msra.mxu0 %v3021_v54  ;;  %v3232_v54 = vld [vmem:[%s7872_s12 + $0x8] sm:$0xff] }
 0xd56   : > { %6855 = vmatprep.subr.mxu0 %v3020_v55 }
 0xd57   : > { %6856 = vmatpush3.msra.mxu0 %v3020_v55  ;;  %v3231_v55 = vld [vmem:[%s7872_s12] sm:$0xff] }
 0xd58   : > { %6857 = vmatprep.subr.mxu0 %v3019_v56 }
 0xd59   : > { %6858 = vmatpush3.msra.mxu0 %v3019_v56  ;;  %v3024_v56 = vsub.s32 1, %v7499_v41 }
 0xd5a   : > { %6859 = vmatprep.subr.mxu0 %v3018_v57 }
 0xd5b   : > { %6860 = vmatpush3.msra.mxu0 %v3018_v57  ;;  %v7303_v57 = vld [vmem:[%s7504_s20] sm:$0x3] }
 0xe0a   : > { %v6837_v17 = vpop.f32.mrf.mxu1 }
 0xe0c   : > { %v2733_v18 = vpop.f32.mrf.mxu1 }
 0xe0d   : > { %6847 = vmatprep.mubr.msk.f32.mxu1 %vm900_vm5, %v2733_v18 }
 0xe0e   : > { %6848 = vmatmul.mubr.msk.f32.vlgmr.msra.gmra.mxu1 %vm900_vm5, %v6837_v17 }
 0xe14   : > { %v6844_v19 = vpop.f32.mrf.mxu0 }
 0xe16   : > { %v2820_v20 = vpop.f32.mrf.mxu0 }
 0xe17   : > { %6850 = vmatprep.mubr.msk.f32.mxu1 %vm900_vm5, %v2820_v20 }
 0xe18   : > { %6851 = vmatmul.mubr.msk.f32.gmra.mxu1 %vm900_vm5, %v6844_v19 }
 0xece   : > { %v6849_v22 = vpop.f32.mrf.mxu1 }
 0xecf   : > { %v2927_v23 = vadd.f32 %v6849_v22, %v7766_v27 }
 0xed0   : > { %v2907_v25 = vpop.f32.mrf.mxu1 }
 0xed1   : > { %v2931_v26 = vadd.f32 %v2927_v23, %v7484_v35  ;;  %v2926_v28 = vadd.f32 %v2907_v25, %v7770_v46  ;;  %v6286_v25 = vld [vmem:[%s7473_s15 + $0x3] ss:$0 sm:$0xff] }
 0xed3   : > { %v7802_v30 = vadd.f32 %v6285_v24, %v2931_v26  ;;  %v2930_v32 = vadd.f32 %v2926_v28, %v7480_v29  ;;  %v6287_v28 = vld [vmem:[%s7473_s15 + $0x4] ss:$0 sm:$0xff] }
 0xed5   : > { %v7805_v33 = vadd.f32 %v6285_v24, %v2930_v32  ;;  %v2945_v49 = vsel %vm674_vm4, %v7802_v30, 0.0  ;;  %v2959_v50 = vmul.f32 %v7802_v30, %v7802_v30 }
 0xed6   : > { %2946 = vadd.xlane.f32.xlu1 %v2945_v49 }
 0xed7   : > { %v2942_v34 = vsel %vm674_vm4, %v7805_v33, 0.0  ;;  %v2958_v27 = vmul.f32 %v7805_v33, %v7805_v33 }
 0xed8   : > { %2943 = vadd.xlane.f32.xlu0 %v2942_v34  ;;  %v6852_v35 = vpop.f32.mrf.mxu1 }
 0xed9   : > { %v2929_v46 = vadd.f32 %v6852_v35, %v7774_v44  ;;  %v2962_v21 = vsel %vm674_vm4, %v2958_v27, 0.0  ;;  %v2965_v44 = vsel %vm674_vm4, %v2959_v50, 0.0 }
 0xeda   : > { %v2917_v31 = vpop.f32.mrf.mxu1 }
 0xedb   : > { %v2933_v43 = vadd.f32 %v2929_v46, %v7493_v40  ;;  %v2928_v29 = vadd.f32 %v2917_v31, %v7776_v38 }
 0xedc   : > { %2963 = vadd.xlane.f32.xlu0 %v2962_v21 }
 0xedd   : > { %v2932_v52 = vadd.f32 %v2928_v29, %v7486_v36  ;;  %v7820_v37 = vadd.f32 %v6285_v24, %v2933_v43 }
 0xedf   : > { %v7822_v45 = vadd.f32 %v6285_v24, %v2932_v52  ;;  %v2951_v53 = vsel %vm674_vm4, %v7820_v37, 0.0  ;;  %v2961_v36 = vmul.f32 %v7820_v37, %v7820_v37 }
 0xee0   : > { %2966 = vadd.xlane.f32.xlu0 %v2965_v44 }
 0xee1   : > { %v2948_v40 = vsel %vm674_vm4, %v7822_v45, 0.0  ;;  %v2960_v38 = vmul.f32 %v7822_v45, %v7822_v45  ;;  %v2971_v47 = vsel %vm674_vm4, %v2961_v36, 0.0  ;;  %v3235_v36 = vld [vmem:[%s7872_s12 + $0x20] sm:$0xff] }
 0xee2   : > { %2949 = vadd.xlane.f32.xlu1 %v2948_v40 }
 0xee3   : > { %v2968_v39 = vsel %vm674_vm4, %v2960_v38, 0.0 }
 0xee4   : > { %2952 = vadd.xlane.f32.xlu0 %v2951_v53  ;;  %v3236_v53 = vld [vmem:[%s7872_s12 + $0x28] sm:$0xff] }
 0xee6   : > { %2969 = vadd.xlane.f32.xlu1 %v2968_v39  ;;  %v3234_v39 = vld [vmem:[%s7872_s12 + $0x18] sm:$0xff] }
 0xee8   : > { %2972 = vadd.xlane.f32.xlu0 %v2971_v47  ;;  %v3233_v47 = vld [vmem:[%s7872_s12 + $0x10] sm:$0xff] }
 0xf5f   : > { %v2947_v60 = vpop.xlane.xlu1 %2946 }
 0xf60   : > { %v2955_v62 = vmul.f32 0.03125, %v2947_v60 }
 0xf61   : > { %v2944_v58 = vpop.xlane.xlu0 %2943 }
 0xf62   : > { %v2954_v59 = vmul.f32 0.03125, %v2944_v58  ;;  %v2979_v4 = vmul.f32 %v2955_v62, %v2955_v62  ;;  %v2987_v32 = vsub.f32 %v7802_v30, %v2955_v62  ;;  %v3025_v58 = vrot.slane %v7303_v57, %v3024_v56 }
 0xf64   : > { %v2978_v63 = vmul.f32 %v2954_v59, %v2954_v59  ;;  %v2986_v23 = vsub.f32 %v7805_v33, %v2954_v59 }
 0xf65   : > { %v2964_v61 = vpop.xlane.xlu0 %2963 }
 0xf66   : > { %v2974_v0 = vmul.f32 0.03125, %v2964_v61 }
 0xf68   : > { %v2982_v2 = vsub.f32 %v2974_v0, %v2978_v63 }
 0xf69   : > { %v2967_v3 = vpop.xlane.xlu0 %2966 }
 0xf6a   : > { %v2990_v5 = vadd.f32 1e-12, %v2982_v2  ;;  %v2975_v6 = vmul.f32 0.03125, %v2967_v3 }
 0xf6b   : > { %v2950_v7 = vpop.xlane.xlu1 %2949 }
 0xf6c   : > { %7179 = vrsqrt.f32 %v2990_v5  ;;  %v2983_v8 = vsub.f32 %v2975_v6, %v2979_v4  ;;  %v2956_v9 = vmul.f32 0.03125, %v2950_v7 }
 0xf6d   : > { %v2953_v10 = vpop.xlane.xlu0 %2952 }
 0xf6e   : > { %v2991_v11 = vadd.f32 1e-12, %v2983_v8  ;;  %v2957_v12 = vmul.f32 0.03125, %v2953_v10  ;;  %v2980_v13 = vmul.f32 %v2956_v9, %v2956_v9  ;;  %v2988_v31 = vsub.f32 %v7822_v45, %v2956_v9  ;;  %v3237_v45 = vld [vmem:[%s7872_s12 + $0x30] sm:$0xff] }
 0xf6f   : > { %v2970_v51 = vpop.xlane.xlu1 %2969 }
 0xf70   : > { %7181 = vrsqrt.f32 %v2991_v11  ;;  %v2976_v48 = vmul.f32 0.03125, %v2970_v51  ;;  %v2981_v16 = vmul.f32 %v2957_v12, %v2957_v12  ;;  %v2989_v29 = vsub.f32 %v7820_v37, %v2957_v12  ;;  %v3238_v37 = vld [vmem:[%s7872_s12 + $0x38] sm:$0xff] }
 0xf71   : > { %v2973_v15 = vpop.xlane.xlu0 %2972  ;;  %6867 = vmatprep.subr.mxu1 %v3238_v37 }
 0xf72   : > { %v2984_v17 = vsub.f32 %v2976_v48, %v2980_v13  ;;  %v2977_v18 = vmul.f32 0.03125, %v2973_v15  ;;  %6868 = vmatpush3.msra.mxu1 %v3238_v37 }
 0xf73   : > { %6869 = vmatprep.subr.mxu1 %v3237_v45 }
 0xf74   : > { %v2992_v19 = vadd.f32 1e-12, %v2984_v17  ;;  %v2985_v20 = vsub.f32 %v2977_v18, %v2981_v16  ;;  %6870 = vmatpush3.msra.mxu1 %v3237_v45 }
 0xf75   : > { %6871 = vmatprep.subr.mxu1 %v3236_v53 }
 0xf76   : > { %7183 = vrsqrt.f32 %v2992_v19  ;;  %v2993_v22 = vadd.f32 1e-12, %v2985_v20  ;;  %6872 = vmatpush3.msra.mxu1 %v3236_v53 }
 0xf77   : > { %6873 = vmatprep.subr.mxu1 %v3235_v36 }
 0xf78   : > { %7185 = vrsqrt.f32 %v2993_v22  ;;  %6874 = vmatpush3.msra.mxu1 %v3235_v36 }
 0xf79   : > { %v7180_v24 = vpop.eup %7179  ;;  %6875 = vmatprep.subr.mxu1 %v3234_v39 }
 0xf7a   : > { %v2998_v26 = vmul.f32 %v7180_v24, %v2986_v23  ;;  %6876 = vmatpush3.msra.mxu1 %v3234_v39 }
 0xf7b   : > { %6877 = vmatprep.subr.mxu1 %v3233_v47 }
 0xf7c   : > { %v3006_v49 = vmul.f32 %v6286_v25, %v2998_v26  ;;  %6878 = vmatpush3.msra.mxu1 %v3233_v47 }
 0xf7d   : > { %v7182_v34 = vpop.eup %7181  ;;  %6879 = vmatprep.subr.mxu1 %v3232_v54 }
 0xf7e   : > { %v7849_v27 = vadd.f32 %v6287_v28, %v3006_v49  ;;  %v2999_v35 = vmul.f32 %v7182_v34, %v2987_v32  ;;  %6880 = vmatpush3.msra.mxu1 %v3232_v54 }
 0xf7f   : > { %6881 = vmatprep.subr.mxu1 %v3231_v55 }
 0xf80   : > { %6861 = vmatprep.mubr.msk.f32.mxu0 %vm674_vm4, %v7849_v27  ;;  %v3007_v46 = vmul.f32 %v6286_v25, %v2999_v35  ;;  %6882 = vmatpush3.msra.mxu1 %v3231_v55 }
 0xf82   : > { %v7854_v33 = vadd.f32 %v6287_v28, %v3007_v46 }
 0xf83   : > { %v7184_v43 = vpop.eup %7183 }
 0xf84   : > { %6862 = vmatmul.mubr.msk.f32.vlgmr.msra.gmra.mxu0 %vm674_vm4, %v7854_v33  ;;  %v3000_v30 = vmul.f32 %v7184_v43, %v2988_v31 }
 0xf85   : > { %v7186_v21 = vpop.eup %7185 }
 0xf86   : > { %v3008_v50 = vmul.f32 %v6286_v25, %v3000_v30  ;;  %v3001_v52 = vmul.f32 %v7186_v21, %v2989_v29 }
 0xf88   : > { %v7859_v44 = vadd.f32 %v6287_v28, %v3008_v50  ;;  %v3009_v40 = vmul.f32 %v6286_v25, %v3001_v52 }
 0xf8a   : > { %6864 = vmatprep.mubr.msk.f32.mxu0 %vm674_vm4, %v7859_v44  ;;  %v7863_v38 = vadd.f32 %v6287_v28, %v3009_v40 }
 0xf8c   : > { %6865 = vmatmul.mubr.msk.f32.gmra.mxu0 %vm674_vm4, %v7863_v38 }
0x1044   : > { %v6863_v59 = vpop.f32.mrf.mxu0 }
0x1045   : > { %v7886_v60 = vadd.f32 %v6863_v59, %v3025_v58 }
0x1046   : > { %v3104_v61 = vpop.f32.mrf.mxu0 }
0x1047   : > { %v7889_v62 = vmul.f32 0.70710677, %v7886_v60  ;;  %v7891_v63 = vadd.f32 %v3104_v61, %v3025_v58 }
0x1049   : > { %v3132_v0 = vand.u32 2147483647, %v7889_v62  ;;  %v7895_v2 = vmul.f32 0.70710677, %v7891_v63  ;;  %vm3212_vm7 = vcmp.ge.f32.partialorder %v7889_v62, 0.0  ;;  %v3124_v62 = vmul.f32 0.5, %v7886_v60 }
0x104b   : > { %v3136_v3 = vmul.f32 0.3275911, %v3132_v0  ;;  %v3131_v4 = vand.u32 2147483647, %v7895_v2  ;;  %v3188_v15 = vsub.f32 0.0, %v3132_v0  ;;  %vm3211_vm8 = vcmp.ge.f32.partialorder %v7895_v2, 0.0 }
0x104c   : > { %v6866_v5 = vpop.f32.mrf.mxu0 }
0x104d   : > { %v3140_v6 = vadd.f32 1.0, %v3136_v3  ;;  %v3135_v7 = vmul.f32 0.3275911, %v3131_v4  ;;  %v7898_v8 = vadd.f32 %v6866_v5, %v3025_v58  ;;  %v3187_v19 = vsub.f32 0.0, %v3131_v4 }
0x104e   : > { %v3114_v9 = vpop.f32.mrf.mxu0  ;;  %v3192_v20 = vmul.f32 %v3188_v15, %v3132_v0 }
0x104f   : > { %7187 = vrcp.f32 %v3140_v6  ;;  %v3139_v10 = vadd.f32 1.0, %v3135_v7  ;;  %v7901_v11 = vmul.f32 0.70710677, %v7898_v8  ;;  %v7903_v12 = vadd.f32 %v3114_v9, %v3025_v58 }
0x1050   : > { %v3191_v24 = vmul.f32 %v3187_v19, %v3131_v4  ;;  %v3197_v26 = vmul.f32 1.442695, %v3192_v20 }
0x1051   : > { %7189 = vrcp.f32 %v3139_v10  ;;  %v3134_v51 = vand.u32 2147483647, %v7901_v11  ;;  %v7907_v13 = vmul.f32 0.70710677, %v7903_v12  ;;  %vm3214_vm10 = vcmp.ge.f32.partialorder %v7901_v11, 0.0 }
0x1052   : > { %v3195_v35 = vmul.f32 1.442695, %v3191_v24  ;;  %v6292_v11 = vld [vmem:[%s7473_s15 + $0x5] ss:$0 sm:$0xff] }
0x1053   : > { %v3138_v48 = vmul.f32 0.3275911, %v3134_v51  ;;  %v3133_v16 = vand.u32 2147483647, %v7907_v13  ;;  %v3190_v28 = vsub.f32 0.0, %v3134_v51  ;;  %vm3213_vm11 = vcmp.ge.f32.partialorder %v7907_v13, 0.0 }
0x1055   : > { %v3142_v17 = vadd.f32 1.0, %v3138_v48  ;;  %v3137_v18 = vmul.f32 0.3275911, %v3133_v16  ;;  %v3189_v31 = vsub.f32 0.0, %v3133_v16  ;;  %v3194_v29 = vmul.f32 %v3190_v28, %v3134_v51 }
0x1057   : > { %7191 = vrcp.f32 %v3142_v17  ;;  %v3141_v22 = vadd.f32 1.0, %v3137_v18  ;;  %v3193_v40 = vmul.f32 %v3189_v31, %v3133_v16  ;;  %v3201_v53 = vmul.f32 1.442695, %v3194_v29 }
0x1059   : > { %7193 = vrcp.f32 %v3141_v22  ;;  %v3199_v58 = vmul.f32 1.442695, %v3193_v40 }
0x105a   : > { %7195 = vpow2.f32 %v3197_v26 }
0x105b   : > { %7197 = vpow2.f32 %v3195_v35 }
0x105c   : > { %v7188_v23 = vpop.eup %7187  ;;  %7199 = vpow2.f32 %v3201_v53 }
0x105d   : > { %v3152_v25 = vmul.f32 1.0614054, %v7188_v23  ;;  %7201 = vpow2.f32 %v3199_v58  ;;  %v3126_v58 = vmul.f32 0.5, %v7898_v8 }
0x105e   : > { %v7190_v32 = vpop.eup %7189 }
0x105f   : > { %v3156_v49 = vadd.f32 -1.4531521, %v3152_v25  ;;  %v3151_v34 = vmul.f32 1.0614054, %v7190_v32 }
0x1061   : > { %v3160_v46 = vmul.f32 %v7188_v23, %v3156_v49  ;;  %v3155_v43 = vadd.f32 -1.4531521, %v3151_v34 }
0x1063   : > { %v3164_v30 = vadd.f32 1.4214138, %v3160_v46  ;;  %v3159_v21 = vmul.f32 %v7190_v32, %v3155_v43 }
0x1064   : > { %v7192_v50 = vpop.eup %7191 }
0x1065   : > { %v3168_v52 = vmul.f32 %v7188_v23, %v3164_v30  ;;  %v3163_v37 = vadd.f32 1.4214138, %v3159_v21  ;;  %v3154_v45 = vmul.f32 1.0614054, %v7192_v50  ;;  %v3123_v21 = vmul.f32 0.5, %v7891_v63 }
0x1066   : > { %v7194_v39 = vpop.eup %7193 }
0x1067   : > { %v3172_v36 = vadd.f32 -0.28449672, %v3168_v52  ;;  %v3167_v47 = vmul.f32 %v7190_v32, %v3163_v37  ;;  %v3158_v54 = vadd.f32 -1.4531521, %v3154_v45  ;;  %v3153_v57 = vmul.f32 1.0614054, %v7194_v39  ;;  %v7196_v9 = vpop.eup %7195 }
0x1068   : > { %v7198_v18 = vpop.eup %7197 }
0x1069   : > { %v3176_v55 = vmul.f32 %v7188_v23, %v3172_v36  ;;  %v3171_v59 = vadd.f32 -0.28449672, %v3167_v47  ;;  %v3162_v61 = vmul.f32 %v7192_v50, %v3158_v54  ;;  %v3157_v3 = vadd.f32 -1.4531521, %v3153_v57  ;;  %v7200_v31 = vpop.eup %7199 }
0x106a   : > { %v7202_v37 = vpop.eup %7201 }
0x106b   : > { %v3180_v0 = vadd.f32 0.2548296, %v3176_v55  ;;  %v3175_v4 = vmul.f32 %v7190_v32, %v3171_v59  ;;  %v3166_v5 = vadd.f32 1.4214138, %v3162_v61  ;;  %v3161_v7 = vmul.f32 %v7194_v39, %v3157_v3 }
0x106c   : > { %v3125_v55 = vmul.f32 0.5, %v7903_v12 }
0x106d   : > { %v3184_v6 = vmul.f32 %v7188_v23, %v3180_v0  ;;  %v3179_v10 = vadd.f32 0.2548296, %v3175_v4  ;;  %v3170_v51 = vmul.f32 %v7192_v50, %v3166_v5  ;;  %v3165_v15 = vadd.f32 1.4214138, %v3161_v7 }
0x106f   : > { %v3204_v48 = vmul.f32 %v7196_v9, %v3184_v6  ;;  %v3183_v16 = vmul.f32 %v7190_v32, %v3179_v10  ;;  %v3174_v17 = vadd.f32 -0.28449672, %v3170_v51  ;;  %v3169_v20 = vmul.f32 %v7194_v39, %v3165_v15 }
0x1071   : > { %v3208_v19 = vsub.f32 1.0, %v3204_v48  ;;  %v3203_v22 = vmul.f32 %v7198_v18, %v3183_v16  ;;  %v3178_v24 = vmul.f32 %v7192_v50, %v3174_v17  ;;  %v3173_v26 = vadd.f32 -0.28449672, %v3169_v20 }
0x1073   : > { %v3216_v25 = vsub.f32 0.0, %v3208_v19  ;;  %v3207_v28 = vsub.f32 1.0, %v3203_v22  ;;  %v3182_v23 = vadd.f32 0.2548296, %v3178_v24  ;;  %v3177_v34 = vmul.f32 %v7194_v39, %v3173_v26  ;;  %v6303_v24 = vld [vmem:[%s7463_s29 + $0x38] sm:$0xff]  ;;  %v6301_v26 = vld [vmem:[%s7463_s29 + $0x28] sm:$0xff] }
0x1074   : > { %6889 = vmatprep.subr.mxu0 %v6303_v24 }
0x1075   : > { %v3220_v49 = vsel %vm3212_vm7, %v3208_v19, %v3216_v25  ;;  %v3215_v35 = vsub.f32 0.0, %v3207_v28  ;;  %v3186_v46 = vmul.f32 %v7192_v50, %v3182_v23  ;;  %v3181_v32 = vadd.f32 0.2548296, %v3177_v34  ;;  %v6302_v25 = vld [vmem:[%s7463_s29 + $0x30] sm:$0xff]  ;;  %6890 = vmatpush3.msra.mxu0 %v6303_v24 }
0x1076   : > { %v3224_v43 = vadd.f32 1.0, %v3220_v49  ;;  %6891 = vmatprep.subr.mxu0 %v6302_v25 }
0x1077   : > { %v3219_v29 = vsel %vm3211_vm8, %v3207_v28, %v3215_v35  ;;  %v3206_v30 = vmul.f32 %v7200_v31, %v3186_v46  ;;  %v3185_v40 = vmul.f32 %v7194_v39, %v3181_v32  ;;  %6892 = vmatpush3.msra.mxu0 %v6302_v25  ;;  %v6300_v28 = vld [vmem:[%s7463_s29 + $0x20] sm:$0xff]  ;;  %s8401_s29 = smov 40  }
0x1078   : > { %v3223_v52 = vadd.f32 1.0, %v3219_v29  ;;  %v3228_v47 = vmul.f32 %v3224_v43, %v3124_v62  ;;  %6893 = vmatprep.subr.mxu0 %v6301_v26 }
0x1079   : > { %v3210_v45 = vsub.f32 1.0, %v3206_v30  ;;  %v3205_v36 = vmul.f32 %v7202_v37, %v3185_v40  ;;  %6894 = vmatpush3.msra.mxu0 %v6301_v26 }
0x107a   : > { %v3227_v53 = vmul.f32 %v3223_v52, %v3123_v21  ;;  %6895 = vmatprep.subr.mxu0 %v6300_v28 }
0x107b   : > { %v3218_v50 = vsub.f32 0.0, %v3210_v45  ;;  %v3209_v2 = vsub.f32 1.0, %v3205_v36  ;;  %6896 = vmatpush3.msra.mxu0 %v6300_v28 }
0x107c   : > { %6883 = vmatprep.mubr.msk.f32.mxu1 %vm3243_vm9, %v3227_v53 }
0x107d   : > { %v3222_v54 = vsel %vm3214_vm10, %v3210_v45, %v3218_v50  ;;  %6884 = vmatmul.mubr.msk.f32.vlgmr.msra.gmra.mxu1 %vm3243_vm9, %v3228_v47  ;;  %v3217_v63 = vsub.f32 0.0, %v3209_v2 }
0x107e   : > { %v3226_v39 = vadd.f32 1.0, %v3222_v54 }
0x107f   : > { %v3221_v60 = vsel %vm3213_vm11, %v3209_v2, %v3217_v63 }
0x1080   : > { %v3225_v57 = vadd.f32 1.0, %v3221_v60  ;;  %v3230_v61 = vmul.f32 %v3226_v39, %v3126_v58 }
0x1082   : > { %v3229_v59 = vmul.f32 %v3225_v57, %v3125_v55 }
0x1084   : > { %6886 = vmatprep.mubr.msk.f32.mxu1 %vm3243_vm9, %v3229_v59 }
0x1085   : > { %6887 = vmatmul.mubr.msk.f32.gmra.mxu1 %vm3243_vm9, %v3230_v61 }
0x113d   : > { %v6885_v0 = vpop.f32.mrf.mxu1 }
0x113e   : > { %v3328_v3 = vadd.f32 %v6885_v0, %v6292_v11 }
0x113f   : > { %v3322_v4 = vpop.f32.mrf.mxu1 }
0x1140   : > { %v7924_v5 = vadd.f32 %v3328_v3, %v7854_v33  ;;  %v3323_v13 = vadd.f32 %v6292_v11, %v3322_v4  ;;  %v6297_v3 = vld [vmem:[%s7473_s15 + $0x6] ss:$0 sm:$0xff] }
0x1142   : > { %v7927_v6 = vadd.f32 %v3323_v13, %v7849_v27  ;;  %v3348_v8 = vsel %vm674_vm4, %v7924_v5, 0.0  ;;  %v3362_v12 = vmul.f32 %v7924_v5, %v7924_v5 }
0x1143   : > { %3349 = vadd.xlane.f32.xlu0 %v3348_v8 }
0x1144   : > { %v3345_v7 = vsel %vm674_vm4, %v7927_v6, 0.0  ;;  %v3361_v9 = vmul.f32 %v7927_v6, %v7927_v6  ;;  %v3368_v10 = vsel %vm674_vm4, %v3362_v12, 0.0  ;;  %v6298_v12 = vld [vmem:[%s7473_s15 + $0x7] ss:$0 sm:$0xff] }
0x1145   : > { %3346 = vadd.xlane.f32.xlu1 %v3345_v7  ;;  %v6888_v33 = vpop.f32.mrf.mxu1 }
0x1146   : > { %v3338_v51 = vadd.f32 %v6888_v33, %v6292_v11  ;;  %v3365_v48 = vsel %vm674_vm4, %v3361_v9, 0.0 }
0x1147   : > { %3369 = vadd.xlane.f32.xlu0 %v3368_v10  ;;  %v3332_v27 = vpop.f32.mrf.mxu1 }
0x1148   : > { %v7940_v15 = vadd.f32 %v3338_v51, %v7863_v38  ;;  %v3333_v16 = vadd.f32 %v6292_v11, %v3332_v27 }
0x1149   : > { %3366 = vadd.xlane.f32.xlu1 %v3365_v48 }
0x114a   : > { %v7943_v17 = vadd.f32 %v3333_v16, %v7859_v44  ;;  %v3354_v18 = vsel %vm674_vm4, %v7940_v15, 0.0  ;;  %v3364_v19 = vmul.f32 %v7940_v15, %v7940_v15 }
0x114b   : > { %3355 = vadd.xlane.f32.xlu0 %v3354_v18 }
0x114c   : > { %v3351_v20 = vsel %vm674_vm4, %v7943_v17, 0.0  ;;  %v3363_v38 = vmul.f32 %v7943_v17, %v7943_v17  ;;  %v3374_v22 = vsel %vm674_vm4, %v3364_v19, 0.0 }
0x114d   : > { %3352 = vadd.xlane.f32.xlu1 %v3351_v20 }
0x114e   : > { %v3371_v44 = vsel %vm674_vm4, %v3363_v38, 0.0 }
0x114f   : > { %3375 = vadd.xlane.f32.xlu0 %v3374_v22 }
0x1151   : > { %3372 = vadd.xlane.f32.xlu1 %v3371_v44 }
0x11cc   : > { %v3350_v23 = vpop.xlane.xlu0 %3349 }
0x11cd   : > { %v3358_v49 = vmul.f32 0.03125, %v3350_v23 }
0x11ce   : > { %v3347_v34 = vpop.xlane.xlu1 %3346 }
0x11cf   : > { %v3357_v35 = vmul.f32 0.03125, %v3347_v34  ;;  %v3382_v31 = vmul.f32 %v3358_v49, %v3358_v49  ;;  %v3390_v59 = vsub.f32 %v7924_v5, %v3358_v49 }
0x11d0   : > { %v3370_v46 = vpop.xlane.xlu0 %3369 }
0x11d1   : > { %v3378_v32 = vmul.f32 0.03125, %v3370_v46  ;;  %v3381_v29 = vmul.f32 %v3357_v35, %v3357_v35  ;;  %v3389_v11 = vsub.f32 %v7927_v6, %v3357_v35 }
0x11d2   : > { %v3367_v43 = vpop.xlane.xlu1 %3366 }
0x11d3   : > { %v3386_v30 = vsub.f32 %v3378_v32, %v3382_v31  ;;  %v3377_v21 = vmul.f32 0.03125, %v3367_v43 }
0x11d4   : > { %v3356_v37 = vpop.xlane.xlu0 %3355 }
0x11d5   : > { %v3394_v52 = vadd.f32 1e-12, %v3386_v30  ;;  %v3385_v40 = vsub.f32 %v3377_v21, %v3381_v29  ;;  %v3360_v62 = vmul.f32 0.03125, %v3356_v37 }
0x11d6   : > { %v3353_v53 = vpop.xlane.xlu1 %3352 }
0x11d7   : > { %7203 = vrsqrt.f32 %v3394_v52  ;;  %v3393_v45 = vadd.f32 1e-12, %v3385_v40  ;;  %v3359_v36 = vmul.f32 0.03125, %v3353_v53  ;;  %v3384_v50 = vmul.f32 %v3360_v62, %v3360_v62 }
0x11d8   : > { %v3376_v47 = vpop.xlane.xlu0 %3375  ;;  %v3392_v33 = vsub.f32 %v7940_v15, %v3360_v62  ;;  %v6299_v15 = vld [vmem:[%s7504_s20 + $0x2] sm:$0x3] }
0x11d9   : > { %7205 = vrsqrt.f32 %v3393_v45  ;;  %v3380_v2 = vmul.f32 0.03125, %v3376_v47  ;;  %v3383_v63 = vmul.f32 %v3359_v36, %v3359_v36  ;;  %v3391_v5 = vsub.f32 %v7943_v17, %v3359_v36 }
0x11da   : > { %v3373_v54 = vpop.xlane.xlu1 %3372  ;;  %v3437_v17 = vrot.slane %v6299_v15, %v7507_v42 }
0x11db   : > { %v3388_v39 = vsub.f32 %v3380_v2, %v3384_v50  ;;  %v3379_v60 = vmul.f32 0.03125, %v3373_v54 }
0x11dd   : > { %v3396_v55 = vadd.f32 1e-12, %v3388_v39  ;;  %v3387_v57 = vsub.f32 %v3379_v60, %v3383_v63 }
0x11df   : > { %7207 = vrsqrt.f32 %v3396_v55  ;;  %v3395_v58 = vadd.f32 1e-12, %v3387_v57 }
0x11e1   : > { %7209 = vrsqrt.f32 %v3395_v58 }
0x11e4   : > { %v7204_v61 = vpop.eup %7203 }
0x11e5   : > { %v3402_v0 = vmul.f32 %v7204_v61, %v3390_v59 }
0x11e6   : > { %v7206_v4 = vpop.eup %7205 }
0x11e7   : > { %v3401_v13 = vmul.f32 %v7206_v4, %v3389_v11  ;;  %v3410_v8 = vmul.f32 %v6297_v3, %v3402_v0 }
0x11e9   : > { %v3409_v7 = vmul.f32 %v6297_v3, %v3401_v13  ;;  %v7966_v10 = vadd.f32 %v6298_v12, %v3410_v8 }
0x11eb   : > { %v7963_v9 = vadd.f32 %v6298_v12, %v3409_v7 }
0x11ec   : > { %v7208_v51 = vpop.eup %7207 }
0x11ed   : > { %6897 = vmatprep.mubr.msk.f32.mxu0 %vm674_vm4, %v7963_v9  ;;  %v3404_v6 = vmul.f32 %v7208_v51, %v3392_v33 }
0x11ee   : > { %6898 = vmatmul.mubr.msk.f32.vlgmr.msra.gmra.mxu0 %vm674_vm4, %v7966_v10  ;;  %v7210_v27 = vpop.eup %7209 }
0x11ef   : > { %v3403_v48 = vmul.f32 %v7210_v27, %v3391_v5  ;;  %v3412_v16 = vmul.f32 %v6297_v3, %v3404_v6 }
0x11f1   : > { %v3411_v18 = vmul.f32 %v6297_v3, %v3403_v48  ;;  %v7975_v20 = vadd.f32 %v6298_v12, %v3412_v16 }
0x11f3   : > { %v7973_v19 = vadd.f32 %v6298_v12, %v3411_v18 }
0x11f5   : > { %6900 = vmatprep.mubr.msk.f32.mxu0 %vm674_vm4, %v7973_v19 }
0x11f6   : > { %6901 = vmatmul.mubr.msk.f32.gmra.mxu0 %vm674_vm4, %v7975_v20 }
0x12ae   : > { %v6899_v38 = vpop.f32.mrf.mxu0 }
0x12af   : > { %v7983_v22 = vadd.f32 %v6899_v38, %v3437_v17 }
0x12b0   : > { %v3516_v44 = vpop.f32.mrf.mxu0 }
0x12b1   : > { %v7985_v24 = vadd.f32 %v3516_v44, %v3437_v17  ;;  %3544 = vrot.lane.b32.xlu1 %v7983_v22, %s7315_s21 }
0x12b3   : > { %3542 = vrot.lane.b32.xlu0 %v7985_v24, %s7315_s21  ;;  %6907 = vmatprep.mubr.msk.f32.mxu0 %vm900_vm5, %v7985_v24 }
0x12b6   : > { %v6902_v25 = vpop.f32.mrf.mxu0 }
0x12b7   : > { %v7993_v26 = vadd.f32 %v6902_v25, %v3437_v17 }
0x12b8   : > { %v3526_v28 = vpop.f32.mrf.mxu0 }
0x12b9   : > { %v7995_v42 = vadd.f32 %v3526_v28, %v3437_v17  ;;  %3633 = vrot.lane.b32.xlu1 %v7993_v26, %s7315_s21 }
0x12bb   : > { %6914 = vmatprep.mubr.msk.f32.mxu1 %vm900_vm5, %v7995_v42 }
0x12bd   : > { %3631 = vrot.lane.b32.xlu1 %v7995_v42, %s7315_s21 }
0x1323   : > { %v3545_v23 = vpop.permute.xlu1 %3544 }
0x1324   : > { %6903 = vmatprep.subr.msk.mxu0 %vm900_vm5, %v3545_v23 }
0x1325   : > { %v3543_v49 = vpop.permute.xlu0 %3542  ;;  %6904 = vmatpush3.xpose.msk.msra.mxu0 %vm900_vm5, %v3545_v23 }
0x1326   : > { %6905 = vmatprep.subr.msk.mxu0 %vm900_vm5, %v3543_v49 }
0x1329   : > { %6906 = vmatpush3.xpose.msk.msra.mxu0 %vm900_vm5, %v3543_v49 }
0x132b   : > { %v3634_v34 = vpop.permute.xlu1 %3633 }
0x132c   : > { %6908 = vmatmul.mubr.msk.f32.vlgmr.msra.gmra.mxu0 %vm900_vm5, %v7983_v22  ;;  %6910 = vmatprep.subr.msk.mxu1 %vm900_vm5, %v3634_v34 }
0x132d   : > { %6911 = vmatpush3.xpose.msk.msra.mxu1 %vm900_vm5, %v3634_v34 }
0x132f   : > { %v3632_v35 = vpop.permute.xlu1 %3631 }
0x1330   : > { %6912 = vmatprep.subr.msk.mxu1 %vm900_vm5, %v3632_v35 }
0x1331   : > { %6913 = vmatpush3.xpose.msk.msra.mxu1 %vm900_vm5, %v3632_v35 }
0x1334   : > { %6915 = vmatmul.mubr.msk.f32.vlgmr.msra.gmra.mxu1 %vm900_vm5, %v7993_v26 }
0x13ec   : > { %v6909_v46 = vpop.f32.mrf.mxu0 }
0x13ed   : > { %v3719_v31 = vmul.f32 0.35355338, %v6909_v46 }
0x13ee   : > { %v3620_v32 = vpop.f32.mrf.mxu0 }
0x13ef   : > { %v3723_v43 = vadd.f32 %v3719_v31, %v7551_v1  ;;  %v3718_v29 = vmul.f32 0.35355338, %v3620_v32 }
0x13f1   : > { %v3722_v30 = vadd.f32 %v3718_v29, %v7551_v1  ;;  %v3729_v21 = vsel %vm1091_vm6, %v3723_v43, -inf }
0x13f2   : > { %3730 = vmax.xlane.f32.xlu1 %v3729_v21 }
0x13f3   : > { %v3726_v52 = vsel %vm1091_vm6, %v3722_v30, -inf }
0x13f4   : > { %3727 = vmax.xlane.f32.xlu0 %v3726_v52  ;;  %v6916_v40 = vpop.f32.mrf.mxu1 }
0x13f5   : > { %v3721_v62 = vmul.f32 0.35355338, %v6916_v40 }
0x13f6   : > { %v3709_v37 = vpop.f32.mrf.mxu1 }
0x13f7   : > { %v3720_v45 = vmul.f32 0.35355338, %v3709_v37  ;;  %v3725_v36 = vadd.f32 %v3721_v62, %v7558_v14 }
0x13f9   : > { %v3724_v53 = vadd.f32 %v3720_v45, %v7558_v14  ;;  %v3735_v50 = vsel %vm1091_vm6, %v3725_v36, -inf }
0x13fb   : > { %v3732_v47 = vsel %vm1091_vm6, %v3724_v53, -inf }
0x13fc   : > { %3733 = vmax.xlane.f32.xlu0 %v3732_v47 }
0x1400   : > { %3736 = vmax.xlane.f32.xlu0 %v3735_v50 }
0x147b   : > { %v3731_v2 = vpop.xlane.xlu1 %3730 }
0x147c   : > { %v3739_v54 = vsub.f32 %v3723_v43, %v3731_v2 }
0x147d   : > { %v3728_v63 = vpop.xlane.xlu0 %3727 }
0x147e   : > { %v3744_v39 = vmul.f32 1.442695, %v3739_v54  ;;  %v3738_v60 = vsub.f32 %v3722_v30, %v3728_v63 }
0x1480   : > { %7211 = vpow2.f32 %v3744_v39  ;;  %v3742_v55 = vmul.f32 1.442695, %v3738_v60 }
0x1482   : > { %7213 = vpow2.f32 %v3742_v55 }
0x1485   : > { %v3734_v11 = vpop.xlane.xlu0 %3733 }
0x1486   : > { %v3740_v13 = vsub.f32 %v3724_v53, %v3734_v11 }
0x1488   : > { %v3746_v8 = vmul.f32 1.442695, %v3740_v13 }
0x1489   : > { %v3737_v0 = vpop.xlane.xlu0 %3736 }
0x148a   : > { %v3741_v3 = vsub.f32 %v3725_v36, %v3737_v0 }
0x148c   : > { %v3748_v4 = vmul.f32 1.442695, %v3741_v3 }
0x148d   : > { %v7212_v57 = vpop.eup %7211 }
0x148e   : > { %v3753_v58 = vsel %vm1091_vm6, %v7212_v57, 0.0  ;;  %7215 = vpow2.f32 %v3748_v4 }
0x148f   : > { %v7214_v59 = vpop.eup %7213  ;;  %3754 = vadd.xlane.f32.xlu0 %v3753_v58  ;;  %7217 = vpow2.f32 %v3746_v8 }
0x1490   : > { %v3750_v61 = vsel %vm1091_vm6, %v7214_v59, 0.0 }
0x1491   : > { %3751 = vadd.xlane.f32.xlu1 %v3750_v61 }
0x149b   : > { %v7216_v12 = vpop.eup %7215 }
0x149c   : > { %v3759_v7 = vsel %vm1091_vm6, %v7216_v12, 0.0  ;;  %v7218_v33 = vpop.eup %7217 }
0x149d   : > { %v3756_v51 = vsel %vm1091_vm6, %v7218_v33, 0.0 }
0x14a2   : > { %3772 = vrot.lane.b32.xlu1 %v7983_v22, %s7317_s27 }
0x14a5   : > { %3770 = vrot.lane.b32.xlu0 %v7985_v24, %s7317_s27 }
0x14a6   : > { %3859 = vrot.lane.b32.xlu1 %v7993_v26, %s7317_s27 }
0x14a9   : > { %3857 = vrot.lane.b32.xlu0 %v7995_v42, %s7317_s27 }
0x14aa   : > { %3950 = vrot.lane.b32.xlu1 %v7983_v22, %s7318_s28 }
0x14ad   : > { %4041 = vrot.lane.b32.xlu0 %v7993_v26, %s7318_s28 }
0x14ae   : > { %3948 = vrot.lane.b32.xlu1 %v7985_v24, %s7318_s28 }
0x14b2   : > { %3944 = vrot.lane.b32.xlu1 %v7985_v24, %s7319_s30 }
0x14b6   : > { %4039 = vrot.lane.b32.xlu1 %v7995_v42, %s7318_s28 }
0x14cc   : > { %3760 = vadd.xlane.f32.xlu0 %v3759_v7 }
0x14da   : > { %3757 = vadd.xlane.f32.xlu1 %v3756_v51 }
0x14e2   : > { %3946 = vrot.lane.b32.xlu0 %v7983_v22, %s7319_s30 }
0x14e6   : > { %4035 = vrot.lane.b32.xlu0 %v7995_v42, %s7319_s30 }
0x14eb   : > { %4037 = vrot.lane.b32.xlu1 %v7993_v26, %s7319_s30 }
0x1518   : > { %v3755_v5 = vpop.xlane.xlu0 %3754 }
0x1519   : > { %7219 = vrcp.f32 %v3755_v5 }
0x151a   : > { %v3752_v6 = vpop.xlane.xlu1 %3751 }
0x151b   : > { %7221 = vrcp.f32 %v3752_v6 }
0x151c   : > { %v3771_v27 = vpop.permute.xlu0 %3770 }
0x151e   : > { %v3773_v48 = vpop.permute.xlu1 %3772 }
0x151f   : > { %6917 = vmatprep.subr.mxu0 %v3773_v48 }
0x1520   : > { %v3858_v16 = vpop.permute.xlu0 %3857  ;;  %6918 = vmatpush3.msra.mxu0 %v3773_v48 }
0x1521   : > { %6919 = vmatprep.subr.mxu0 %v3771_v27 }
0x1522   : > { %6920 = vmatpush3.msra.mxu0 %v3771_v27  ;;  %v3860_v18 = vpop.permute.xlu1 %3859 }
0x1523   : > { %6924 = vmatprep.subr.mxu1 %v3860_v18 }
0x1524   : > { %6925 = vmatpush3.msra.mxu1 %v3860_v18  ;;  %v4042_v15 = vpop.permute.xlu0 %4041 }
0x1525   : > { %6926 = vmatprep.subr.mxu1 %v3858_v16 }
0x1526   : > { %6927 = vmatpush3.msra.mxu1 %v3858_v16  ;;  %v3951_v17 = vpop.permute.xlu1 %3950  ;;  %v7220_v38 = vpop.eup %7219 }
0x1527   : > { %6931 = vmatprep.subr.msk.mxu0 %vm900_vm5, %v3951_v17  ;;  %6938 = vmatprep.subr.msk.mxu1 %vm900_vm5, %v4042_v15  ;;  %v3765_v23 = vmul.f32 %v7220_v38, %v7212_v57 }
0x1528   : > { %v7222_v44 = vpop.eup %7221 }
0x1529   : > { %v3763_v25 = vmul.f32 %v7222_v44, %v7214_v59 }
0x152a   : > { %v3949_v28 = vpop.permute.xlu1 %3948 }
0x152b   : > { %6921 = vmatprep.mubr.msk.f32.mxu0 %vm1091_vm6, %v3763_v25 }
0x152c   : > { %6922 = vmatmul.mubr.msk.f32.vlgmr.msra.gmra.mxu0 %vm1091_vm6, %v3765_v23 }
0x152d   : > { %6932 = vmatpush3.xpose.msk.msra.mxu0 %vm900_vm5, %v3951_v17 }
0x152e   : > { %6933 = vmatprep.subr.msk.mxu0 %vm900_vm5, %v3949_v28  ;;  %v3945_v49 = vpop.permute.xlu1 %3944 }
0x152f   : > { %6935 = vmatprep.mubr.msk.f32.mxu0 %vm900_vm5, %v3945_v49 }
0x1531   : > { %6934 = vmatpush3.xpose.msk.msra.mxu0 %vm900_vm5, %v3949_v28 }
0x1532   : > { %v4040_v46 = vpop.permute.xlu1 %4039 }
0x1555   : > { %v3761_v34 = vpop.xlane.xlu0 %3760 }
0x1556   : > { %7223 = vrcp.f32 %v3761_v34 }
0x1559   : > { %v3947_v35 = vpop.permute.xlu0 %3946 }
0x155a   : > { %6936 = vmatmul.mubr.msk.f32.vlgmr.msra.gmra.mxu0 %vm900_vm5, %v3947_v35 }
0x155d   : > { %v4036_v21 = vpop.permute.xlu0 %4035 }
0x1563   : > { %v3758_v31 = vpop.xlane.xlu1 %3757  ;;  %v7224_v32 = vpop.eup %7223 }
0x1564   : > { %7225 = vrcp.f32 %v3758_v31  ;;  %v3769_v30 = vmul.f32 %v7224_v32, %v7216_v12 }
0x1567   : > { %v4038_v52 = vpop.permute.xlu1 %4037 }
0x1571   : > { %v7226_v43 = vpop.eup %7225 }
0x1572   : > { %v3767_v29 = vmul.f32 %v7226_v43, %v7218_v33 }
0x1574   : > { %6928 = vmatprep.mubr.msk.f32.mxu1 %vm1091_vm6, %v3767_v29 }
0x1575   : > { %6929 = vmatmul.mubr.msk.f32.vlgmr.msra.gmra.mxu1 %vm1091_vm6, %v3769_v30  ;;  %v6309_v30 = vld [vmem:[%s7612_s17 + $0x28] sm:$0xff] }
0x1576   : > { %6939 = vmatpush3.xpose.msk.msra.mxu1 %vm900_vm5, %v4042_v15  ;;  %6942 = vmatprep.mubr.msk.f32.mxu1 %vm900_vm5, %v4036_v21 }
0x1577   : > { %6940 = vmatprep.subr.msk.mxu1 %vm900_vm5, %v4040_v46 }
0x157a   : > { %6941 = vmatpush3.xpose.msk.msra.mxu1 %vm900_vm5, %v4040_v46 }
0x157d   : > { %6943 = vmatmul.mubr.msk.f32.vlgmr.msra.gmra.mxu1 %vm900_vm5, %v4038_v52 }
0x15ec   : > { %v8067_v40 = vpop.f32.mrf.mxu0 }
0x15ee   : > { %v8069_v37 = vpop.f32.mrf.mxu0 }
0x161a   : > { %v6937_v62 = vpop.f32.mrf.mxu0 }
0x161b   : > { %v4127_v45 = vmul.f32 0.35355338, %v6937_v62 }
0x161c   : > { %v4026_v53 = vpop.f32.mrf.mxu0 }
0x161d   : > { %v4131_v36 = vadd.f32 %v4127_v45, %v7551_v1  ;;  %v4126_v47 = vmul.f32 0.35355338, %v4026_v53  ;;  %v6308_v53 = vld [vmem:[%s7612_s17 + $0x20] sm:$0xff] }
0x161f   : > { %v4130_v50 = vadd.f32 %v4126_v47, %v7551_v1  ;;  %v4137_v2 = vsel %vm1091_vm6, %v4131_v36, -inf }
0x1620   : > { %4138 = vmax.xlane.f32.xlu1 %v4137_v2 }
0x1621   : > { %v4134_v54 = vsel %vm1091_vm6, %v4130_v50, -inf }
0x1622   : > { %4135 = vmax.xlane.f32.xlu0 %v4134_v54 }
0x1635   : > { %v8075_v63 = vpop.f32.mrf.mxu1 }
0x1637   : > { %v8077_v39 = vpop.f32.mrf.mxu1 }
0x163d   : > { %v6944_v60 = vpop.f32.mrf.mxu1 }
0x163e   : > { %v4129_v57 = vmul.f32 0.35355338, %v6944_v60 }
0x163f   : > { %v4117_v55 = vpop.f32.mrf.mxu1 }
0x1640   : > { %v4128_v58 = vmul.f32 0.35355338, %v4117_v55  ;;  %v4133_v61 = vadd.f32 %v4129_v57, %v7558_v14 }
0x1642   : > { %v4132_v59 = vadd.f32 %v4128_v58, %v7558_v14  ;;  %v4143_v0 = vsel %vm1091_vm6, %v4133_v61, -inf }
0x1644   : > { %v4140_v11 = vsel %vm1091_vm6, %v4132_v59, -inf }
0x1645   : > { %4141 = vmax.xlane.f32.xlu0 %v4140_v11 }
0x1649   : > { %4144 = vmax.xlane.f32.xlu0 %v4143_v0 }
0x16a9   : > { %v4139_v3 = vpop.xlane.xlu1 %4138 }
0x16aa   : > { %v4147_v4 = vsub.f32 %v4131_v36, %v4139_v3 }
0x16ab   : > { %v4136_v13 = vpop.xlane.xlu0 %4135 }
0x16ac   : > { %v4152_v8 = vmul.f32 1.442695, %v4147_v4  ;;  %v4146_v12 = vsub.f32 %v4130_v50, %v4136_v13 }
0x16ae   : > { %7227 = vpow2.f32 %v4152_v8  ;;  %v4150_v7 = vmul.f32 1.442695, %v4146_v12 }
0x16b0   : > { %7229 = vpow2.f32 %v4150_v7 }
0x16bb   : > { %v7228_v33 = vpop.eup %7227 }
0x16bc   : > { %v4161_v51 = vsel %vm1091_vm6, %v7228_v33, 0.0 }
0x16bd   : > { %v7230_v5 = vpop.eup %7229  ;;  %4162 = vadd.xlane.f32.xlu0 %v4161_v51 }
0x16be   : > { %v4158_v6 = vsel %vm1091_vm6, %v7230_v5, 0.0 }
0x16bf   : > { %4159 = vadd.xlane.f32.xlu1 %v4158_v6 }
0x16ce   : > { %v4142_v27 = vpop.xlane.xlu0 %4141 }
0x16cf   : > { %v4148_v15 = vsub.f32 %v4132_v59, %v4142_v27 }
0x16d0   : > { %4180 = vrot.lane.b32.xlu1 %v7983_v22, %s7320_s18 }
0x16d1   : > { %v4154_v17 = vmul.f32 1.442695, %v4148_v15 }
0x16d2   : > { %v4145_v48 = vpop.xlane.xlu0 %4144 }
0x16d3   : > { %v4149_v16 = vsub.f32 %v4133_v61, %v4145_v48 }
0x16d4   : > { %4267 = vrot.lane.b32.xlu1 %v7993_v26, %s7320_s18 }
0x16d5   : > { %v4156_v18 = vmul.f32 1.442695, %v4149_v16 }
0x16d7   : > { %7231 = vpow2.f32 %v4156_v18 }
0x16d8   : > { %7233 = vpow2.f32 %v4154_v17 }
0x16e4   : > { %v7232_v38 = vpop.eup %7231 }
0x16e5   : > { %v4167_v44 = vsel %vm1091_vm6, %v7232_v38, 0.0  ;;  %v7234_v25 = vpop.eup %7233 }
0x16e6   : > { %4168 = vadd.xlane.f32.xlu0 %v4167_v44  ;;  %v4164_v28 = vsel %vm1091_vm6, %v7234_v25, 0.0 }
0x16f8   : > { %4165 = vadd.xlane.f32.xlu1 %v4164_v28 }
0x16fc   : > { %4178 = vrot.lane.b32.xlu0 %v7985_v24, %s7320_s18 }
0x1700   : > { %4552 = vrot.lane.b32.xlu0 %v7983_v22, %s7321_s19 }
0x1704   : > { %4643 = vrot.lane.b32.xlu0 %v7993_v26, %s7321_s19 }
0x1708   : > { %4548 = vrot.lane.b32.xlu0 %v7983_v22, %s7322_s23 }
0x1709   : > { %4265 = vrot.lane.b32.xlu1 %v7995_v42, %s7320_s18 }
0x170c   : > { %4637 = vrot.lane.b32.xlu0 %v7995_v42, %s7322_s23 }
0x170d   : > { %4550 = vrot.lane.b32.xlu1 %v7985_v24, %s7321_s19 }
0x1711   : > { %4546 = vrot.lane.b32.xlu1 %v7985_v24, %s7322_s23 }
0x1715   : > { %4641 = vrot.lane.b32.xlu1 %v7995_v42, %s7321_s19 }
0x1719   : > { %4639 = vrot.lane.b32.xlu1 %v7993_v26, %s7322_s23 }
0x1746   : > { %v4163_v31 = vpop.xlane.xlu0 %4162 }
0x1748   : > { %v4160_v23 = vpop.xlane.xlu1 %4159 }
0x1749   : > { %7235 = vrcp.f32 %v4160_v23 }
0x174a   : > { %7237 = vrcp.f32 %v4163_v31 }
0x174c   : > { %v4181_v49 = vpop.permute.xlu1 %4180 }
0x174d   : > { %6945 = vmatprep.subr.mxu0 %v4181_v49 }
0x174e   : > { %6946 = vmatpush3.msra.mxu0 %v4181_v49 }
0x1750   : > { %v4268_v34 = vpop.permute.xlu1 %4267 }
0x1751   : > { %6952 = vmatprep.subr.mxu1 %v4268_v34 }
0x1752   : > { %6953 = vmatpush3.msra.mxu1 %v4268_v34 }
0x1756   : > { %v7236_v35 = vpop.eup %7235 }
0x1757   : > { %v4171_v46 = vmul.f32 %v7236_v35, %v7230_v5  ;;  %v7238_v43 = vpop.eup %7237 }
0x1758   : > { %v4173_v21 = vmul.f32 %v7238_v43, %v7228_v33 }
0x1759   : > { %6949 = vmatprep.mubr.msk.f32.mxu0 %vm1091_vm6, %v4171_v46 }
0x176f   : > { %v4169_v32 = vpop.xlane.xlu0 %4168 }
0x1770   : > { %7239 = vrcp.f32 %v4169_v32 }
0x1773   : > { %v4179_v29 = vpop.permute.xlu0 %4178 }
0x1774   : > { %6947 = vmatprep.subr.mxu0 %v4179_v29 }
0x1775   : > { %6948 = vmatpush3.msra.mxu0 %v4179_v29 }
0x1776   : > { %6950 = vmatmul.mubr.msk.f32.vlgmr.msra.gmra.mxu0 %vm1091_vm6, %v4173_v21  ;;  %6959 = vmatprep.subr.mxu0 %v6309_v30 }
0x1777   : > { %v4553_v52 = vpop.permute.xlu0 %4552  ;;  %6960 = vmatpush3.msra.mxu0 %v6309_v30 }
0x1778   : > { %6975 = vmatprep.subr.msk.mxu0 %vm900_vm5, %v4553_v52 }
0x177b   : > { %v4644_v2 = vpop.permute.xlu0 %4643 }
0x177d   : > { %v7240_v47 = vpop.eup %7239 }
0x177e   : > { %v4177_v60 = vmul.f32 %v7240_v47, %v7232_v38 }
0x177f   : > { %v4549_v57 = vpop.permute.xlu0 %4548 }
0x1781   : > { %v4166_v62 = vpop.xlane.xlu1 %4165 }
0x1782   : > { %7241 = vrcp.f32 %v4166_v62 }
0x1783   : > { %v4638_v59 = vpop.permute.xlu0 %4637 }
0x1785   : > { %v4266_v45 = vpop.permute.xlu1 %4265 }
0x1786   : > { %6954 = vmatprep.subr.mxu1 %v4266_v45 }
0x1787   : > { %6955 = vmatpush3.msra.mxu1 %v4266_v45 }
0x1788   : > { %6967 = vmatprep.subr.mxu1 %v6308_v53 }
0x1789   : > { %v4551_v36 = vpop.permute.xlu1 %4550 }
0x178d   : > { %v4547_v55 = vpop.permute.xlu1 %4546 }
0x178f   : > { %v7242_v50 = vpop.eup %7241 }
0x1790   : > { %v4175_v54 = vmul.f32 %v7242_v50, %v7234_v25 }
0x1791   : > { %v4642_v58 = vpop.permute.xlu1 %4641 }
0x1792   : > { %6956 = vmatprep.mubr.msk.f32.mxu1 %vm1091_vm6, %v4175_v54 }
0x1793   : > { %6957 = vmatmul.mubr.msk.f32.vlgmr.msra.gmra.mxu1 %vm1091_vm6, %v4177_v60 }
0x1794   : > { %6968 = vmatpush3.msra.mxu1 %v6308_v53  ;;  %6969 = vmatprep.mubr.msk.f32.mxu1 %vm900_vm5, %v8069_v37 }
0x1795   : > { %6982 = vmatprep.subr.msk.mxu1 %vm900_vm5, %v4644_v2  ;;  %v4640_v37 = vpop.permute.xlu1 %4639 }
0x1797   : > { %6970 = vmatmul.mubr.msk.f32.vlgmr.msra.gmra.mxu1 %vm900_vm5, %v8067_v40 }
0x1798   : > { %6983 = vmatpush3.xpose.msk.msra.mxu1 %vm900_vm5, %v4644_v2  ;;  %6972 = vmatprep.mubr.msk.f32.mxu1 %vm900_vm5, %v8077_v39 }
0x1799   : > { %6984 = vmatprep.subr.msk.mxu1 %vm900_vm5, %v4642_v58 }
0x179b   : > { %6973 = vmatmul.mubr.msk.f32.gmra.mxu1 %vm900_vm5, %v8075_v63 }
0x179c   : > { %6985 = vmatpush3.xpose.msk.msra.mxu1 %vm900_vm5, %v4642_v58  ;;  %6986 = vmatprep.mubr.msk.f32.mxu1 %vm900_vm5, %v4638_v59 }
0x179f   : > { %6987 = vmatmul.mubr.msk.f32.vlgmr.msra.gmra.mxu1 %vm900_vm5, %v4640_v37 }
0x1836   : > { %v6951_v40 = vpop.f32.mrf.mxu0 }
0x1838   : > { %v4256_v61 = vpop.f32.mrf.mxu0 }
0x1839   : > { %6961 = vmatprep.mubr.msk.f32.mxu0 %vm900_vm5, %v4256_v61 }
0x183a   : > { %6962 = vmatmul.mubr.msk.f32.vlgmr.msra.gmra.mxu0 %vm900_vm5, %v6951_v40 }
0x183b   : > { %6976 = vmatpush3.xpose.msk.msra.mxu0 %vm900_vm5, %v4553_v52 }
0x183c   : > { %6977 = vmatprep.subr.msk.mxu0 %vm900_vm5, %v4551_v36 }
0x183f   : > { %6978 = vmatpush3.xpose.msk.msra.mxu0 %vm900_vm5, %v4551_v36 }
0x1853   : > { %v6958_v63 = vpop.f32.mrf.mxu1 }
0x1855   : > { %v4343_v39 = vpop.f32.mrf.mxu1 }
0x1856   : > { %6964 = vmatprep.mubr.msk.f32.mxu0 %vm900_vm5, %v4343_v39 }
0x1857   : > { %6965 = vmatmul.mubr.msk.f32.gmra.mxu0 %vm900_vm5, %v6958_v63  ;;  %v8141_v11 = vpop.f32.mrf.mxu1  ;;  %v6310_v63 = vld [vmem:[%s7612_s17 + $0x30] sm:$0xff] }
0x1858   : > { %6979 = vmatprep.mubr.msk.f32.mxu0 %vm900_vm5, %v4547_v55 }
0x1859   : > { %v8143_v0 = vpop.f32.mrf.mxu1 }
0x185b   : > { %6980 = vmatmul.mubr.msk.f32.vlgmr.msra.gmra.mxu0 %vm900_vm5, %v4549_v57  ;;  %v8145_v3 = vpop.f32.mrf.mxu1 }
0x185d   : > { %v8149_v13 = vpop.f32.mrf.mxu1 }
0x185f   : > { %v6988_v12 = vpop.f32.mrf.mxu1 }
0x1860   : > { %v4731_v38 = vmul.f32 0.35355338, %v6988_v12 }
0x1861   : > { %v4719_v51 = vpop.f32.mrf.mxu1 }
0x1862   : > { %v4730_v48 = vmul.f32 0.35355338, %v4719_v51  ;;  %v4735_v28 = vadd.f32 %v4731_v38, %v7558_v14 }
0x1864   : > { %v4734_v44 = vadd.f32 %v4730_v48, %v7558_v14  ;;  %v4745_v49 = vsel %vm1091_vm6, %v4735_v28, -inf }
0x1866   : > { %v4742_v23 = vsel %vm1091_vm6, %v4734_v44, -inf }
0x18fa   : > { %v8147_v4 = vpop.f32.mrf.mxu0 }
0x18fc   : > { %v8151_v8 = vpop.f32.mrf.mxu0 }
0x1917   : > { %v8153_v7 = vpop.f32.mrf.mxu0 }
0x1919   : > { %v8155_v33 = vpop.f32.mrf.mxu0 }
0x191b   : > { %v6981_v5 = vpop.f32.mrf.mxu0 }
0x191c   : > { %v4729_v6 = vmul.f32 0.35355338, %v6981_v5 }
0x191d   : > { %v4628_v27 = vpop.f32.mrf.mxu0 }
0x191e   : > { %v4733_v16 = vadd.f32 %v4729_v6, %v7551_v1  ;;  %v4728_v18 = vmul.f32 0.35355338, %v4628_v27 }
0x1920   : > { %v4732_v15 = vadd.f32 %v4728_v18, %v7551_v1  ;;  %v4739_v17 = vsel %vm1091_vm6, %v4733_v16, -inf }
0x1921   : > { %4740 = vmax.xlane.f32.xlu1 %v4739_v17 }
0x1922   : > { %v4736_v25 = vsel %vm1091_vm6, %v4732_v15, -inf }
0x1923   : > { %4737 = vmax.xlane.f32.xlu0 %v4736_v25 }
0x1927   : > { %4743 = vmax.xlane.f32.xlu0 %v4742_v23 }
0x192b   : > { %4746 = vmax.xlane.f32.xlu0 %v4745_v49 }
0x19aa   : > { %v4741_v35 = vpop.xlane.xlu1 %4740 }
0x19ab   : > { %v4749_v32 = vsub.f32 %v4733_v16, %v4741_v35 }
0x19ac   : > { %v4738_v34 = vpop.xlane.xlu0 %4737 }
0x19ad   : > { %v4754_v21 = vmul.f32 1.442695, %v4749_v32  ;;  %v4748_v2 = vsub.f32 %v4732_v15, %v4738_v34 }
0x19af   : > { %v4752_v54 = vmul.f32 1.442695, %v4748_v2 }
0x19b0   : > { %v4744_v46 = vpop.xlane.xlu0 %4743 }
0x19b1   : > { %v4750_v31 = vsub.f32 %v4734_v44, %v4744_v46 }
0x19b3   : > { %v4756_v43 = vmul.f32 1.442695, %v4750_v31 }
0x19b4   : > { %v4747_v29 = vpop.xlane.xlu0 %4746 }
0x19b5   : > { %7243 = vpow2.f32 %v4756_v43  ;;  %v4751_v30 = vsub.f32 %v4735_v28, %v4747_v29 }
0x19b7   : > { %v4758_v52 = vmul.f32 1.442695, %v4751_v30 }
0x19b9   : > { %7245 = vpow2.f32 %v4758_v52 }
0x19ba   : > { %7247 = vpow2.f32 %v4754_v21 }
0x19bb   : > { %7249 = vpow2.f32 %v4752_v54 }
0x19c2   : > { %v7244_v62 = vpop.eup %7243 }
0x19c3   : > { %v4766_v45 = vsel %vm1091_vm6, %v7244_v62, 0.0 }
0x19c4   : > { %4767 = vadd.xlane.f32.xlu1 %v4766_v45 }
0x19c6   : > { %v7246_v53 = vpop.eup %7245 }
0x19c7   : > { %v4769_v36 = vsel %vm1091_vm6, %v7246_v53, 0.0  ;;  %v8167_v47 = vpop.eup %7247 }
0x19c8   : > { %4770 = vadd.xlane.f32.xlu0 %v4769_v36  ;;  %v4763_v50 = vsel %vm1091_vm6, %v8167_v47, 0.0  ;;  %v7250_v60 = vpop.eup %7249 }
0x19c9   : > { %v4760_v55 = vsel %vm1091_vm6, %v7250_v60, 0.0 }
0x19cc   : > { %4764 = vadd.xlane.f32.xlu0 %v4763_v50 }
0x19d5   : > { %4782 = vrot.lane.b32.xlu1 %v7983_v22, %s7323_s24 }
0x19d9   : > { %4869 = vrot.lane.b32.xlu1 %v7993_v26, %s7323_s24 }
0x19e2   : > { %4780 = vrot.lane.b32.xlu0 %v7985_v24, %s7323_s24 }
0x19e6   : > { %5061 = vrot.lane.b32.xlu0 %v7983_v22, %s7324_s25 }
0x19ea   : > { %5152 = vrot.lane.b32.xlu0 %v7993_v26, %s7324_s25 }
0x19ee   : > { %5057 = vrot.lane.b32.xlu0 %v7983_v22, %s8400_s16 }
0x19f2   : > { %5146 = vrot.lane.b32.xlu0 %v7995_v42, %s8400_s16 }
0x19fd   : > { %4761 = vadd.xlane.f32.xlu1 %v4760_v55 }
0x1a0e   : > { %4867 = vrot.lane.b32.xlu1 %v7995_v42, %s7323_s24 }
0x1a12   : > { %5059 = vrot.lane.b32.xlu1 %v7985_v24, %s7324_s25 }
0x1a16   : > { %5055 = vrot.lane.b32.xlu1 %v7985_v24, %s8400_s16 }
0x1a1a   : > { %5150 = vrot.lane.b32.xlu1 %v7995_v42, %s7324_s25 }
0x1a1e   : > { %5148 = vrot.lane.b32.xlu1 %v7993_v26, %s8400_s16 }
0x1a4d   : > { %v4768_v57 = vpop.xlane.xlu1 %4767 }
0x1a4e   : > { %7251 = vrcp.f32 %v4768_v57 }
0x1a51   : > { %v4771_v58 = vpop.xlane.xlu0 %4770  ;;  %v4783_v59 = vpop.permute.xlu1 %4782 }
0x1a52   : > { %6989 = vmatprep.subr.mxu0 %v4783_v59  ;;  %7253 = vrcp.f32 %v4771_v58  ;;  %v4528_v58 = vadd.f32 %v8143_v0, %v8151_v8 }
0x1a53   : > { %6990 = vmatpush3.msra.mxu0 %v4783_v59 }
0x1a55   : > { %v4765_v37 = vpop.xlane.xlu0 %4764  ;;  %v4870_v40 = vpop.permute.xlu1 %4869 }
0x1a56   : > { %6996 = vmatprep.subr.mxu1 %v4870_v40  ;;  %7255 = vrcp.f32 %v4765_v37 }
0x1a57   : > { %6997 = vmatpush3.msra.mxu1 %v4870_v40  ;;  %v4543_v40 = vadd.f32 %v8145_v3, %v8153_v7 }
0x1a59   : > { %v4781_v61 = vpop.permute.xlu0 %4780 }
0x1a5a   : > { %6991 = vmatprep.subr.mxu0 %v4781_v61 }
0x1a5b   : > { %v7252_v39 = vpop.eup %7251  ;;  %6992 = vmatpush3.msra.mxu0 %v4781_v61 }
0x1a5c   : > { %v4777_v12 = vmul.f32 %v7252_v39, %v7244_v62  ;;  %7003 = vmatprep.subr.mxu0 %v6310_v63 }
0x1a5d   : > { %v5062_v6 = vpop.permute.xlu0 %5061 }
0x1a5e   : > { %7000 = vmatprep.mubr.msk.f32.mxu1 %vm1091_vm6, %v4777_v12 }
0x1a5f   : > { %v7254_v5 = vpop.eup %7253 }
0x1a60   : > { %v4779_v48 = vmul.f32 %v7254_v5, %v7246_v53 }
0x1a61   : > { %v5153_v16 = vpop.permute.xlu0 %5152 }
0x1a63   : > { %v7256_v17 = vpop.eup %7255 }
0x1a64   : > { %v4775_v28 = vmul.f32 %v7256_v17, %v8167_v47 }
0x1a65   : > { %v5058_v44 = vpop.permute.xlu0 %5057 }
0x1a69   : > { %v5147_v45 = vpop.permute.xlu0 %5146 }
0x1a86   : > { %v4762_v51 = vpop.xlane.xlu1 %4761 }
0x1a87   : > { %7257 = vrcp.f32 %v4762_v51 }
0x1a8a   : > { %v4868_v27 = vpop.permute.xlu1 %4867 }
0x1a8b   : > { %6998 = vmatprep.subr.mxu1 %v4868_v27 }
0x1a8c   : > { %6999 = vmatpush3.msra.mxu1 %v4868_v27 }
0x1a8d   : > { %7001 = vmatmul.mubr.msk.f32.vlgmr.msra.gmra.mxu1 %vm1091_vm6, %v4779_v48  ;;  %7011 = vmatprep.subr.msk.mxu1 %vm900_vm5, %v5062_v6 }
0x1a8e   : > { %7012 = vmatpush3.xpose.msk.msra.mxu1 %vm900_vm5, %v5062_v6  ;;  %v5060_v18 = vpop.permute.xlu1 %5059 }
0x1a8f   : > { %7013 = vmatprep.subr.msk.mxu1 %vm900_vm5, %v5060_v18 }
0x1a92   : > { %7014 = vmatpush3.xpose.msk.msra.mxu1 %vm900_vm5, %v5060_v18  ;;  %v5056_v15 = vpop.permute.xlu1 %5055 }
0x1a93   : > { %7015 = vmatprep.mubr.msk.f32.mxu1 %vm900_vm5, %v5056_v15 }
0x1a94   : > { %v7258_v38 = vpop.eup %7257 }
0x1a95   : > { %7016 = vmatmul.mubr.msk.f32.vlgmr.msra.gmra.mxu1 %vm900_vm5, %v5058_v44  ;;  %v4773_v25 = vmul.f32 %v7258_v38, %v7250_v60  ;;  %v4533_v60 = vadd.f32 %v8141_v11, %v8147_v4 }
0x1a96   : > { %v5151_v62 = vpop.permute.xlu1 %5150 }
0x1a97   : > { %6993 = vmatprep.mubr.msk.f32.mxu0 %vm1091_vm6, %v4773_v25 }
0x1a98   : > { %6994 = vmatmul.mubr.msk.f32.vlgmr.msra.gmra.mxu0 %vm1091_vm6, %v4775_v28 }
0x1a99   : > { %7004 = vmatpush3.msra.mxu0 %v6310_v63 }
0x1a9a   : > { %7018 = vmatprep.subr.msk.mxu0 %vm900_vm5, %v5153_v16 }
0x1b4d   : > { %v7002_v23 = vpop.f32.mrf.mxu1 }
0x1b4f   : > { %v4945_v49 = vpop.f32.mrf.mxu1 }
0x1b55   : > { %v7017_v34 = vpop.f32.mrf.mxu1 }
0x1b56   : > { %v5238_v35 = vmul.f32 0.35355338, %v7017_v34 }
0x1b57   : > { %v5137_v46 = vpop.f32.mrf.mxu1 }
0x1b58   : > { %v5242_v31 = vadd.f32 %v5238_v35, %v7551_v1  ;;  %v5237_v32 = vmul.f32 0.35355338, %v5137_v46  ;;  %v6995_v43 = vpop.f32.mrf.mxu0 }
0x1b5a   : > { %v5241_v29 = vadd.f32 %v5237_v32, %v7551_v1  ;;  %v4858_v30 = vpop.f32.mrf.mxu0  ;;  %v5248_v21 = vsel %vm1091_vm6, %v5242_v31, -inf  ;;  %v5149_v1 = vpop.permute.xlu1 %5148 }
0x1b5b   : > { %7005 = vmatprep.mubr.msk.f32.mxu0 %vm900_vm5, %v4858_v30  ;;  %5249 = vmax.xlane.f32.xlu1 %v5248_v21 }
0x1b5c   : > { %7006 = vmatmul.mubr.msk.f32.vlgmr.msra.gmra.mxu0 %vm900_vm5, %v6995_v43  ;;  %v5245_v52 = vsel %vm1091_vm6, %v5241_v29, -inf }
0x1b5d   : > { %7019 = vmatpush3.xpose.msk.msra.mxu0 %vm900_vm5, %v5153_v16  ;;  %7008 = vmatprep.mubr.msk.f32.mxu0 %vm900_vm5, %v4945_v49 }
0x1b5e   : > { %5246 = vmax.xlane.f32.xlu0 %v5245_v52  ;;  %7020 = vmatprep.subr.msk.mxu0 %vm900_vm5, %v5151_v62 }
0x1b60   : > { %7009 = vmatmul.mubr.msk.f32.gmra.mxu0 %vm900_vm5, %v7002_v23 }
0x1b61   : > { %7021 = vmatpush3.xpose.msk.msra.mxu0 %vm900_vm5, %v5151_v62  ;;  %7022 = vmatprep.mubr.msk.f32.mxu0 %vm900_vm5, %v5147_v45  ;;  %v6311_v45 = vld [vmem:[%s7612_s17 + $0x38] sm:$0xff] }
0x1b64   : > { %7023 = vmatmul.mubr.msk.f32.vlgmr.msra.gmra.mxu0 %vm900_vm5, %v5149_v1 }
0x1be4   : > { %v5250_v54 = vpop.xlane.xlu1 %5249 }
0x1be5   : > { %v5258_v55 = vsub.f32 %v5242_v31, %v5250_v54  ;;  %v6376_v54 = vld [vmem:[%s7473_s15 + $0x8] ss:$0 sm:$0xff] }
0x1be7   : > { %v5247_v53 = vpop.xlane.xlu0 %5246  ;;  %v5263_v61 = vmul.f32 1.442695, %v5258_v55 }
0x1be8   : > { %v5257_v36 = vsub.f32 %v5241_v29, %v5247_v53 }
0x1bea   : > { %v5261_v47 = vmul.f32 1.442695, %v5257_v36 }
0x1bec   : > { %7259 = vpow2.f32 %v5261_v47 }
0x1bed   : > { %7261 = vpow2.f32 %v5263_v61 }
0x1bf9   : > { %v7260_v50 = vpop.eup %7259 }
0x1bfa   : > { %v5269_v2 = vsel %vm1091_vm6, %v7260_v50, 0.0 }
0x1bfb   : > { %5270 = vadd.xlane.f32.xlu1 %v5269_v2 }
0x1c0c   : > { %5291 = vrot.lane.b32.xlu1 %v7983_v22, %s8401_s29 }
0x1c10   : > { %5378 = vrot.lane.b32.xlu1 %v7993_v26, %s8401_s29  ;;  %v4538_v26 = vadd.f32 %v8149_v13, %v8155_v33  ;;  %v7262_v13 = vpop.eup %7261 }
0x1c11   : > { %v5272_v33 = vsel %vm1091_vm6, %v7262_v13, 0.0 }
0x1c1c   : > { %v7007_v57 = vpop.f32.mrf.mxu0 }
0x1c1d   : > { %v8231_v59 = vadd.f32 %v7007_v57, %v4533_v60 }
0x1c1e   : > { %v5032_v37 = vpop.f32.mrf.mxu0 }
0x1c1f   : > { %v8235_v22 = vadd.f32 %v5032_v37, %v4528_v58 }
0x1c20   : > { %v7010_v63 = vpop.f32.mrf.mxu0 }
0x1c21   : > { %v8239_v39 = vadd.f32 %v7010_v63, %v4543_v40 }
0x1c22   : > { %v5042_v11 = vpop.f32.mrf.mxu0 }
0x1c23   : > { %v8241_v4 = vadd.f32 %v5042_v11, %v4538_v26 }
0x1c24   : > { %v7024_v0 = vpop.f32.mrf.mxu0 }
0x1c25   : > { %v5240_v12 = vmul.f32 0.35355338, %v7024_v0 }
0x1c26   : > { %v5228_v8 = vpop.f32.mrf.mxu0 }
0x1c27   : > { %v5239_v51 = vmul.f32 0.35355338, %v5228_v8  ;;  %v5244_v3 = vadd.f32 %v5240_v12, %v7558_v14 }
0x1c29   : > { %v5243_v5 = vadd.f32 %v5239_v51, %v7558_v14  ;;  %v5254_v6 = vsel %vm1091_vm6, %v5244_v3, -inf }
0x1c2b   : > { %v5251_v7 = vsel %vm1091_vm6, %v5243_v5, -inf }
0x1c2c   : > { %5252 = vmax.xlane.f32.xlu0 %v5251_v7 }
0x1c30   : > { %5255 = vmax.xlane.f32.xlu0 %v5254_v6 }
0x1c34   : > { %5273 = vadd.xlane.f32.xlu0 %v5272_v33  ;;  %v6381_v33 = vld [vmem:[%s7839_s11 + $0x30] sm:$0xff] }
0x1c84   : > { %v5271_v27 = vpop.xlane.xlu1 %5270 }
0x1c85   : > { %7263 = vrcp.f32 %v5271_v27  ;;  %v6380_v27 = vld [vmem:[%s7839_s11 + $0x28] sm:$0xff] }
0x1c88   : > { %v5292_v48 = vpop.permute.xlu1 %5291 }
0x1c89   : > { %7025 = vmatprep.subr.mxu1 %v5292_v48 }
0x1c8a   : > { %7026 = vmatpush3.msra.mxu1 %v5292_v48  ;;  %v6379_v48 = vld [vmem:[%s7839_s11 + $0x20] sm:$0xff] }
0x1c8c   : > { %v5379_v16 = vpop.permute.xlu1 %5378 }
0x1c8d   : > { %7032 = vmatprep.subr.mxu0 %v5379_v16 }
0x1c8e   : > { %7033 = vmatpush3.msra.mxu0 %v5379_v16 }
0x1c92   : > { %v7264_v18 = vpop.eup %7263 }
0x1c93   : > { %v5282_v14 = vmul.f32 %v7264_v18, %v7260_v50 }
0x1c95   : > { %7029 = vmatprep.mubr.msk.f32.mxu1 %vm1091_vm6, %v5282_v14 }
0x1cb5   : > { %v5253_v15 = vpop.xlane.xlu0 %5252 }
0x1cb6   : > { %v5259_v17 = vsub.f32 %v5243_v5, %v5253_v15 }
0x1cb8   : > { %v5265_v38 = vmul.f32 1.442695, %v5259_v17 }
0x1cb9   : > { %v5256_v44 = vpop.xlane.xlu0 %5255 }
0x1cba   : > { %7265 = vpow2.f32 %v5265_v38  ;;  %v5260_v25 = vsub.f32 %v5244_v3, %v5256_v44 }
0x1cbc   : > { %v5267_v28 = vmul.f32 1.442695, %v5260_v25 }
0x1cbd   : > { %v5274_v46 = vpop.xlane.xlu0 %5273 }
0x1cbe   : > { %7267 = vpow2.f32 %v5267_v28 }
0x1cbf   : > { %7269 = vrcp.f32 %v5274_v46 }
0x1cc7   : > { %v7266_v23 = vpop.eup %7265 }
0x1cc8   : > { %v5275_v49 = vsel %vm1091_vm6, %v7266_v23, 0.0 }
0x1cc9   : > { %5276 = vadd.xlane.f32.xlu1 %v5275_v49 }
0x1ccb   : > { %v7268_v34 = vpop.eup %7267 }
0x1ccc   : > { %v5278_v35 = vsel %vm1091_vm6, %v7268_v34, 0.0  ;;  %v7270_v29 = vpop.eup %7269 }
0x1ccd   : > { %5279 = vadd.xlane.f32.xlu0 %v5278_v35  ;;  %v5284_v21 = vmul.f32 %v7270_v29, %v7262_v13  ;;  %v6382_v13 = vld [vmem:[%s7839_s11 + $0x38] sm:$0xff] }
0x1cda   : > { %5376 = vrot.lane.b32.xlu1 %v7995_v42, %s8401_s29 }
0x1ce3   : > { %5289 = vrot.lane.b32.xlu0 %v7985_v24, %s8401_s29 }
0x1d52   : > { %v5277_v31 = vpop.xlane.xlu1 %5276 }
0x1d53   : > { %7271 = vrcp.f32 %v5277_v31 }
0x1d56   : > { %v5280_v32 = vpop.xlane.xlu0 %5279  ;;  %v5377_v43 = vpop.permute.xlu1 %5376 }
0x1d57   : > { %7273 = vrcp.f32 %v5280_v32  ;;  %7034 = vmatprep.subr.mxu0 %v5377_v43 }
0x1d58   : > { %7035 = vmatpush3.msra.mxu0 %v5377_v43 }
0x1d59   : > { %7047 = vmatprep.subr.mxu0 %v6382_v13 }
0x1d5a   : > { %v5290_v30 = vpop.permute.xlu0 %5289 }
0x1d5b   : > { %7027 = vmatprep.subr.mxu1 %v5290_v30 }
0x1d5c   : > { %7028 = vmatpush3.msra.mxu1 %v5290_v30 }
0x1d5d   : > { %7030 = vmatmul.mubr.msk.f32.vlgmr.msra.gmra.mxu1 %vm1091_vm6, %v5284_v21  ;;  %7039 = vmatprep.subr.mxu1 %v6311_v45 }
0x1d5e   : > { %7040 = vmatpush3.msra.mxu1 %v6311_v45 }
0x1d60   : > { %v7272_v42 = vpop.eup %7271 }
0x1d61   : > { %v5286_v52 = vmul.f32 %v7272_v42, %v7266_v23 }
0x1d63   : > { %7036 = vmatprep.mubr.msk.f32.mxu0 %vm1091_vm6, %v5286_v52 }
0x1d64   : > { %v7274_v24 = vpop.eup %7273 }
0x1d65   : > { %v5288_v62 = vmul.f32 %v7274_v24, %v7268_v34 }
0x1d67   : > { %7037 = vmatmul.mubr.msk.f32.vlgmr.msra.gmra.mxu0 %vm1091_vm6, %v5288_v62 }
0x1d68   : > { %7048 = vmatpush3.msra.mxu0 %v6382_v13  ;;  %v7304_v13 = vld [vmem:[%s7504_s20 + $0x2] sm:$0x3]  ;;  %s8402_s20 = sshll.u32 %s8404_s14, 1 }
0x1d69   : > { %7049 = vmatprep.subr.mxu0 %v6381_v33  ;;  %s534_s28 = scalar_lea.vmem %s8394_s10, %s8402_s20 }
0x1d6a   : > { %7050 = vmatpush3.msra.mxu0 %v6381_v33  ;;  %v5660_v33 = vrot.slane %v7304_v13, %v3024_v56 }
0x1d6b   : > { %7051 = vmatprep.subr.mxu0 %v6380_v27 }
0x1d6c   : > { %7052 = vmatpush3.msra.mxu0 %v6380_v27 }
0x1d6d   : > { %7053 = vmatprep.subr.mxu0 %v6379_v48 }
0x1d6e   : > { %7054 = vmatpush3.msra.mxu0 %v6379_v48 }
0x1e1d   : > { %v7031_v1 = vpop.f32.mrf.mxu1 }
0x1e1f   : > { %v5367_v53 = vpop.f32.mrf.mxu1 }
0x1e20   : > { %7041 = vmatprep.mubr.msk.f32.mxu1 %vm900_vm5, %v5367_v53 }
0x1e21   : > { %7042 = vmatmul.mubr.msk.f32.vlgmr.msra.gmra.mxu1 %vm900_vm5, %v7031_v1 }
0x1e27   : > { %v7038_v36 = vpop.f32.mrf.mxu0 }
0x1e29   : > { %v5454_v47 = vpop.f32.mrf.mxu0 }
0x1e2a   : > { %7044 = vmatprep.mubr.msk.f32.mxu1 %vm900_vm5, %v5454_v47 }
0x1e2b   : > { %7045 = vmatmul.mubr.msk.f32.gmra.mxu1 %vm900_vm5, %v7038_v36 }
0x1ee1   : > { %v7043_v50 = vpop.f32.mrf.mxu1 }
0x1ee2   : > { %v5561_v2 = vadd.f32 %v7043_v50, %v8231_v59 }
0x1ee3   : > { %v5541_v60 = vpop.f32.mrf.mxu1 }
0x1ee4   : > { %v5565_v55 = vadd.f32 %v5561_v2, %v7966_v10  ;;  %v5560_v57 = vadd.f32 %v5541_v60, %v8235_v22  ;;  %v6377_v60 = vld [vmem:[%s7473_s15 + $0x9] ss:$0 sm:$0xff] }
0x1ee6   : > { %v8267_v58 = vadd.f32 %v6376_v54, %v5565_v55  ;;  %v5564_v37 = vadd.f32 %v5560_v57, %v7963_v9 }
0x1ee8   : > { %v8270_v40 = vadd.f32 %v6376_v54, %v5564_v37  ;;  %v5579_v61 = vsel %vm674_vm4, %v8267_v58, 0.0  ;;  %v5593_v59 = vmul.f32 %v8267_v58, %v8267_v58 }
0x1ee9   : > { %5580 = vadd.xlane.f32.xlu1 %v5579_v61  ;;  %v6378_v61 = vld [vmem:[%s7473_s15 + $0xa] ss:$0 sm:$0xff] }
0x1eea   : > { %v5576_v63 = vsel %vm674_vm4, %v8270_v40, 0.0  ;;  %v5599_v0 = vsel %vm674_vm4, %v5593_v59, 0.0  ;;  %v5592_v8 = vmul.f32 %v8270_v40, %v8270_v40 }
0x1eeb   : > { %5577 = vadd.xlane.f32.xlu0 %v5576_v63  ;;  %v7046_v10 = vpop.f32.mrf.mxu1 }
0x1eec   : > { %v5563_v22 = vadd.f32 %v7046_v10, %v8239_v39  ;;  %v5596_v39 = vsel %vm674_vm4, %v5592_v8, 0.0 }
0x1eed   : > { %v5551_v26 = vpop.f32.mrf.mxu1 }
0x1eee   : > { %v5567_v11 = vadd.f32 %v5563_v22, %v7975_v20  ;;  %v5562_v9 = vadd.f32 %v5551_v26, %v8241_v4 }
0x1eef   : > { %5600 = vadd.xlane.f32.xlu0 %v5599_v0 }
0x1ef0   : > { %v5566_v12 = vadd.f32 %v5562_v9, %v7973_v19  ;;  %v8285_v51 = vadd.f32 %v6376_v54, %v5567_v11 }
0x1ef2   : > { %v8287_v5 = vadd.f32 %v6376_v54, %v5566_v12  ;;  %v5585_v19 = vsel %vm674_vm4, %v8285_v51, 0.0  ;;  %v5595_v3 = vmul.f32 %v8285_v51, %v8285_v51 }
0x1ef3   : > { %5597 = vadd.xlane.f32.xlu0 %v5596_v39  ;;  %v6393_v39 = vld [vmem:[%s7872_s12 + $0x70] sm:$0xff] }
0x1ef4   : > { %v5582_v20 = vsel %vm674_vm4, %v8287_v5, 0.0  ;;  %v5594_v4 = vmul.f32 %v8287_v5, %v8287_v5  ;;  %v5605_v6 = vsel %vm674_vm4, %v5595_v3, 0.0  ;;  %v6389_v3 = vld [vmem:[%s7872_s12 + $0x50] sm:$0xff] }
0x1ef5   : > { %5583 = vadd.xlane.f32.xlu1 %v5582_v20  ;;  %v6392_v20 = vld [vmem:[%s7872_s12 + $0x68] sm:$0xff] }
0x1ef6   : > { %v5602_v7 = vsel %vm674_vm4, %v5594_v4, 0.0  ;;  %v6391_v4 = vld [vmem:[%s7872_s12 + $0x60] sm:$0xff] }
0x1ef7   : > { %5586 = vadd.xlane.f32.xlu0 %v5585_v19  ;;  %v6390_v19 = vld [vmem:[%s7872_s12 + $0x58] sm:$0xff] }
0x1ef9   : > { %5603 = vadd.xlane.f32.xlu1 %v5602_v7  ;;  %v6388_v7 = vld [vmem:[%s7872_s12 + $0x48] sm:$0xff] }
0x1efb   : > { %5606 = vadd.xlane.f32.xlu0 %v5605_v6  ;;  %v6387_v6 = vld [vmem:[%s7872_s12 + $0x40] sm:$0xff] }
0x1f72   : > { %v5581_v16 = vpop.xlane.xlu1 %5580 }
0x1f73   : > { %v5589_v14 = vmul.f32 0.03125, %v5581_v16 }
0x1f74   : > { %v5578_v18 = vpop.xlane.xlu0 %5577 }
0x1f75   : > { %v5613_v17 = vmul.f32 %v5589_v14, %v5589_v14  ;;  %v5588_v38 = vmul.f32 0.03125, %v5578_v18  ;;  %v5621_v50 = vsub.f32 %v8267_v58, %v5589_v14 }
0x1f77   : > { %v5612_v23 = vmul.f32 %v5588_v38, %v5588_v38  ;;  %v5620_v54 = vsub.f32 %v8270_v40, %v5588_v38 }
0x1f78   : > { %v5601_v15 = vpop.xlane.xlu0 %5600 }
0x1f79   : > { %v5609_v44 = vmul.f32 0.03125, %v5601_v15 }
0x1f7b   : > { %v5617_v25 = vsub.f32 %v5609_v44, %v5613_v17 }
0x1f7c   : > { %v5598_v28 = vpop.xlane.xlu0 %5597 }
0x1f7d   : > { %v5625_v49 = vadd.f32 1e-12, %v5617_v25  ;;  %v5608_v34 = vmul.f32 0.03125, %v5598_v28 }
0x1f7e   : > { %v5584_v35 = vpop.xlane.xlu1 %5583 }
0x1f7f   : > { %7275 = vrsqrt.f32 %v5625_v49  ;;  %v5616_v46 = vsub.f32 %v5608_v34, %v5612_v23  ;;  %v5590_v31 = vmul.f32 0.03125, %v5584_v35 }
0x1f80   : > { %v5587_v32 = vpop.xlane.xlu0 %5586 }
0x1f81   : > { %v5624_v43 = vadd.f32 1e-12, %v5616_v46  ;;  %v5591_v29 = vmul.f32 0.03125, %v5587_v32  ;;  %v5614_v21 = vmul.f32 %v5590_v31, %v5590_v31  ;;  %v5622_v59 = vsub.f32 %v8287_v5, %v5590_v31 }
0x1f82   : > { %v5604_v30 = vpop.xlane.xlu1 %5603 }
0x1f83   : > { %7277 = vrsqrt.f32 %v5624_v43  ;;  %v5610_v42 = vmul.f32 0.03125, %v5604_v30  ;;  %v5615_v24 = vmul.f32 %v5591_v29, %v5591_v29  ;;  %v5623_v11 = vsub.f32 %v8285_v51, %v5591_v29  ;;  %v6394_v51 = vld [vmem:[%s7872_s12 + $0x78] sm:$0xff] }
0x1f84   : > { %v5607_v52 = vpop.xlane.xlu0 %5606  ;;  %7061 = vmatprep.subr.mxu1 %v6394_v51 }
0x1f85   : > { %v5618_v62 = vsub.f32 %v5610_v42, %v5614_v21  ;;  %v5611_v45 = vmul.f32 0.03125, %v5607_v52  ;;  %7062 = vmatpush3.msra.mxu1 %v6394_v51 }
0x1f86   : > { %7063 = vmatprep.subr.mxu1 %v6393_v39 }
0x1f87   : > { %v5626_v1 = vadd.f32 1e-12, %v5618_v62  ;;  %v5619_v53 = vsub.f32 %v5611_v45, %v5615_v24  ;;  %7064 = vmatpush3.msra.mxu1 %v6393_v39 }
0x1f88   : > { %7065 = vmatprep.subr.mxu1 %v6392_v20 }
0x1f89   : > { %7279 = vrsqrt.f32 %v5626_v1  ;;  %v5627_v36 = vadd.f32 1e-12, %v5619_v53  ;;  %7066 = vmatpush3.msra.mxu1 %v6392_v20 }
0x1f8a   : > { %7067 = vmatprep.subr.mxu1 %v6391_v4 }
0x1f8b   : > { %7281 = vrsqrt.f32 %v5627_v36  ;;  %7068 = vmatpush3.msra.mxu1 %v6391_v4 }
0x1f8c   : > { %v7276_v47 = vpop.eup %7275  ;;  %7069 = vmatprep.subr.mxu1 %v6390_v19 }
0x1f8d   : > { %v5633_v2 = vmul.f32 %v7276_v47, %v5621_v50  ;;  %7070 = vmatpush3.msra.mxu1 %v6390_v19 }
0x1f8e   : > { %7071 = vmatprep.subr.mxu1 %v6389_v3 }
0x1f8f   : > { %v5641_v37 = vmul.f32 %v6377_v60, %v5633_v2  ;;  %7072 = vmatpush3.msra.mxu1 %v6389_v3 }
0x1f90   : > { %v7278_v55 = vpop.eup %7277  ;;  %7073 = vmatprep.subr.mxu1 %v6388_v7 }
0x1f91   : > { %v5632_v57 = vmul.f32 %v7278_v55, %v5620_v54  ;;  %v5649_v26 = vadd.f32 %v6378_v61, %v5641_v37  ;;  %7074 = vmatpush3.msra.mxu1 %v6388_v7 }
0x1f92   : > { %7075 = vmatprep.subr.mxu1 %v6387_v6 }
0x1f93   : > { %v5640_v63 = vmul.f32 %v6377_v60, %v5632_v57  ;;  %7076 = vmatpush3.msra.mxu1 %v6387_v6 }
0x1f95   : > { %v8309_v10 = vadd.f32 %v6378_v61, %v5640_v63 }
0x1f96   : > { %v7280_v22 = vpop.eup %7279 }
0x1f97   : > { %7055 = vmatprep.mubr.msk.f32.mxu0 %vm674_vm4, %v8309_v10  ;;  %v5634_v58 = vmul.f32 %v7280_v22, %v5622_v59 }
0x1f98   : > { %v7282_v40 = vpop.eup %7281  ;;  %7056 = vmatmul.mubr.msk.f32.vlgmr.msra.gmra.mxu0 %vm674_vm4, %v5649_v26 }
0x1f99   : > { %v5642_v9 = vmul.f32 %v6377_v60, %v5634_v58  ;;  %v5635_v0 = vmul.f32 %v7282_v40, %v5623_v11 }
0x1f9b   : > { %v8315_v8 = vadd.f32 %v6378_v61, %v5642_v9  ;;  %v5643_v12 = vmul.f32 %v6377_v60, %v5635_v0 }
0x1f9d   : > { %7058 = vmatprep.mubr.msk.f32.mxu0 %vm674_vm4, %v8315_v8  ;;  %v5651_v5 = vadd.f32 %v6378_v61, %v5643_v12 }
0x1f9f   : > { %7059 = vmatmul.mubr.msk.f32.gmra.mxu0 %vm674_vm4, %v5651_v5 }
0x2058   : > { %v7057_v27 = vpop.f32.mrf.mxu0 }
0x2059   : > { %v8331_v48 = vadd.f32 %v7057_v27, %v5660_v33 }
0x205a   : > { %v5739_v16 = vpop.f32.mrf.mxu0 }
0x205b   : > { %v8334_v18 = vmul.f32 0.70710677, %v8331_v48  ;;  %v8336_v14 = vadd.f32 %v5739_v16, %v5660_v33 }
0x205d   : > { %v5767_v15 = vand.u32 2147483647, %v8334_v18  ;;  %v8340_v17 = vmul.f32 0.70710677, %v8336_v14  ;;  %vm5847_vm12 = vcmp.ge.f32.partialorder %v8334_v18, 0.0  ;;  %v5759_v18 = vmul.f32 0.5, %v8331_v48 }
0x205f   : > { %v5771_v38 = vmul.f32 0.3275911, %v5767_v15  ;;  %v5766_v44 = vand.u32 2147483647, %v8340_v17  ;;  %v7060_v25 = vpop.f32.mrf.mxu0  ;;  %v5823_v21 = vsub.f32 0.0, %v5767_v15  ;;  %vm5846_vm13 = vcmp.ge.f32.partialorder %v8340_v17, 0.0 }
0x2060   : > { %v8343_v41 = vadd.f32 %v7060_v25, %v5660_v33 }
0x2061   : > { %v5775_v56 = vadd.f32 1.0, %v5771_v38  ;;  %v5770_v28 = vmul.f32 0.3275911, %v5766_v44  ;;  %v5749_v23 = vpop.f32.mrf.mxu0  ;;  %v5822_v52 = vsub.f32 0.0, %v5766_v44  ;;  %v5827_v24 = vmul.f32 %v5823_v21, %v5767_v15 }
0x2062   : > { %v8346_v49 = vmul.f32 0.70710677, %v8343_v41  ;;  %v8348_v34 = vadd.f32 %v5749_v23, %v5660_v33 }
0x2063   : > { %7283 = vrcp.f32 %v5775_v56  ;;  %v5774_v35 = vadd.f32 1.0, %v5770_v28  ;;  %v5826_v45 = vmul.f32 %v5822_v52, %v5766_v44  ;;  %v5832_v36 = vmul.f32 1.442695, %v5827_v24 }
0x2064   : > { %v5769_v46 = vand.u32 2147483647, %v8346_v49  ;;  %v8352_v31 = vmul.f32 0.70710677, %v8348_v34  ;;  %vm5849_vm14 = vcmp.ge.f32.partialorder %v8346_v49, 0.0 }
0x2065   : > { %7285 = vrcp.f32 %v5774_v35  ;;  %v5830_v60 = vmul.f32 1.442695, %v5826_v45 }
0x2066   : > { %v5773_v32 = vmul.f32 0.3275911, %v5769_v46  ;;  %v5768_v43 = vand.u32 2147483647, %v8352_v31  ;;  %v5825_v1 = vsub.f32 0.0, %v5769_v46  ;;  %vm5848_vm15 = vcmp.ge.f32.partialorder %v8352_v31, 0.0 }
0x2068   : > { %v5777_v29 = vadd.f32 1.0, %v5773_v32  ;;  %v5772_v30 = vmul.f32 0.3275911, %v5768_v43  ;;  %v5824_v2 = vsub.f32 0.0, %v5768_v43  ;;  %v5829_v55 = vmul.f32 %v5825_v1, %v5769_v46 }
0x206a   : > { %7287 = vrcp.f32 %v5777_v29  ;;  %v5776_v42 = vadd.f32 1.0, %v5772_v30  ;;  %v5828_v59 = vmul.f32 %v5824_v2, %v5768_v43  ;;  %v5836_v11 = vmul.f32 1.442695, %v5829_v55 }
0x206b   : > { %v5758_v55 = vmul.f32 0.5, %v8336_v14 }
0x206c   : > { %7289 = vrcp.f32 %v5776_v42  ;;  %v5834_v51 = vmul.f32 1.442695, %v5828_v59 }
0x206d   : > { %7291 = vpow2.f32 %v5832_v36 }
0x206e   : > { %7293 = vpow2.f32 %v5830_v60 }
0x206f   : > { %7295 = vpow2.f32 %v5836_v11 }
0x2070   : > { %v7284_v62 = vpop.eup %7283  ;;  %7297 = vpow2.f32 %v5834_v51 }
0x2071   : > { %v5787_v53 = vmul.f32 1.0614054, %v7284_v62 }
0x2072   : > { %v7286_v47 = vpop.eup %7285 }
0x2073   : > { %v5791_v50 = vadd.f32 -1.4531521, %v5787_v53  ;;  %v5786_v54 = vmul.f32 1.0614054, %v7286_v47 }
0x2075   : > { %v5795_v57 = vmul.f32 %v7284_v62, %v5791_v50  ;;  %v5790_v37 = vadd.f32 -1.4531521, %v5786_v54 }
0x2077   : > { %v7288_v61 = vpop.eup %7287  ;;  %v5799_v63 = vadd.f32 1.4214138, %v5795_v57  ;;  %v5794_v22 = vmul.f32 %v7286_v47, %v5790_v37 }
0x2078   : > { %v5789_v26 = vmul.f32 1.0614054, %v7288_v61 }
0x2079   : > { %v5803_v58 = vmul.f32 %v7284_v62, %v5799_v63  ;;  %v7290_v40 = vpop.eup %7289  ;;  %v5798_v9 = vadd.f32 1.4214138, %v5794_v22 }
0x207a   : > { %v5793_v0 = vadd.f32 -1.4531521, %v5789_v26  ;;  %v5788_v5 = vmul.f32 1.0614054, %v7290_v40  ;;  %v7292_v38 = vpop.eup %7291 }
0x207b   : > { %v5807_v12 = vadd.f32 -0.28449672, %v5803_v58  ;;  %v5802_v39 = vmul.f32 %v7286_v47, %v5798_v9  ;;  %v7294_v46 = vpop.eup %7293  ;;  %v5760_v58 = vmul.f32 0.5, %v8348_v34 }
0x207c   : > { %v5797_v20 = vmul.f32 %v7288_v61, %v5793_v0  ;;  %v5792_v19 = vadd.f32 -1.4531521, %v5788_v5 }
0x207d   : > { %v5811_v4 = vmul.f32 %v7284_v62, %v5807_v12  ;;  %v5806_v3 = vadd.f32 -0.28449672, %v5802_v39  ;;  %v6395_v12 = vld [vmem:[%s7473_s15 + $0xb] ss:$0 sm:$0xff] }
0x207e   : > { %v5801_v7 = vadd.f32 1.4214138, %v5797_v20  ;;  %v5796_v13 = vmul.f32 %v7290_v40, %v5792_v19 }
0x207f   : > { %v5815_v6 = vadd.f32 0.2548296, %v5811_v4  ;;  %v5810_v33 = vmul.f32 %v7286_v47, %v5806_v3 }
0x2080   : > { %v5805_v27 = vmul.f32 %v7288_v61, %v5801_v7  ;;  %v5800_v15 = vadd.f32 1.4214138, %v5796_v13 }
0x2081   : > { %v5819_v16 = vmul.f32 %v7284_v62, %v5815_v6  ;;  %v5814_v44 = vadd.f32 0.2548296, %v5810_v33  ;;  %v7296_v62 = vpop.eup %7295 }
0x2082   : > { %v5809_v25 = vadd.f32 -0.28449672, %v5805_v27  ;;  %v5804_v28 = vmul.f32 %v7290_v40, %v5800_v15  ;;  %v7298_v50 = vpop.eup %7297 }
0x2083   : > { %v5839_v56 = vmul.f32 %v7292_v38, %v5819_v16  ;;  %v5818_v23 = vmul.f32 %v7286_v47, %v5814_v44 }
0x2084   : > { %v5813_v35 = vmul.f32 %v7288_v61, %v5809_v25  ;;  %v5808_v43 = vadd.f32 -0.28449672, %v5804_v28 }
0x2085   : > { %v5843_v32 = vsub.f32 1.0, %v5839_v56  ;;  %v5838_v29 = vmul.f32 %v7294_v46, %v5818_v23 }
0x2086   : > { %v5817_v30 = vadd.f32 0.2548296, %v5813_v35  ;;  %v5812_v42 = vmul.f32 %v7290_v40, %v5808_v43 }
0x2087   : > { %v5851_v21 = vsub.f32 0.0, %v5843_v32  ;;  %v5842_v52 = vsub.f32 1.0, %v5838_v29  ;;  %v6400_v29 = vld [vmem:[%s7473_s15 + $0xc] ss:$0 sm:$0xff] }
0x2088   : > { %v5821_v24 = vmul.f32 %v7288_v61, %v5817_v30  ;;  %v5816_v1 = vadd.f32 0.2548296, %v5812_v42 }
0x2089   : > { %v5855_v45 = vsel %vm5847_vm12, %v5843_v32, %v5851_v21  ;;  %v5850_v53 = vsub.f32 0.0, %v5842_v52  ;;  %v6401_v21 = vld [vmem:[%s7473_s15 + $0xd] ss:$0 sm:$0xff] }
0x208a   : > { %v5841_v36 = vmul.f32 %v7296_v62, %v5821_v24  ;;  %v5820_v47 = vmul.f32 %v7290_v40, %v5816_v1  ;;  %v5859_v2 = vadd.f32 1.0, %v5855_v45  ;;  %v5761_v40 = vmul.f32 0.5, %v8343_v41 }
0x208b   : > { %v5854_v54 = vsel %vm5846_vm13, %v5842_v52, %v5850_v53 }
0x208c   : > { %v5845_v60 = vsub.f32 1.0, %v5841_v36  ;;  %v5858_v57 = vadd.f32 1.0, %v5854_v54  ;;  %v5840_v37 = vmul.f32 %v7298_v50, %v5820_v47  ;;  %v5863_v22 = vmul.f32 %v5859_v2, %v5759_v18 }
0x208e   : > { %v5853_v63 = vsub.f32 0.0, %v5845_v60  ;;  %v5862_v61 = vmul.f32 %v5858_v57, %v5758_v55  ;;  %v5844_v59 = vsub.f32 1.0, %v5840_v37 }
0x2090   : > { %v5857_v26 = vsel %vm5849_vm14, %v5845_v60, %v5853_v63  ;;  %v5852_v17 = vsub.f32 0.0, %v5844_v59  ;;  %7077 = vmatprep.mubr.msk.f32.mxu1 %vm3243_vm9, %v5862_v61 }
0x2091   : > { %7078 = vmatmul.mubr.msk.f32.vlgmr.msra.gmra.mxu1 %vm3243_vm9, %v5863_v22  ;;  %v5861_v14 = vadd.f32 1.0, %v5857_v26 }
0x2092   : > { %v5856_v11 = vsel %vm5848_vm15, %v5844_v59, %v5852_v17 }
0x2093   : > { %v5860_v48 = vadd.f32 1.0, %v5856_v11  ;;  %v5865_v49 = vmul.f32 %v5861_v14, %v5761_v40 }
0x2095   : > { %v5864_v9 = vmul.f32 %v5860_v48, %v5760_v58 }
0x2097   : > { %7080 = vmatprep.mubr.msk.f32.mxu1 %vm3243_vm9, %v5864_v9 }
0x2098   : > { %7081 = vmatmul.mubr.msk.f32.gmra.mxu1 %vm3243_vm9, %v5865_v49 }
0x2151   : > { %v7079_v0 = vpop.f32.mrf.mxu1 }
0x2153   : > { %v5957_v5 = vpop.f32.mrf.mxu1 }
0x2154   : > { %v5958_v51 = vadd.f32 %v6395_v12, %v5957_v5 }
0x2156   : > { %v5974_v31 = vadd.f32 %v5958_v51, %v8309_v10 }
0x2158   : > { %v7082_v39 = vpop.f32.mrf.mxu1  ;;  %v5976_v20 = vsel %vm674_vm4, %v5974_v31, 0.0  ;;  %v5984_v4 = vmul.f32 %v5974_v31, %v5974_v31 }
0x2159   : > { %5977 = vadd.xlane.f32.xlu1 %v5976_v20 }
0x215a   : > { %v5966_v34 = vpop.f32.mrf.mxu1  ;;  %v5986_v41 = vsel %vm674_vm4, %v5984_v4, 0.0 }
0x215b   : > { %v5967_v19 = vadd.f32 %v6395_v12, %v5966_v34 }
0x215d   : > { %v5975_v3 = vadd.f32 %v5967_v19, %v8315_v8  ;;  %5987 = vadd.xlane.f32.xlu1 %v5986_v41 }
0x215f   : > { %v5979_v7 = vsel %vm674_vm4, %v5975_v3, 0.0  ;;  %v5985_v6 = vmul.f32 %v5975_v3, %v5975_v3 }
0x2160   : > { %5980 = vadd.xlane.f32.xlu0 %v5979_v7 }
0x2161   : > { %v5989_v13 = vsel %vm674_vm4, %v5985_v6, 0.0 }
0x2164   : > { %5990 = vadd.xlane.f32.xlu0 %v5989_v13 }
0x21e2   : > { %v5978_v10 = vpop.xlane.xlu1 %5977 }
0x21e3   : > { %v5982_v33 = vmul.f32 0.03125, %v5978_v10 }
0x21e5   : > { %v5994_v16 = vmul.f32 %v5982_v33, %v5982_v33  ;;  %v5998_v32 = vsub.f32 %v5974_v31, %v5982_v33 }
0x21e6   : > { %v5988_v27 = vpop.xlane.xlu1 %5987 }
0x21e7   : > { %v5992_v15 = vmul.f32 0.03125, %v5988_v27 }
0x21e9   : > { %v5996_v38 = vsub.f32 %v5992_v15, %v5994_v16  ;;  %v5981_v44 = vpop.xlane.xlu0 %5980 }
0x21ea   : > { %v5983_v25 = vmul.f32 0.03125, %v5981_v44 }
0x21eb   : > { %v6000_v8 = vadd.f32 1e-12, %v5996_v38 }
0x21ec   : > { %v5995_v28 = vmul.f32 %v5983_v25, %v5983_v25  ;;  %v5999_v24 = vsub.f32 %v5975_v3, %v5983_v25 }
0x21ed   : > { %7299 = vrsqrt.f32 %v6000_v8  ;;  %v5991_v56 = vpop.xlane.xlu0 %5990 }
0x21ee   : > { %v5993_v23 = vmul.f32 0.03125, %v5991_v56 }
0x21f0   : > { %v5997_v35 = vsub.f32 %v5993_v23, %v5995_v28 }
0x21f2   : > { %v6001_v46 = vadd.f32 1e-12, %v5997_v35 }
0x21f4   : > { %7301 = vrsqrt.f32 %v6001_v46 }
0x21fa   : > { %v7300_v43 = vpop.eup %7299 }
0x21fb   : > { %v6004_v30 = vmul.f32 %v7300_v43, %v5998_v32 }
0x21fd   : > { %v6010_v42 = vmul.f32 %v6400_v29, %v6004_v30 }
0x21ff   : > { %v6016_v52 = vadd.f32 %v6401_v21, %v6010_v42 }
0x2201   : > { %v7302_v62 = vpop.eup %7301  ;;  %6019 = vst.msk [vmem:[%s534_s28] sm:$0x1] %vm6018_vm0, %v6016_v52 }
0x2202   : > { %v6005_v45 = vmul.f32 %v7302_v62, %v5999_v24 }
0x2204   : > { %v6011_v1 = vmul.f32 %v6400_v29, %v6005_v45 }
0x2206   : > { %v6017_v53 = vadd.f32 %v6401_v21, %v6011_v1 }
0x2208   : > { %6020 = vst.msk [vmem:[%s534_s28 + $0x1] sm:$0x1] %vm6018_vm0, %v6017_v53 }
0x2209 PF: > { %s20_s13 = sadd.s32 1, %s7311_s13  }
0x220a   : > { %p17_p4 = scmp.ge.s32.totalorder %s20_s13, 4  }
0x220c   :  { %19 = sbr.rel (!%p17_p4) target bundleno = 1 (0x1), region = 122 }

</bundles_post_ra>
